<compile_context>
chip_gen: v7x
topology: tpu7x:2x2x1
jax: 0.10.0
libtpu: 0.0.40
codegen_flags: <defaults>
</compile_context>

<pallas_src>
import math

import jax
import jax.numpy as jnp
import numpy as np
from jax.experimental import pallas as pl
from jax.experimental.pallas import tpu as pltpu

DTYPE = jnp.bfloat16          # mirrors `DTYPE = torch.bfloat16`
LN_EPS = 1e-6

# ----------------------------- small Flux config -----------------------------
B = 2                          # batch
S_IMG = 16                     # image (latent patch) tokens
S_TXT = 8                      # text tokens
S_TOT = S_IMG + S_TXT
C_IN = 16                      # x_embedder input channels
JOINT_DIM = 32                 # context_embedder input dim
POOLED_DIM = 24                # pooled text projection dim
D = 32                         # inner_dim
NUM_HEADS = 2
HEAD_DIM = D // NUM_HEADS      # 16
FREQ_DIM = 32                  # sinusoidal timestep embedding dim
MLP_RATIO = 4
AXES_DIMS_ROPE = (4, 6, 6)     # sums to HEAD_DIM
NUM_DUAL_BLOCKS = 1
NUM_SINGLE_BLOCKS = 1
OUT_CHANNELS = C_IN
ATTN_SCALE = 1.0 / math.sqrt(HEAD_DIM)


# ======================== in-kernel math helpers (values) ====================
def _mm(x, w_ref, b_ref):
    """bf16 x bf16 MXU matmul with f32 accumulation + bias."""
    y = jnp.dot(x.astype(DTYPE), w_ref[...], preferred_element_type=jnp.float32)
    return y + b_ref[...].astype(jnp.float32)


def _silu(x):                                   # f32 VPU/EUP
    return x * jax.nn.sigmoid(x)


def _ln_mod(x, scale, shift):
    # LayerNorm (no affine, eps=1e-6) + adaLN modulation: LN(x)*(1+scale)+shift
    mean = jnp.mean(x, axis=-1, keepdims=True)
    xc = x - mean
    var = jnp.mean(xc * xc, axis=-1, keepdims=True)
    return (xc * jax.lax.rsqrt(var + LN_EPS)) * (1.0 + scale) + shift


def _rms(x, w):
    # RMSNorm over head_dim, weight multiply kept in f32 before any downcast.
    var = jnp.mean(x * x, axis=-1, keepdims=True)
    return x * jax.lax.rsqrt(var + LN_EPS) * w


def _rope(x, cos, sin, rotp):
    # Interleaved-pair rotation expressed as a tiny (dh,dh) +/-1 matmul (MXU),
    # avoiding in-kernel lane reshuffles:  y = x*cos + (x @ P)*sin
    rot = jnp.dot(x.astype(DTYPE), rotp, preferred_element_type=jnp.float32)
    return x * cos + rot * sin


def _attn_head(q, k, v_bf16):
    # softmax(q k^T * scale) v for one head; contraction on last dims (no k.T copy).
    s = jax.lax.dot_general(q.astype(DTYPE), k.astype(DTYPE),
                            (((1,), (1,)), ((), ())),
                            preferred_element_type=jnp.float32) * ATTN_SCALE
    m = jnp.max(s, axis=-1, keepdims=True)
    p = jnp.exp(s - m)
    denom = jnp.sum(p, axis=-1, keepdims=True)
    p = p * pl.reciprocal(denom, approx=True)          # EUP slot
    return jnp.dot(p.astype(DTYPE), v_bf16, preferred_element_type=jnp.float32)


# ============================== Pallas kernels ===============================
def _input_embed_kernel(hs_ref, enc_ref, xw, xb, cw, cb, hs_out_ref, enc_out_ref):
    # x_embedder + context_embedder (both nn.Linear), one batch element per step.
    hs_out_ref[...] = _mm(hs_ref[0], xw, xb)[None].astype(DTYPE)
    enc_out_ref[...] = _mm(enc_ref[0], cw, cb)[None].astype(DTYPE)


def _time_text_embed_kernel(tproj_ref, gproj_ref, pooled_ref,
                            t1w, t1b, t2w, t2b,
                            g1w, g1b, g2w, g2b,
                            p1w, p1b, p2w, p2b,
                            temb_out_ref):
    # CombinedTimestepGuidanceTextProjEmbeddings: three (linear -> SiLU -> linear) MLPs.
    def mlp(x, w1, b1, w2, b2):
        h = _mm(x, w1, b1)
        return _mm(_silu(h), w2, b2)

    temb = (mlp(tproj_ref[...], t1w, t1b, t2w, t2b)
            + mlp(gproj_ref[...], g1w, g1b, g2w, g2b)
            + mlp(pooled_ref[...], p1w, p1b, p2w, p2b))
    temb_out_ref[...] = temb.astype(DTYPE)


def _dual_block_kernel(hs_ref, enc_ref, temb_ref, cos_ref, sin_ref, rotp_ref,
                       adaln_w, adaln_b,
                       qkv_w, qkv_b, add_qkv_w, add_qkv_b,
                       nq_ref, nk_ref, naq_ref, nak_ref,
                       out_w, out_b, add_out_w, add_out_b,
                       ff1_w, ff1_b, ff2_w, ff2_b,
                       ffc1_w, ffc1_b, ffc2_w, ffc2_b,
                       hs_out_ref, enc_out_ref):
    Si = hs_ref.shape[1]
    St = enc_ref.shape[1]

    hs = hs_ref[0].astype(jnp.float32)            # (Si, D)
    enc = enc_ref[0].astype(jnp.float32)          # (St, D)
    temb = temb_ref[0].astype(jnp.float32)        # (1, D)
    cos = cos_ref[...].astype(jnp.float32)        # (S_tot, dh)
    sin = sin_ref[...].astype(jnp.float32)
    rotp = rotp_ref[...]                          # (dh, dh) bf16

    # ---- fused AdaLayerNormZero (norm1 + norm1_context): silu(temb) @ W -> 12 chunks
    emb = _mm(_silu(temb), adaln_w, adaln_b)      # (1, 12D) f32
    mods = [emb[:, i * D:(i + 1) * D] for i in range(12)]
    shift_msa, scale_msa, gate_msa, shift_mlp, scale_mlp, gate_mlp = mods[:6]
    c_shift_msa, c_scale_msa, c_gate_msa, c_shift_mlp, c_scale_mlp, c_gate_mlp = mods[6:]

    nh = _ln_mod(hs, scale_msa, shift_msa)
    ne = _ln_mod(enc, c_scale_msa, c_shift_msa)

    # ---- fused QKV projections (one matmul per stream, N = 3D)
    qkv_i = _mm(nh, qkv_w, qkv_b)                 # (Si, 3D) f32
    qkv_c = _mm(ne, add_qkv_w, add_qkv_b)         # (St, 3D) f32
    qi, ki, vi = (qkv_i[:, j * D:(j + 1) * D] for j in range(3))
    qc, kc, vc = (qkv_c[:, j * D:(j + 1) * D] for j in range(3))

    nq = nq_ref[...].astype(jnp.float32)
    nk = nk_ref[...].astype(jnp.float32)
    naq = naq_ref[...].astype(jnp.float32)
    nak = nak_ref[...].astype(jnp.float32)

    # ---- per-head RMSNorm + RoPE + attention (text tokens first, as in Flux)
    heads = []
    for h in range(NUM_HEADS):
        sl = slice(h * HEAD_DIM, (h + 1) * HEAD_DIM)
        q_h = jnp.concatenate([_rms(qc[:, sl], naq), _rms(qi[:, sl], nq)], axis=0)
        k_h = jnp.concatenate([_rms(kc[:, sl], nak), _rms(ki[:, sl], nk)], axis=0)
        v_h = jnp.concatenate([vc[:, sl], vi[:, sl]], axis=0).astype(DTYPE)
        q_h = _rope(q_h, cos, sin, rotp)
        k_h = _rope(k_h, cos, sin, rotp)
        heads.append(_attn_head(q_h, k_h, v_h))
    attn = jnp.concatenate(heads, axis=-1)        # (S_tot, D) f32

    ctx_attn = _mm(attn[:St, :], add_out_w, add_out_b)   # (St, D)
    img_attn = _mm(attn[St:, :], out_w, out_b)           # (Si, D)

    # ---- image stream residual + FF
    hs = hs + gate_msa * img_attn
    nh2 = _ln_mod(hs, scale_mlp, shift_mlp)
    ff_h = jax.nn.gelu(_mm(nh2, ff1_w, ff1_b), approximate=True)
    hs = hs + gate_mlp * _mm(ff_h, ff2_w, ff2_b)

    # ---- context stream residual + FF
    enc = enc + c_gate_msa * ctx_attn
    ne2 = _ln_mod(enc, c_scale_mlp, c_shift_mlp)
    ffc_h = jax.nn.gelu(_mm(ne2, ffc1_w, ffc1_b), approximate=True)
    enc = enc + c_gate_mlp * _mm(ffc_h, ffc2_w, ffc2_b)

    hs_out_ref[...] = hs[None].astype(DTYPE)
    enc_out_ref[...] = enc[None].astype(DTYPE)


def _single_block_kernel(hs_ref, temb_ref, cos_ref, sin_ref, rotp_ref,
                         norm_w, norm_b, qkv_w, qkv_b, nq_ref, nk_ref,
                         mlp_w, mlp_b, out_w, out_b,
                         hs_out_ref):
    hs = hs_ref[0].astype(jnp.float32)            # (S_tot, D)
    temb = temb_ref[0].astype(jnp.float32)        # (1, D)
    cos = cos_ref[...].astype(jnp.float32)
    sin = sin_ref[...].astype(jnp.float32)
    rotp = rotp_ref[...]
    nq = nq_ref[...].astype(jnp.float32)
    nk = nk_ref[...].astype(jnp.float32)

    # AdaLayerNormZeroSingle
    emb = _mm(_silu(temb), norm_w, norm_b)        # (1, 3D)
    shift, scale, gate = (emb[:, i * D:(i + 1) * D] for i in range(3))
    nh = _ln_mod(hs, scale, shift)

    mlp_h = jax.nn.gelu(_mm(nh, mlp_w, mlp_b), approximate=True)   # (S, 4D) f32

    qkv = _mm(nh, qkv_w, qkv_b)                   # (S, 3D) f32, fused QKV
    q, k, v = (qkv[:, j * D:(j + 1) * D] for j in range(3))

    heads = []
    for h in range(NUM_HEADS):
        sl = slice(h * HEAD_DIM, (h + 1) * HEAD_DIM)
        q_h = _rope(_rms(q[:, sl], nq), cos, sin, rotp)
        k_h = _rope(_rms(k[:, sl], nk), cos, sin, rotp)
        heads.append(_attn_head(q_h, k_h, v[:, sl].astype(DTYPE)))
    attn = jnp.concatenate(heads, axis=-1)        # (S, D) f32

    # proj_out([attn, mlp]) as two matmuls against row-slices of the fused weight
    # (mathematically identical, avoids materializing a (S, 5D) concat).
    w = out_w[...]                                # (5D, D) bf16
    out = (jnp.dot(attn.astype(DTYPE), w[:D, :], preferred_element_type=jnp.float32)
           + jnp.dot(mlp_h.astype(DTYPE), w[D:, :], preferred_element_type=jnp.float32)
           + out_b[...].astype(jnp.float32))

    hs_out_ref[...] = (hs + gate * out)[None].astype(DTYPE)


def _out_layers_kernel(hs_ref, temb_ref, norm_w, norm_b, proj_w, proj_b, out_ref):
    # drop text tokens, AdaLayerNormContinuous, proj_out
    n_txt = hs_ref.shape[1] - out_ref.shape[1]
    hs = hs_ref[0].astype(jnp.float32)[n_txt:, :]         # (S_img, D)
    temb = temb_ref[0].astype(jnp.float32)                # (1, D)
    emb = _mm(_silu(temb), norm_w, norm_b)                # (1, 2D) -> (scale, shift)
    scale, shift = emb[:, :D], emb[:, D:]
    y = _ln_mod(hs, scale, shift)
    out_ref[...] = _mm(y, proj_w, proj_b)[None].astype(DTYPE)


# ============================== spec helpers =================================
def _full_spec(shape):
    n = len(shape)
    return pl.BlockSpec(shape, lambda *_: (0,) * n)


def _batch_spec(shape):
    n = len(shape)
    return pl.BlockSpec(shape, lambda b: (b,) + (0,) * (n - 1))


_PARALLEL = pltpu.CompilerParams(dimension_semantics=("parallel",))


# ============================== kernel wrappers ==============================
def input_embed(params, hidden_states, encoder_hidden_states):
    Bb, Si, Ci = hidden_states.shape
    _, St, Cj = encoder_hidden_states.shape
    xw, xb = params["x_embedder"]["w"], params["x_embedder"]["b"]
    cw, cb = params["context_embedder"]["w"], params["context_embedder"]["b"]
    return pl.pallas_call(
        _input_embed_kernel,
        grid=(Bb,),
        out_shape=(jax.ShapeDtypeStruct((Bb, Si, D), DTYPE),
                   jax.ShapeDtypeStruct((Bb, St, D), DTYPE)),
        in_specs=[_batch_spec((1, Si, Ci)), _batch_spec((1, St, Cj)),
                  _full_spec(xw.shape), _full_spec(xb.shape),
                  _full_spec(cw.shape), _full_spec(cb.shape)],
        out_specs=(_batch_spec((1, Si, D)), _batch_spec((1, St, D))),
        compiler_params=_PARALLEL,
    )(hidden_states, encoder_hidden_states, xw, xb, cw, cb)


def time_text_embed(params, t_proj, g_proj, pooled):
    te, ge, pe = params["time_embed"], params["guidance_embed"], params["text_embed"]
    weights = (te["l1"]["w"], te["l1"]["b"], te["l2"]["w"], te["l2"]["b"],
               ge["l1"]["w"], ge["l1"]["b"], ge["l2"]["w"], ge["l2"]["b"],
               pe["l1"]["w"], pe["l1"]["b"], pe["l2"]["w"], pe["l2"]["b"])
    args = (t_proj, g_proj, pooled) + weights
    Bb = t_proj.shape[0]
    return pl.pallas_call(
        _time_text_embed_kernel,
        grid=(1,),
        out_shape=jax.ShapeDtypeStruct((Bb, D), DTYPE),
        in_specs=[_full_spec(a.shape) for a in args],
        out_specs=_full_spec((Bb, D)),
    )(*args)


def dual_block(bp, hs, enc, temb3, cos, sin, rotp):
    Bb, Si, _ = hs.shape
    _, St, _ = enc.shape
    weights = (bp["adaln"]["w"], bp["adaln"]["b"],
               bp["qkv"]["w"], bp["qkv"]["b"],
               bp["add_qkv"]["w"], bp["add_qkv"]["b"],
               bp["norm_q"], bp["norm_k"], bp["norm_add_q"], bp["norm_add_k"],
               bp["to_out"]["w"], bp["to_out"]["b"],
               bp["add_out"]["w"], bp["add_out"]["b"],
               bp["ff1"]["w"], bp["ff1"]["b"], bp["ff2"]["w"], bp["ff2"]["b"],
               bp["ff_c1"]["w"], bp["ff_c1"]["b"], bp["ff_c2"]["w"], bp["ff_c2"]["b"])
    hs_out, enc_out = pl.pallas_call(
        _dual_block_kernel,
        grid=(Bb,),
        out_shape=(jax.ShapeDtypeStruct((Bb, Si, D), DTYPE),
                   jax.ShapeDtypeStruct((Bb, St, D), DTYPE)),
        in_specs=([_batch_spec((1, Si, D)), _batch_spec((1, St, D)),
                   _batch_spec((1, 1, D))]
                  + [_full_spec(a.shape) for a in (cos, sin, rotp) + weights]),
        out_specs=(_batch_spec((1, Si, D)), _batch_spec((1, St, D))),
        compiler_params=_PARALLEL,
    )(hs, enc, temb3, cos, sin, rotp, *weights)
    return enc_out, hs_out


def single_block(bp, hs, temb3, cos, sin, rotp):
    Bb, St_tot, _ = hs.shape
    weights = (bp["norm"]["w"], bp["norm"]["b"],
               bp["qkv"]["w"], bp["qkv"]["b"],
               bp["norm_q"], bp["norm_k"],
               bp["proj_mlp"]["w"], bp["proj_mlp"]["b"],
               bp["proj_out"]["w"], bp["proj_out"]["b"])
    return pl.pallas_call(
        _single_block_kernel,
        grid=(Bb,),
        out_shape=jax.ShapeDtypeStruct((Bb, St_tot, D), DTYPE),
        in_specs=([_batch_spec((1, St_tot, D)), _batch_spec((1, 1, D))]
                  + [_full_spec(a.shape) for a in (cos, sin, rotp) + weights]),
        out_specs=_batch_spec((1, St_tot, D)),
        compiler_params=_PARALLEL,
    )(hs, temb3, cos, sin, rotp, *weights)


def out_layers(params, hs_full, temb3):
    Bb, St_tot, _ = hs_full.shape
    nw, nb = params["norm_out"]["w"], params["norm_out"]["b"]
    pw, pb = params["proj_out"]["w"], params["proj_out"]["b"]
    return pl.pallas_call(
        _out_layers_kernel,
        grid=(Bb,),
        out_shape=jax.ShapeDtypeStruct((Bb, S_IMG, OUT_CHANNELS), DTYPE),
        in_specs=[_batch_spec((1, St_tot, D)), _batch_spec((1, 1, D)),
                  _full_spec(nw.shape), _full_spec(nb.shape),
                  _full_spec(pw.shape), _full_spec(pb.shape)],
        out_specs=_batch_spec((1, S_IMG, OUT_CHANNELS)),
        compiler_params=_PARALLEL,
    )(hs_full, temb3, nw, nb, pw, pb)


# ============================ plain-JAX glue ops =============================
def sinusoidal_embedding(t, dim):
    # diffusers Timesteps(flip_sin_to_cos=True, downscale_freq_shift=0) -> [cos, sin]
    half = dim // 2
    exponent = -math.log(10000.0) * jnp.arange(half, dtype=jnp.float32) / half
    emb = t.astype(jnp.float32)[:, None] * jnp.exp(exponent)[None, :]
    return jnp.concatenate([jnp.cos(emb), jnp.sin(emb)], axis=-1)


def flux_rope(txt_ids, img_ids, axes_dims, theta=10000.0):
    # FluxPosEmbed: per-axis 1D rope (repeat_interleave), concatenated to HEAD_DIM.
    ids = jnp.concatenate([txt_ids, img_ids], axis=0)  # (S_tot, 3), text first
    cos_parts, sin_parts = [], []
    for i, d in enumerate(axes_dims):
        pos = ids[:, i].astype(jnp.float32)
        freqs = 1.0 / (theta ** (jnp.arange(0, d, 2, dtype=jnp.float32) / d))
        ang = pos[:, None] * freqs[None, :]
        cos_parts.append(jnp.repeat(jnp.cos(ang), 2, axis=-1))
        sin_parts.append(jnp.repeat(jnp.sin(ang), 2, axis=-1))
    return jnp.concatenate(cos_parts, -1), jnp.concatenate(sin_parts, -1)


def _rope_rotation_matrix(dh):
    # out = x @ P with out[2i] = -x[2i+1], out[2i+1] = x[2i]  (interleaved pair rotate)
    P = np.zeros((dh, dh), np.float32)
    for i in range(dh // 2):
        P[2 * i + 1, 2 * i] = -1.0
        P[2 * i, 2 * i + 1] = 1.0
    return jnp.asarray(P, DTYPE)


# ================================ full forward ===============================
def flux_transformer_forward(params, hidden_states, encoder_hidden_states,
                             pooled_projections, timestep, img_ids, txt_ids, guidance):
    # 1. x_embedder + context_embedder (fused Linear kernel)
    hs, enc = input_embed(params, hidden_states.astype(DTYPE),
                          encoder_hidden_states.astype(DTYPE))

    # 2. embedders_model: temb + rotary embeddings (timestep/guidance scaled *1000)
    t_proj = sinusoidal_embedding(timestep * 1000.0, FREQ_DIM).astype(DTYPE)
    g_proj = sinusoidal_embedding(guidance * 1000.0, FREQ_DIM).astype(DTYPE)
    temb = time_text_embed(params, t_proj, g_proj, pooled_projections.astype(DTYPE))
    temb3 = temb[:, None, :]                                      # (B, 1, D)

    cos, sin = flux_rope(txt_ids, img_ids, AXES_DIMS_ROPE)
    cos, sin = cos.astype(DTYPE), sin.astype(DTYPE)               # image_rotary_emb.type(DTYPE)
    rotp = params["rope_rot"]

    # 3. dual-stream transformer blocks (one fused kernel each)
    for bp in params["dual_blocks"]:
        enc, hs = dual_block(bp, hs, enc, temb3, cos, sin, rotp)

    # 4. concat text tokens in front of image tokens
    hs_full = jnp.concatenate([enc, hs], axis=1)                  # (B, S_tot, D)

    # 5. single-stream transformer blocks (one fused kernel each)
    for bp in params["single_blocks"]:
        hs_full = single_block(bp, hs_full, temb3, cos, sin, rotp)

    # 6. out_layers_model: drop text tokens, AdaLayerNormContinuous, proj_out
    return out_layers(params, hs_full, temb3)


# ============================ parameter initialization =======================
def _lin(key, din, dout, scale=0.02):
    kw, kb = jax.random.split(key)
    return {"w": (scale * jax.random.normal(kw, (din, dout), jnp.float32)).astype(DTYPE),
            "b": (scale * jax.random.normal(kb, (1, dout), jnp.float32)).astype(DTYPE)}


def _init_dual_block(key):
    ks = iter(jax.random.split(key, 16))
    nxt = lambda: next(ks)
    return {
        # fused norm1 + norm1_context adaLN projection (chunks 0-5 image, 6-11 context)
        "adaln": _lin(nxt(), D, 12 * D),
        # fused to_q/to_k/to_v and add_q/add_k/add_v
        "qkv": _lin(nxt(), D, 3 * D), "add_qkv": _lin(nxt(), D, 3 * D),
        "norm_q": jnp.ones((1, HEAD_DIM), DTYPE), "norm_k": jnp.ones((1, HEAD_DIM), DTYPE),
        "norm_add_q": jnp.ones((1, HEAD_DIM), DTYPE), "norm_add_k": jnp.ones((1, HEAD_DIM), DTYPE),
        "to_out": _lin(nxt(), D, D), "add_out": _lin(nxt(), D, D),
        "ff1": _lin(nxt(), D, MLP_RATIO * D), "ff2": _lin(nxt(), MLP_RATIO * D, D),
        "ff_c1": _lin(nxt(), D, MLP_RATIO * D), "ff_c2": _lin(nxt(), MLP_RATIO * D, D),
    }


def _init_single_block(key):
    ks = iter(jax.random.split(key, 8))
    nxt = lambda: next(ks)
    return {
        "norm": _lin(nxt(), D, 3 * D),
        "qkv": _lin(nxt(), D, 3 * D),                      # fused to_q/to_k/to_v
        "norm_q": jnp.ones((1, HEAD_DIM), DTYPE), "norm_k": jnp.ones((1, HEAD_DIM), DTYPE),
        "proj_mlp": _lin(nxt(), D, MLP_RATIO * D),
        "proj_out": _lin(nxt(), (1 + MLP_RATIO) * D, D),   # rows [0:D]=attn, [D:]=mlp
    }


def init_params(key):
    ks = iter(jax.random.split(key, 32))
    nxt = lambda: next(ks)
    return {
        "x_embedder": _lin(nxt(), C_IN, D),
        "context_embedder": _lin(nxt(), JOINT_DIM, D),
        "time_embed": {"l1": _lin(nxt(), FREQ_DIM, D), "l2": _lin(nxt(), D, D)},
        "guidance_embed": {"l1": _lin(nxt(), FREQ_DIM, D), "l2": _lin(nxt(), D, D)},
        "text_embed": {"l1": _lin(nxt(), POOLED_DIM, D), "l2": _lin(nxt(), D, D)},
        "dual_blocks": [_init_dual_block(nxt()) for _ in range(NUM_DUAL_BLOCKS)],
        "single_blocks": [_init_single_block(nxt()) for _ in range(NUM_SINGLE_BLOCKS)],
        "norm_out": _lin(nxt(), D, 2 * D),
        "proj_out": _lin(nxt(), D, OUT_CHANNELS),
        "rope_rot": _rope_rotation_matrix(HEAD_DIM),
    }


# ==================================== main ===================================
if __name__ == "__main__":
    root = jax.random.PRNGKey(0)
    pkey, dkey = jax.random.split(root)
    params = init_params(pkey)

    ks = jax.random.split(dkey, 3)
    hidden_states = jax.random.normal(ks[0], (B, S_IMG, C_IN), jnp.float32).astype(DTYPE)
    encoder_hidden_states = jax.random.normal(ks[1], (B, S_TXT, JOINT_DIM), jnp.float32).astype(DTYPE)
    pooled_projections = jax.random.normal(ks[2], (B, POOLED_DIM), jnp.float32).astype(DTYPE)
    timestep = jnp.array([0.5, 0.9], dtype=jnp.float32)
    guidance = jnp.array([3.5, 3.5], dtype=jnp.float32)

    side = int(math.sqrt(S_IMG))
    rows = jnp.repeat(jnp.arange(side), side)
    cols = jnp.tile(jnp.arange(side), side)
    img_ids = jnp.stack([jnp.zeros_like(rows), rows, cols], axis=-1).astype(jnp.float32)
    txt_ids = jnp.zeros((S_TXT, 3), dtype=jnp.float32)

    fwd = jax.jit(flux_transformer_forward)
    out = fwd(params, hidden_states, encoder_hidden_states, pooled_projections,
              timestep, img_ids, txt_ids, guidance)
    out = jax.block_until_ready(out)
    assert out.shape == (B, S_IMG, OUT_CHANNELS) and out.dtype == DTYPE
    print("KERNEL_OK")
</pallas_src>

<mosaic_0001>
module attributes {stable_mosaic.version = 11 : i64} {
  func.func @_time_text_embed_kernel(%arg0: i32, %arg1: memref<2x32xbf16, #tpu.memory_space<vmem>>, %arg2: memref<2x32xbf16, #tpu.memory_space<vmem>>, %arg3: memref<2x24xbf16, #tpu.memory_space<vmem>>, %arg4: memref<32x32xbf16, #tpu.memory_space<vmem>>, %arg5: memref<1x32xbf16, #tpu.memory_space<vmem>>, %arg6: memref<32x32xbf16, #tpu.memory_space<vmem>>, %arg7: memref<1x32xbf16, #tpu.memory_space<vmem>>, %arg8: memref<32x32xbf16, #tpu.memory_space<vmem>>, %arg9: memref<1x32xbf16, #tpu.memory_space<vmem>>, %arg10: memref<32x32xbf16, #tpu.memory_space<vmem>>, %arg11: memref<1x32xbf16, #tpu.memory_space<vmem>>, %arg12: memref<24x32xbf16, #tpu.memory_space<vmem>>, %arg13: memref<1x32xbf16, #tpu.memory_space<vmem>>, %arg14: memref<32x32xbf16, #tpu.memory_space<vmem>>, %arg15: memref<1x32xbf16, #tpu.memory_space<vmem>>, %arg16: memref<2x32xbf16, #tpu.memory_space<vmem>>) attributes {dimension_semantics = [#tpu.dimension_semantics<arbitrary>], iteration_bounds = array<i64: 1>, scalar_prefetch = 0 : i64, scratch_operands = 0 : i64, tpu.core_type = #tpu.core_type<tc>, window_params = [{pipeline_mode = #tpu.pipeline_mode<synchronous>, transform_indices = @transform_0, window_bounds = array<i64: 2, 32>}, {pipeline_mode = #tpu.pipeline_mode<synchronous>, transform_indices = @transform_1, window_bounds = array<i64: 2, 32>}, {pipeline_mode = #tpu.pipeline_mode<synchronous>, transform_indices = @transform_2, window_bounds = array<i64: 2, 24>}, {pipeline_mode = #tpu.pipeline_mode<synchronous>, transform_indices = @transform_3, window_bounds = array<i64: 32, 32>}, {pipeline_mode = #tpu.pipeline_mode<synchronous>, transform_indices = @transform_4, window_bounds = array<i64: 1, 32>}, {pipeline_mode = #tpu.pipeline_mode<synchronous>, transform_indices = @transform_5, window_bounds = array<i64: 32, 32>}, {pipeline_mode = #tpu.pipeline_mode<synchronous>, transform_indices = @transform_6, window_bounds = array<i64: 1, 32>}, {pipeline_mode = #tpu.pipeline_mode<synchronous>, transform_indices = @transform_7, window_bounds = array<i64: 32, 32>}, {pipeline_mode = #tpu.pipeline_mode<synchronous>, transform_indices = @transform_8, window_bounds = array<i64: 1, 32>}, {pipeline_mode = #tpu.pipeline_mode<synchronous>, transform_indices = @transform_9, window_bounds = array<i64: 32, 32>}, {pipeline_mode = #tpu.pipeline_mode<synchronous>, transform_indices = @transform_10, window_bounds = array<i64: 1, 32>}, {pipeline_mode = #tpu.pipeline_mode<synchronous>, transform_indices = @transform_11, window_bounds = array<i64: 24, 32>}, {pipeline_mode = #tpu.pipeline_mode<synchronous>, transform_indices = @transform_12, window_bounds = array<i64: 1, 32>}, {pipeline_mode = #tpu.pipeline_mode<synchronous>, transform_indices = @transform_13, window_bounds = array<i64: 32, 32>}, {pipeline_mode = #tpu.pipeline_mode<synchronous>, transform_indices = @transform_14, window_bounds = array<i64: 1, 32>}, {pipeline_mode = #tpu.pipeline_mode<synchronous>, transform_indices = @transform_15, window_bounds = array<i64: 2, 32>}]} {
    %c0 = arith.constant 0 : index
    %c0_0 = arith.constant 0 : index
    %0 = vector.load %arg1[%c0, %c0_0] : memref<2x32xbf16, #tpu.memory_space<vmem>>, vector<2x32xbf16>
    %c0_1 = arith.constant 0 : index
    %c0_2 = arith.constant 0 : index
    %1 = vector.load %arg4[%c0_1, %c0_2] : memref<32x32xbf16, #tpu.memory_space<vmem>>, vector<32x32xbf16>
    %cst = arith.constant dense<0.000000e+00> : vector<2x32xf32>
    %2 = tpu.matmul %0, %1, %cst {dimension_numbers = #tpu.dot_dimension_numbers<[1], [0], [0], [1], [0, 0, 1, 1], [], []>} : vector<2x32xbf16>, vector<32x32xbf16>, vector<2x32xf32> -> vector<2x32xf32>
    %c0_3 = arith.constant 0 : index
    %c0_4 = arith.constant 0 : index
    %3 = vector.load %arg5[%c0_3, %c0_4] : memref<1x32xbf16, #tpu.memory_space<vmem>>, vector<1x32xbf16>
    %4 = arith.extf %3 : vector<1x32xbf16> to vector<1x32xf32>
    %5 = vector.broadcast %4 : vector<1x32xf32> to vector<2x32xf32>
    %6 = arith.addf %2, %5 : vector<2x32xf32>
    %7 = arith.negf %6 : vector<2x32xf32>
    %8 = math.exp %7 : vector<2x32xf32>
    %cst_5 = arith.constant 1.000000e+00 : f32
    %9 = vector.broadcast %cst_5 : f32 to vector<2x32xf32>
    %10 = arith.addf %9, %8 : vector<2x32xf32>
    %11 = arith.divf %9, %10 : vector<2x32xf32>
    %12 = arith.mulf %6, %11 : vector<2x32xf32>
    %13 = arith.truncf %12 : vector<2x32xf32> to vector<2x32xbf16>
    %c0_6 = arith.constant 0 : index
    %c0_7 = arith.constant 0 : index
    %14 = vector.load %arg6[%c0_6, %c0_7] : memref<32x32xbf16, #tpu.memory_space<vmem>>, vector<32x32xbf16>
    %cst_8 = arith.constant dense<0.000000e+00> : vector<2x32xf32>
    %15 = tpu.matmul %13, %14, %cst_8 {dimension_numbers = #tpu.dot_dimension_numbers<[1], [0], [0], [1], [0, 0, 1, 1], [], []>} : vector<2x32xbf16>, vector<32x32xbf16>, vector<2x32xf32> -> vector<2x32xf32>
    %c0_9 = arith.constant 0 : index
    %c0_10 = arith.constant 0 : index
    %16 = vector.load %arg7[%c0_9, %c0_10] : memref<1x32xbf16, #tpu.memory_space<vmem>>, vector<1x32xbf16>
    %17 = arith.extf %16 : vector<1x32xbf16> to vector<1x32xf32>
    %18 = vector.broadcast %17 : vector<1x32xf32> to vector<2x32xf32>
    %19 = arith.addf %15, %18 : vector<2x32xf32>
    %c0_11 = arith.constant 0 : index
    %c0_12 = arith.constant 0 : index
    %20 = vector.load %arg2[%c0_11, %c0_12] : memref<2x32xbf16, #tpu.memory_space<vmem>>, vector<2x32xbf16>
    %c0_13 = arith.constant 0 : index
    %c0_14 = arith.constant 0 : index
    %21 = vector.load %arg8[%c0_13, %c0_14] : memref<32x32xbf16, #tpu.memory_space<vmem>>, vector<32x32xbf16>
    %cst_15 = arith.constant dense<0.000000e+00> : vector<2x32xf32>
    %22 = tpu.matmul %20, %21, %cst_15 {dimension_numbers = #tpu.dot_dimension_numbers<[1], [0], [0], [1], [0, 0, 1, 1], [], []>} : vector<2x32xbf16>, vector<32x32xbf16>, vector<2x32xf32> -> vector<2x32xf32>
    %c0_16 = arith.constant 0 : index
    %c0_17 = arith.constant 0 : index
    %23 = vector.load %arg9[%c0_16, %c0_17] : memref<1x32xbf16, #tpu.memory_space<vmem>>, vector<1x32xbf16>
    %24 = arith.extf %23 : vector<1x32xbf16> to vector<1x32xf32>
    %25 = vector.broadcast %24 : vector<1x32xf32> to vector<2x32xf32>
    %26 = arith.addf %22, %25 : vector<2x32xf32>
    %27 = arith.negf %26 : vector<2x32xf32>
    %28 = math.exp %27 : vector<2x32xf32>
    %cst_18 = arith.constant 1.000000e+00 : f32
    %29 = vector.broadcast %cst_18 : f32 to vector<2x32xf32>
    %30 = arith.addf %29, %28 : vector<2x32xf32>
    %31 = arith.divf %29, %30 : vector<2x32xf32>
    %32 = arith.mulf %26, %31 : vector<2x32xf32>
    %33 = arith.truncf %32 : vector<2x32xf32> to vector<2x32xbf16>
    %c0_19 = arith.constant 0 : index
    %c0_20 = arith.constant 0 : index
    %34 = vector.load %arg10[%c0_19, %c0_20] : memref<32x32xbf16, #tpu.memory_space<vmem>>, vector<32x32xbf16>
    %cst_21 = arith.constant dense<0.000000e+00> : vector<2x32xf32>
    %35 = tpu.matmul %33, %34, %cst_21 {dimension_numbers = #tpu.dot_dimension_numbers<[1], [0], [0], [1], [0, 0, 1, 1], [], []>} : vector<2x32xbf16>, vector<32x32xbf16>, vector<2x32xf32> -> vector<2x32xf32>
    %c0_22 = arith.constant 0 : index
    %c0_23 = arith.constant 0 : index
    %36 = vector.load %arg11[%c0_22, %c0_23] : memref<1x32xbf16, #tpu.memory_space<vmem>>, vector<1x32xbf16>
    %37 = arith.extf %36 : vector<1x32xbf16> to vector<1x32xf32>
    %38 = vector.broadcast %37 : vector<1x32xf32> to vector<2x32xf32>
    %39 = arith.addf %35, %38 : vector<2x32xf32>
    %40 = arith.addf %19, %39 : vector<2x32xf32>
    %c0_24 = arith.constant 0 : index
    %c0_25 = arith.constant 0 : index
    %41 = vector.load %arg3[%c0_24, %c0_25] : memref<2x24xbf16, #tpu.memory_space<vmem>>, vector<2x24xbf16>
    %c0_26 = arith.constant 0 : index
    %c0_27 = arith.constant 0 : index
    %42 = vector.load %arg12[%c0_26, %c0_27] : memref<24x32xbf16, #tpu.memory_space<vmem>>, vector<24x32xbf16>
    %cst_28 = arith.constant dense<0.000000e+00> : vector<2x32xf32>
    %43 = tpu.matmul %41, %42, %cst_28 {dimension_numbers = #tpu.dot_dimension_numbers<[1], [0], [0], [1], [0, 0, 1, 1], [], []>} : vector<2x24xbf16>, vector<24x32xbf16>, vector<2x32xf32> -> vector<2x32xf32>
    %c0_29 = arith.constant 0 : index
    %c0_30 = arith.constant 0 : index
    %44 = vector.load %arg13[%c0_29, %c0_30] : memref<1x32xbf16, #tpu.memory_space<vmem>>, vector<1x32xbf16>
    %45 = arith.extf %44 : vector<1x32xbf16> to vector<1x32xf32>
    %46 = vector.broadcast %45 : vector<1x32xf32> to vector<2x32xf32>
    %47 = arith.addf %43, %46 : vector<2x32xf32>
    %48 = arith.negf %47 : vector<2x32xf32>
    %49 = math.exp %48 : vector<2x32xf32>
    %cst_31 = arith.constant 1.000000e+00 : f32
    %50 = vector.broadcast %cst_31 : f32 to vector<2x32xf32>
    %51 = arith.addf %50, %49 : vector<2x32xf32>
    %52 = arith.divf %50, %51 : vector<2x32xf32>
    %53 = arith.mulf %47, %52 : vector<2x32xf32>
    %54 = arith.truncf %53 : vector<2x32xf32> to vector<2x32xbf16>
    %c0_32 = arith.constant 0 : index
    %c0_33 = arith.constant 0 : index
    %55 = vector.load %arg14[%c0_32, %c0_33] : memref<32x32xbf16, #tpu.memory_space<vmem>>, vector<32x32xbf16>
    %cst_34 = arith.constant dense<0.000000e+00> : vector<2x32xf32>
    %56 = tpu.matmul %54, %55, %cst_34 {dimension_numbers = #tpu.dot_dimension_numbers<[1], [0], [0], [1], [0, 0, 1, 1], [], []>} : vector<2x32xbf16>, vector<32x32xbf16>, vector<2x32xf32> -> vector<2x32xf32>
    %c0_35 = arith.constant 0 : index
    %c0_36 = arith.constant 0 : index
    %57 = vector.load %arg15[%c0_35, %c0_36] : memref<1x32xbf16, #tpu.memory_space<vmem>>, vector<1x32xbf16>
    %58 = arith.extf %57 : vector<1x32xbf16> to vector<1x32xf32>
    %59 = vector.broadcast %58 : vector<1x32xf32> to vector<2x32xf32>
    %60 = arith.addf %56, %59 : vector<2x32xf32>
    %61 = arith.addf %40, %60 : vector<2x32xf32>
    %62 = arith.truncf %61 : vector<2x32xf32> to vector<2x32xbf16>
    %c0_37 = arith.constant 0 : index
    %c0_38 = arith.constant 0 : index
    %63 = vector.load %arg16[%c0_37, %c0_38] : memref<2x32xbf16, #tpu.memory_space<vmem>>, vector<2x32xbf16>
    tpu.vector_store %arg16[%c0_37, %c0_38], %62 {strides = array<i32>} : memref<2x32xbf16, #tpu.memory_space<vmem>>, vector<2x32xbf16>,
    return
  }
  func.func @transform_0(%arg0: i32) -> (i32, i32) {
    %c0_i32 = arith.constant 0 : i32
    %c0_i32_0 = arith.constant 0 : i32
    %c0_i32_1 = arith.constant 0 : i32
    return %c0_i32, %c0_i32_0 : i32, i32
  }
  func.func @transform_1(%arg0: i32) -> (i32, i32) {
    %c0_i32 = arith.constant 0 : i32
    %c0_i32_0 = arith.constant 0 : i32
    %c0_i32_1 = arith.constant 0 : i32
    return %c0_i32, %c0_i32_0 : i32, i32
  }
  func.func @transform_2(%arg0: i32) -> (i32, i32) {
    %c0_i32 = arith.constant 0 : i32
    %c0_i32_0 = arith.constant 0 : i32
    %c0_i32_1 = arith.constant 0 : i32
    return %c0_i32, %c0_i32_0 : i32, i32
  }
  func.func @transform_3(%arg0: i32) -> (i32, i32) {
    %c0_i32 = arith.constant 0 : i32
    %c0_i32_0 = arith.constant 0 : i32
    %c0_i32_1 = arith.constant 0 : i32
    return %c0_i32, %c0_i32_0 : i32, i32
  }
  func.func @transform_4(%arg0: i32) -> (i32, i32) {
    %c0_i32 = arith.constant 0 : i32
    %c0_i32_0 = arith.constant 0 : i32
    %c0_i32_1 = arith.constant 0 : i32
    return %c0_i32, %c0_i32_0 : i32, i32
  }
  func.func @transform_5(%arg0: i32) -> (i32, i32) {
    %c0_i32 = arith.constant 0 : i32
    %c0_i32_0 = arith.constant 0 : i32
    %c0_i32_1 = arith.constant 0 : i32
    return %c0_i32, %c0_i32_0 : i32, i32
  }
  func.func @transform_6(%arg0: i32) -> (i32, i32) {
    %c0_i32 = arith.constant 0 : i32
    %c0_i32_0 = arith.constant 0 : i32
    %c0_i32_1 = arith.constant 0 : i32
    return %c0_i32, %c0_i32_0 : i32, i32
  }
  func.func @transform_7(%arg0: i32) -> (i32, i32) {
    %c0_i32 = arith.constant 0 : i32
    %c0_i32_0 = arith.constant 0 : i32
    %c0_i32_1 = arith.constant 0 : i32
    return %c0_i32, %c0_i32_0 : i32, i32
  }
  func.func @transform_8(%arg0: i32) -> (i32, i32) {
    %c0_i32 = arith.constant 0 : i32
    %c0_i32_0 = arith.constant 0 : i32
    %c0_i32_1 = arith.constant 0 : i32
    return %c0_i32, %c0_i32_0 : i32, i32
  }
  func.func @transform_9(%arg0: i32) -> (i32, i32) {
    %c0_i32 = arith.constant 0 : i32
    %c0_i32_0 = arith.constant 0 : i32
    %c0_i32_1 = arith.constant 0 : i32
    return %c0_i32, %c0_i32_0 : i32, i32
  }
  func.func @transform_10(%arg0: i32) -> (i32, i32) {
    %c0_i32 = arith.constant 0 : i32
    %c0_i32_0 = arith.constant 0 : i32
    %c0_i32_1 = arith.constant 0 : i32
    return %c0_i32, %c0_i32_0 : i32, i32
  }
  func.func @transform_11(%arg0: i32) -> (i32, i32) {
    %c0_i32 = arith.constant 0 : i32
    %c0_i32_0 = arith.constant 0 : i32
    %c0_i32_1 = arith.constant 0 : i32
    return %c0_i32, %c0_i32_0 : i32, i32
  }
  func.func @transform_12(%arg0: i32) -> (i32, i32) {
    %c0_i32 = arith.constant 0 : i32
    %c0_i32_0 = arith.constant 0 : i32
    %c0_i32_1 = arith.constant 0 : i32
    return %c0_i32, %c0_i32_0 : i32, i32
  }
  func.func @transform_13(%arg0: i32) -> (i32, i32) {
    %c0_i32 = arith.constant 0 : i32
    %c0_i32_0 = arith.constant 0 : i32
    %c0_i32_1 = arith.constant 0 : i32
    return %c0_i32, %c0_i32_0 : i32, i32
  }
  func.func @transform_14(%arg0: i32) -> (i32, i32) {
    %c0_i32 = arith.constant 0 : i32
    %c0_i32_0 = arith.constant 0 : i32
    %c0_i32_1 = arith.constant 0 : i32
    return %c0_i32, %c0_i32_0 : i32, i32
  }
  func.func @transform_15(%arg0: i32) -> (i32, i32) {
    %c0_i32 = arith.constant 0 : i32
    %c0_i32_0 = arith.constant 0 : i32
    %c0_i32_1 = arith.constant 0 : i32
    return %c0_i32, %c0_i32_0 : i32, i32
  }
}

module attributes {stable_mosaic.version = 11 : i64} {
  func.func @_input_embed_kernel(%arg0: i32, %arg1: memref<1x16x16xbf16, #tpu.memory_space<vmem>>, %arg2: memref<1x8x32xbf16, #tpu.memory_space<vmem>>, %arg3: memref<16x32xbf16, #tpu.memory_space<vmem>>, %arg4: memref<1x32xbf16, #tpu.memory_space<vmem>>, %arg5: memref<32x32xbf16, #tpu.memory_space<vmem>>, %arg6: memref<1x32xbf16, #tpu.memory_space<vmem>>, %arg7: memref<1x16x32xbf16, #tpu.memory_space<vmem>>, %arg8: memref<1x8x32xbf16, #tpu.memory_space<vmem>>) attributes {dimension_semantics = [#tpu.dimension_semantics<parallel>], iteration_bounds = array<i64: 2>, scalar_prefetch = 0 : i64, scratch_operands = 0 : i64, tpu.core_type = #tpu.core_type<tc>, window_params = [{transform_indices = @transform_0, window_bounds = array<i64: 1, 16, 16>}, {transform_indices = @transform_1, window_bounds = array<i64: 1, 8, 32>}, {pipeline_mode = #tpu.pipeline_mode<synchronous>, transform_indices = @transform_2, window_bounds = array<i64: 16, 32>}, {pipeline_mode = #tpu.pipeline_mode<synchronous>, transform_indices = @transform_3, window_bounds = array<i64: 1, 32>}, {pipeline_mode = #tpu.pipeline_mode<synchronous>, transform_indices = @transform_4, window_bounds = array<i64: 32, 32>}, {pipeline_mode = #tpu.pipeline_mode<synchronous>, transform_indices = @transform_5, window_bounds = array<i64: 1, 32>}, {transform_indices = @transform_6, window_bounds = array<i64: 1, 16, 32>}, {transform_indices = @transform_7, window_bounds = array<i64: 1, 8, 32>}]} {
    %c0 = arith.constant 0 : index
    %c0_0 = arith.constant 0 : index
    %c0_1 = arith.constant 0 : index
    %0 = vector.load %arg1[%c0, %c0_0, %c0_1] : memref<1x16x16xbf16, #tpu.memory_space<vmem>>, vector<1x16x16xbf16>
    %1 = vector.shape_cast %0 : vector<1x16x16xbf16> to vector<16x16xbf16>
    %c0_2 = arith.constant 0 : index
    %c0_3 = arith.constant 0 : index
    %2 = vector.load %arg3[%c0_2, %c0_3] : memref<16x32xbf16, #tpu.memory_space<vmem>>, vector<16x32xbf16>
    %cst = arith.constant dense<0.000000e+00> : vector<16x32xf32>
    %3 = tpu.matmul %1, %2, %cst {dimension_numbers = #tpu.dot_dimension_numbers<[1], [0], [0], [1], [0, 0, 1, 1], [], []>} : vector<16x16xbf16>, vector<16x32xbf16>, vector<16x32xf32> -> vector<16x32xf32>
    %c0_4 = arith.constant 0 : index
    %c0_5 = arith.constant 0 : index
    %4 = vector.load %arg4[%c0_4, %c0_5] : memref<1x32xbf16, #tpu.memory_space<vmem>>, vector<1x32xbf16>
    %5 = arith.extf %4 : vector<1x32xbf16> to vector<1x32xf32>
    %6 = vector.broadcast %5 : vector<1x32xf32> to vector<16x32xf32>
    %7 = arith.addf %3, %6 : vector<16x32xf32>
    %8 = vector.shape_cast %7 : vector<16x32xf32> to vector<1x16x32xf32>
    %9 = arith.truncf %8 : vector<1x16x32xf32> to vector<1x16x32xbf16>
    %c0_6 = arith.constant 0 : index
    %c0_7 = arith.constant 0 : index
    %c0_8 = arith.constant 0 : index
    %10 = vector.load %arg7[%c0_6, %c0_7, %c0_8] : memref<1x16x32xbf16, #tpu.memory_space<vmem>>, vector<1x16x32xbf16>
    tpu.vector_store %arg7[%c0_6, %c0_7, %c0_8], %9 {strides = array<i32>} : memref<1x16x32xbf16, #tpu.memory_space<vmem>>, vector<1x16x32xbf16>,
    %c0_9 = arith.constant 0 : index
    %c0_10 = arith.constant 0 : index
    %c0_11 = arith.constant 0 : index
    %11 = vector.load %arg2[%c0_9, %c0_10, %c0_11] : memref<1x8x32xbf16, #tpu.memory_space<vmem>>, vector<1x8x32xbf16>
    %12 = vector.shape_cast %11 : vector<1x8x32xbf16> to vector<8x32xbf16>
    %c0_12 = arith.constant 0 : index
    %c0_13 = arith.constant 0 : index
    %13 = vector.load %arg5[%c0_12, %c0_13] : memref<32x32xbf16, #tpu.memory_space<vmem>>, vector<32x32xbf16>
    %cst_14 = arith.constant dense<0.000000e+00> : vector<8x32xf32>
    %14 = tpu.matmul %12, %13, %cst_14 {dimension_numbers = #tpu.dot_dimension_numbers<[1], [0], [0], [1], [0, 0, 1, 1], [], []>} : vector<8x32xbf16>, vector<32x32xbf16>, vector<8x32xf32> -> vector<8x32xf32>
    %c0_15 = arith.constant 0 : index
    %c0_16 = arith.constant 0 : index
    %15 = vector.load %arg6[%c0_15, %c0_16] : memref<1x32xbf16, #tpu.memory_space<vmem>>, vector<1x32xbf16>
    %16 = arith.extf %15 : vector<1x32xbf16> to vector<1x32xf32>
    %17 = vector.broadcast %16 : vector<1x32xf32> to vector<8x32xf32>
    %18 = arith.addf %14, %17 : vector<8x32xf32>
    %19 = vector.shape_cast %18 : vector<8x32xf32> to vector<1x8x32xf32>
    %20 = arith.truncf %19 : vector<1x8x32xf32> to vector<1x8x32xbf16>
    %c0_17 = arith.constant 0 : index
    %c0_18 = arith.constant 0 : index
    %c0_19 = arith.constant 0 : index
    %21 = vector.load %arg8[%c0_17, %c0_18, %c0_19] : memref<1x8x32xbf16, #tpu.memory_space<vmem>>, vector<1x8x32xbf16>
    tpu.vector_store %arg8[%c0_17, %c0_18, %c0_19], %20 {strides = array<i32>} : memref<1x8x32xbf16, #tpu.memory_space<vmem>>, vector<1x8x32xbf16>,
    return
  }
  func.func @transform_0(%arg0: i32) -> (i32, i32, i32) {
    %c0_i32 = arith.constant 0 : i32
    %c0_i32_0 = arith.constant 0 : i32
    %c0_i32_1 = arith.constant 0 : i32
    return %arg0, %c0_i32, %c0_i32_0 : i32, i32, i32
  }
  func.func @transform_1(%arg0: i32) -> (i32, i32, i32) {
    %c0_i32 = arith.constant 0 : i32
    %c0_i32_0 = arith.constant 0 : i32
    %c0_i32_1 = arith.constant 0 : i32
    return %arg0, %c0_i32, %c0_i32_0 : i32, i32, i32
  }
  func.func @transform_2(%arg0: i32) -> (i32, i32) {
    %c0_i32 = arith.constant 0 : i32
    %c0_i32_0 = arith.constant 0 : i32
    %c0_i32_1 = arith.constant 0 : i32
    return %c0_i32, %c0_i32_0 : i32, i32
  }
  func.func @transform_3(%arg0: i32) -> (i32, i32) {
    %c0_i32 = arith.constant 0 : i32
    %c0_i32_0 = arith.constant 0 : i32
    %c0_i32_1 = arith.constant 0 : i32
    return %c0_i32, %c0_i32_0 : i32, i32
  }
  func.func @transform_4(%arg0: i32) -> (i32, i32) {
    %c0_i32 = arith.constant 0 : i32
    %c0_i32_0 = arith.constant 0 : i32
    %c0_i32_1 = arith.constant 0 : i32
    return %c0_i32, %c0_i32_0 : i32, i32
  }
  func.func @transform_5(%arg0: i32) -> (i32, i32) {
    %c0_i32 = arith.constant 0 : i32
    %c0_i32_0 = arith.constant 0 : i32
    %c0_i32_1 = arith.constant 0 : i32
    return %c0_i32, %c0_i32_0 : i32, i32
  }
  func.func @transform_6(%arg0: i32) -> (i32, i32, i32) {
    %c0_i32 = arith.constant 0 : i32
    %c0_i32_0 = arith.constant 0 : i32
    %c0_i32_1 = arith.constant 0 : i32
    return %arg0, %c0_i32, %c0_i32_0 : i32, i32, i32
  }
  func.func @transform_7(%arg0: i32) -> (i32, i32, i32) {
    %c0_i32 = arith.constant 0 : i32
    %c0_i32_0 = arith.constant 0 : i32
    %c0_i32_1 = arith.constant 0 : i32
    return %arg0, %c0_i32, %c0_i32_0 : i32, i32, i32
  }
}

module attributes {stable_mosaic.version = 11 : i64} {
  func.func @_dual_block_kernel(%arg0: i32, %arg1: memref<1x16x32xbf16, #tpu.memory_space<vmem>>, %arg2: memref<1x8x32xbf16, #tpu.memory_space<vmem>>, %arg3: memref<1x1x32xbf16, #tpu.memory_space<vmem>>, %arg4: memref<24x16xbf16, #tpu.memory_space<vmem>>, %arg5: memref<24x16xbf16, #tpu.memory_space<vmem>>, %arg6: memref<16x16xbf16, #tpu.memory_space<vmem>>, %arg7: memref<32x384xbf16, #tpu.memory_space<vmem>>, %arg8: memref<1x384xbf16, #tpu.memory_space<vmem>>, %arg9: memref<32x96xbf16, #tpu.memory_space<vmem>>, %arg10: memref<1x96xbf16, #tpu.memory_space<vmem>>, %arg11: memref<32x96xbf16, #tpu.memory_space<vmem>>, %arg12: memref<1x96xbf16, #tpu.memory_space<vmem>>, %arg13: memref<1x16xbf16, #tpu.memory_space<vmem>>, %arg14: memref<1x16xbf16, #tpu.memory_space<vmem>>, %arg15: memref<1x16xbf16, #tpu.memory_space<vmem>>, %arg16: memref<1x16xbf16, #tpu.memory_space<vmem>>, %arg17: memref<32x32xbf16, #tpu.memory_space<vmem>>, %arg18: memref<1x32xbf16, #tpu.memory_space<vmem>>, %arg19: memref<32x32xbf16, #tpu.memory_space<vmem>>, %arg20: memref<1x32xbf16, #tpu.memory_space<vmem>>, %arg21: memref<32x128xbf16, #tpu.memory_space<vmem>>, %arg22: memref<1x128xbf16, #tpu.memory_space<vmem>>, %arg23: memref<128x32xbf16, #tpu.memory_space<vmem>>, %arg24: memref<1x32xbf16, #tpu.memory_space<vmem>>, %arg25: memref<32x128xbf16, #tpu.memory_space<vmem>>, %arg26: memref<1x128xbf16, #tpu.memory_space<vmem>>, %arg27: memref<128x32xbf16, #tpu.memory_space<vmem>>, %arg28: memref<1x32xbf16, #tpu.memory_space<vmem>>, %arg29: memref<1x16x32xbf16, #tpu.memory_space<vmem>>, %arg30: memref<1x8x32xbf16, #tpu.memory_space<vmem>>) attributes {dimension_semantics = [#tpu.dimension_semantics<parallel>], iteration_bounds = array<i64: 2>, scalar_prefetch = 0 : i64, scratch_operands = 0 : i64, tpu.core_type = #tpu.core_type<tc>, window_params = [{transform_indices = @transform_0, window_bounds = array<i64: 1, 16, 32>}, {transform_indices = @transform_1, window_bounds = array<i64: 1, 8, 32>}, {transform_indices = @transform_2, window_bounds = array<i64: 1, 1, 32>}, {pipeline_mode = #tpu.pipeline_mode<synchronous>, transform_indices = @transform_3, window_bounds = array<i64: 24, 16>}, {pipeline_mode = #tpu.pipeline_mode<synchronous>, transform_indices = @transform_4, window_bounds = array<i64: 24, 16>}, {pipeline_mode = #tpu.pipeline_mode<synchronous>, transform_indices = @transform_5, window_bounds = array<i64: 16, 16>}, {pipeline_mode = #tpu.pipeline_mode<synchronous>, transform_indices = @transform_6, window_bounds = array<i64: 32, 384>}, {pipeline_mode = #tpu.pipeline_mode<synchronous>, transform_indices = @transform_7, window_bounds = array<i64: 1, 384>}, {pipeline_mode = #tpu.pipeline_mode<synchronous>, transform_indices = @transform_8, window_bounds = array<i64: 32, 96>}, {pipeline_mode = #tpu.pipeline_mode<synchronous>, transform_indices = @transform_9, window_bounds = array<i64: 1, 96>}, {pipeline_mode = #tpu.pipeline_mode<synchronous>, transform_indices = @transform_10, window_bounds = array<i64: 32, 96>}, {pipeline_mode = #tpu.pipeline_mode<synchronous>, transform_indices = @transform_11, window_bounds = array<i64: 1, 96>}, {pipeline_mode = #tpu.pipeline_mode<synchronous>, transform_indices = @transform_12, window_bounds = array<i64: 1, 16>}, {pipeline_mode = #tpu.pipeline_mode<synchronous>, transform_indices = @transform_13, window_bounds = array<i64: 1, 16>}, {pipeline_mode = #tpu.pipeline_mode<synchronous>, transform_indices = @transform_14, window_bounds = array<i64: 1, 16>}, {pipeline_mode = #tpu.pipeline_mode<synchronous>, transform_indices = @transform_15, window_bounds = array<i64: 1, 16>}, {pipeline_mode = #tpu.pipeline_mode<synchronous>, transform_indices = @transform_16, window_bounds = array<i64: 32, 32>}, {pipeline_mode = #tpu.pipeline_mode<synchronous>, transform_indices = @transform_17, window_bounds = array<i64: 1, 32>}, {pipeline_mode = #tpu.pipeline_mode<synchronous>, transform_indices = @transform_18, window_bounds = array<i64: 32, 32>}, {pipeline_mode = #tpu.pipeline_mode<synchronous>, transform_indices = @transform_19, window_bounds = array<i64: 1, 32>}, {pipeline_mode = #tpu.pipeline_mode<synchronous>, transform_indices = @transform_20, window_bounds = array<i64: 32, 128>}, {pipeline_mode = #tpu.pipeline_mode<synchronous>, transform_indices = @transform_21, window_bounds = array<i64: 1, 128>}, {pipeline_mode = #tpu.pipeline_mode<synchronous>, transform_indices = @transform_22, window_bounds = array<i64: 128, 32>}, {pipeline_mode = #tpu.pipeline_mode<synchronous>, transform_indices = @transform_23, window_bounds = array<i64: 1, 32>}, {pipeline_mode = #tpu.pipeline_mode<synchronous>, transform_indices = @transform_24, window_bounds = array<i64: 32, 128>}, {pipeline_mode = #tpu.pipeline_mode<synchronous>, transform_indices = @transform_25, window_bounds = array<i64: 1, 128>}, {pipeline_mode = #tpu.pipeline_mode<synchronous>, transform_indices = @transform_26, window_bounds = array<i64: 128, 32>}, {pipeline_mode = #tpu.pipeline_mode<synchronous>, transform_indices = @transform_27, window_bounds = array<i64: 1, 32>}, {transform_indices = @transform_28, window_bounds = array<i64: 1, 16, 32>}, {transform_indices = @transform_29, window_bounds = array<i64: 1, 8, 32>}]} {
    %c0 = arith.constant 0 : index
    %c0_0 = arith.constant 0 : index
    %c0_1 = arith.constant 0 : index
    %0 = vector.load %arg1[%c0, %c0_0, %c0_1] : memref<1x16x32xbf16, #tpu.memory_space<vmem>>, vector<1x16x32xbf16>
    %1 = vector.shape_cast %0 : vector<1x16x32xbf16> to vector<16x32xbf16>
    %2 = arith.extf %1 : vector<16x32xbf16> to vector<16x32xf32>
    %c0_2 = arith.constant 0 : index
    %c0_3 = arith.constant 0 : index
    %c0_4 = arith.constant 0 : index
    %3 = vector.load %arg2[%c0_2, %c0_3, %c0_4] : memref<1x8x32xbf16, #tpu.memory_space<vmem>>, vector<1x8x32xbf16>
    %4 = vector.shape_cast %3 : vector<1x8x32xbf16> to vector<8x32xbf16>
    %5 = arith.extf %4 : vector<8x32xbf16> to vector<8x32xf32>
    %c0_5 = arith.constant 0 : index
    %c0_6 = arith.constant 0 : index
    %c0_7 = arith.constant 0 : index
    %6 = vector.load %arg3[%c0_5, %c0_6, %c0_7] : memref<1x1x32xbf16, #tpu.memory_space<vmem>>, vector<1x1x32xbf16>
    %7 = vector.shape_cast %6 : vector<1x1x32xbf16> to vector<1x32xbf16>
    %8 = arith.extf %7 : vector<1x32xbf16> to vector<1x32xf32>
    %c0_8 = arith.constant 0 : index
    %c0_9 = arith.constant 0 : index
    %9 = vector.load %arg4[%c0_8, %c0_9] : memref<24x16xbf16, #tpu.memory_space<vmem>>, vector<24x16xbf16>
    %10 = arith.extf %9 : vector<24x16xbf16> to vector<24x16xf32>
    %c0_10 = arith.constant 0 : index
    %c0_11 = arith.constant 0 : index
    %11 = vector.load %arg5[%c0_10, %c0_11] : memref<24x16xbf16, #tpu.memory_space<vmem>>, vector<24x16xbf16>
    %12 = arith.extf %11 : vector<24x16xbf16> to vector<24x16xf32>
    %c0_12 = arith.constant 0 : index
    %c0_13 = arith.constant 0 : index
    %13 = vector.load %arg6[%c0_12, %c0_13] : memref<16x16xbf16, #tpu.memory_space<vmem>>, vector<16x16xbf16>
    %14 = arith.negf %8 : vector<1x32xf32>
    %15 = math.exp %14 : vector<1x32xf32>
    %cst = arith.constant 1.000000e+00 : f32
    %16 = vector.broadcast %cst : f32 to vector<1x32xf32>
    %17 = arith.addf %16, %15 : vector<1x32xf32>
    %18 = arith.divf %16, %17 : vector<1x32xf32>
    %19 = arith.mulf %8, %18 : vector<1x32xf32>
    %20 = arith.truncf %19 : vector<1x32xf32> to vector<1x32xbf16>
    %c0_14 = arith.constant 0 : index
    %c0_15 = arith.constant 0 : index
    %21 = vector.load %arg7[%c0_14, %c0_15] : memref<32x384xbf16, #tpu.memory_space<vmem>>, vector<32x384xbf16>
    %cst_16 = arith.constant dense<0.000000e+00> : vector<1x384xf32>
    %22 = tpu.matmul %20, %21, %cst_16 {dimension_numbers = #tpu.dot_dimension_numbers<[1], [0], [0], [1], [0, 0, 1, 1], [], []>} : vector<1x32xbf16>, vector<32x384xbf16>, vector<1x384xf32> -> vector<1x384xf32>
    %c0_17 = arith.constant 0 : index
    %c0_18 = arith.constant 0 : index
    %23 = vector.load %arg8[%c0_17, %c0_18] : memref<1x384xbf16, #tpu.memory_space<vmem>>, vector<1x384xbf16>
    %24 = arith.extf %23 : vector<1x384xbf16> to vector<1x384xf32>
    %25 = arith.addf %22, %24 : vector<1x384xf32>
    %26 = vector.extract_strided_slice %25 {offsets = [0, 0], sizes = [1, 32], strides = [1, 1]} : vector<1x384xf32> to vector<1x32xf32>
    %27 = vector.extract_strided_slice %25 {offsets = [0, 32], sizes = [1, 32], strides = [1, 1]} : vector<1x384xf32> to vector<1x32xf32>
    %28 = vector.extract_strided_slice %25 {offsets = [0, 64], sizes = [1, 32], strides = [1, 1]} : vector<1x384xf32> to vector<1x32xf32>
    %29 = vector.extract_strided_slice %25 {offsets = [0, 96], sizes = [1, 32], strides = [1, 1]} : vector<1x384xf32> to vector<1x32xf32>
    %30 = vector.extract_strided_slice %25 {offsets = [0, 128], sizes = [1, 32], strides = [1, 1]} : vector<1x384xf32> to vector<1x32xf32>
    %31 = vector.extract_strided_slice %25 {offsets = [0, 160], sizes = [1, 32], strides = [1, 1]} : vector<1x384xf32> to vector<1x32xf32>
    %32 = vector.extract_strided_slice %25 {offsets = [0, 192], sizes = [1, 32], strides = [1, 1]} : vector<1x384xf32> to vector<1x32xf32>
    %33 = vector.extract_strided_slice %25 {offsets = [0, 224], sizes = [1, 32], strides = [1, 1]} : vector<1x384xf32> to vector<1x32xf32>
    %34 = vector.extract_strided_slice %25 {offsets = [0, 256], sizes = [1, 32], strides = [1, 1]} : vector<1x384xf32> to vector<1x32xf32>
    %35 = vector.extract_strided_slice %25 {offsets = [0, 288], sizes = [1, 32], strides = [1, 1]} : vector<1x384xf32> to vector<1x32xf32>
    %36 = vector.extract_strided_slice %25 {offsets = [0, 320], sizes = [1, 32], strides = [1, 1]} : vector<1x384xf32> to vector<1x32xf32>
    %37 = vector.extract_strided_slice %25 {offsets = [0, 352], sizes = [1, 32], strides = [1, 1]} : vector<1x384xf32> to vector<1x32xf32>
    %cst_19 = arith.constant dense<0.000000e+00> : vector<16xf32>
    %38 = vector.multi_reduction <add>, %2, %cst_19 [1] : vector<16x32xf32> to vector<16xf32>
    %39 = vector.shape_cast %38 : vector<16xf32> to vector<16x1xf32>
    %cst_20 = arith.constant 3.200000e+01 : f32
    %40 = vector.broadcast %cst_20 : f32 to vector<16x1xf32>
    %41 = arith.divf %39, %40 : vector<16x1xf32>
    %42 = vector.broadcast %41 : vector<16x1xf32> to vector<16x32xf32>
    %43 = arith.subf %2, %42 : vector<16x32xf32>
    %44 = arith.mulf %43, %43 : vector<16x32xf32>
    %cst_21 = arith.constant dense<0.000000e+00> : vector<16xf32>
    %45 = vector.multi_reduction <add>, %44, %cst_21 [1] : vector<16x32xf32> to vector<16xf32>
    %46 = vector.shape_cast %45 : vector<16xf32> to vector<16x1xf32>
    %cst_22 = arith.constant 3.200000e+01 : f32
    %47 = vector.broadcast %cst_22 : f32 to vector<16x1xf32>
    %48 = arith.divf %46, %47 : vector<16x1xf32>
    %cst_23 = arith.constant 9.99999997E-7 : f32
    %49 = vector.broadcast %cst_23 : f32 to vector<16x1xf32>
    %50 = arith.addf %48, %49 : vector<16x1xf32>
    %51 = math.rsqrt %50 : vector<16x1xf32>
    %52 = vector.broadcast %51 : vector<16x1xf32> to vector<16x32xf32>
    %53 = arith.mulf %43, %52 : vector<16x32xf32>
    %cst_24 = arith.constant 1.000000e+00 : f32
    %54 = vector.broadcast %cst_24 : f32 to vector<1x32xf32>
    %55 = arith.addf %54, %27 : vector<1x32xf32>
    %56 = vector.broadcast %55 : vector<1x32xf32> to vector<16x32xf32>
    %57 = arith.mulf %53, %56 : vector<16x32xf32>
    %58 = vector.broadcast %26 : vector<1x32xf32> to vector<16x32xf32>
    %59 = arith.addf %57, %58 : vector<16x32xf32>
    %cst_25 = arith.constant dense<0.000000e+00> : vector<8xf32>
    %60 = vector.multi_reduction <add>, %5, %cst_25 [1] : vector<8x32xf32> to vector<8xf32>
    %61 = vector.shape_cast %60 : vector<8xf32> to vector<8x1xf32>
    %cst_26 = arith.constant 3.200000e+01 : f32
    %62 = vector.broadcast %cst_26 : f32 to vector<8x1xf32>
    %63 = arith.divf %61, %62 : vector<8x1xf32>
    %64 = vector.broadcast %63 : vector<8x1xf32> to vector<8x32xf32>
    %65 = arith.subf %5, %64 : vector<8x32xf32>
    %66 = arith.mulf %65, %65 : vector<8x32xf32>
    %cst_27 = arith.constant dense<0.000000e+00> : vector<8xf32>
    %67 = vector.multi_reduction <add>, %66, %cst_27 [1] : vector<8x32xf32> to vector<8xf32>
    %68 = vector.shape_cast %67 : vector<8xf32> to vector<8x1xf32>
    %cst_28 = arith.constant 3.200000e+01 : f32
    %69 = vector.broadcast %cst_28 : f32 to vector<8x1xf32>
    %70 = arith.divf %68, %69 : vector<8x1xf32>
    %cst_29 = arith.constant 9.99999997E-7 : f32
    %71 = vector.broadcast %cst_29 : f32 to vector<8x1xf32>
    %72 = arith.addf %70, %71 : vector<8x1xf32>
    %73 = math.rsqrt %72 : vector<8x1xf32>
    %74 = vector.broadcast %73 : vector<8x1xf32> to vector<8x32xf32>
    %75 = arith.mulf %65, %74 : vector<8x32xf32>
    %cst_30 = arith.constant 1.000000e+00 : f32
    %76 = vector.broadcast %cst_30 : f32 to vector<1x32xf32>
    %77 = arith.addf %76, %33 : vector<1x32xf32>
    %78 = vector.broadcast %77 : vector<1x32xf32> to vector<8x32xf32>
    %79 = arith.mulf %75, %78 : vector<8x32xf32>
    %80 = vector.broadcast %32 : vector<1x32xf32> to vector<8x32xf32>
    %81 = arith.addf %79, %80 : vector<8x32xf32>
    %82 = arith.truncf %59 : vector<16x32xf32> to vector<16x32xbf16>
    %c0_31 = arith.constant 0 : index
    %c0_32 = arith.constant 0 : index
    %83 = vector.load %arg9[%c0_31, %c0_32] : memref<32x96xbf16, #tpu.memory_space<vmem>>, vector<32x96xbf16>
    %cst_33 = arith.constant dense<0.000000e+00> : vector<16x96xf32>
    %84 = tpu.matmul %82, %83, %cst_33 {dimension_numbers = #tpu.dot_dimension_numbers<[1], [0], [0], [1], [0, 0, 1, 1], [], []>} : vector<16x32xbf16>, vector<32x96xbf16>, vector<16x96xf32> -> vector<16x96xf32>
    %c0_34 = arith.constant 0 : index
    %c0_35 = arith.constant 0 : index
    %85 = vector.load %arg10[%c0_34, %c0_35] : memref<1x96xbf16, #tpu.memory_space<vmem>>, vector<1x96xbf16>
    %86 = arith.extf %85 : vector<1x96xbf16> to vector<1x96xf32>
    %87 = vector.broadcast %86 : vector<1x96xf32> to vector<16x96xf32>
    %88 = arith.addf %84, %87 : vector<16x96xf32>
    %89 = arith.truncf %81 : vector<8x32xf32> to vector<8x32xbf16>
    %c0_36 = arith.constant 0 : index
    %c0_37 = arith.constant 0 : index
    %90 = vector.load %arg11[%c0_36, %c0_37] : memref<32x96xbf16, #tpu.memory_space<vmem>>, vector<32x96xbf16>
    %cst_38 = arith.constant dense<0.000000e+00> : vector<8x96xf32>
    %91 = tpu.matmul %89, %90, %cst_38 {dimension_numbers = #tpu.dot_dimension_numbers<[1], [0], [0], [1], [0, 0, 1, 1], [], []>} : vector<8x32xbf16>, vector<32x96xbf16>, vector<8x96xf32> -> vector<8x96xf32>
    %c0_39 = arith.constant 0 : index
    %c0_40 = arith.constant 0 : index
    %92 = vector.load %arg12[%c0_39, %c0_40] : memref<1x96xbf16, #tpu.memory_space<vmem>>, vector<1x96xbf16>
    %93 = arith.extf %92 : vector<1x96xbf16> to vector<1x96xf32>
    %94 = vector.broadcast %93 : vector<1x96xf32> to vector<8x96xf32>
    %95 = arith.addf %91, %94 : vector<8x96xf32>
    %96 = vector.extract_strided_slice %88 {offsets = [0, 0], sizes = [16, 32], strides = [1, 1]} : vector<16x96xf32> to vector<16x32xf32>
    %97 = vector.extract_strided_slice %88 {offsets = [0, 32], sizes = [16, 32], strides = [1, 1]} : vector<16x96xf32> to vector<16x32xf32>
    %98 = vector.extract_strided_slice %88 {offsets = [0, 64], sizes = [16, 32], strides = [1, 1]} : vector<16x96xf32> to vector<16x32xf32>
    %99 = vector.extract_strided_slice %95 {offsets = [0, 0], sizes = [8, 32], strides = [1, 1]} : vector<8x96xf32> to vector<8x32xf32>
    %100 = vector.extract_strided_slice %95 {offsets = [0, 32], sizes = [8, 32], strides = [1, 1]} : vector<8x96xf32> to vector<8x32xf32>
    %101 = vector.extract_strided_slice %95 {offsets = [0, 64], sizes = [8, 32], strides = [1, 1]} : vector<8x96xf32> to vector<8x32xf32>
    %c0_41 = arith.constant 0 : index
    %c0_42 = arith.constant 0 : index
    %102 = vector.load %arg13[%c0_41, %c0_42] : memref<1x16xbf16, #tpu.memory_space<vmem>>, vector<1x16xbf16>
    %103 = arith.extf %102 : vector<1x16xbf16> to vector<1x16xf32>
    %c0_43 = arith.constant 0 : index
    %c0_44 = arith.constant 0 : index
    %104 = vector.load %arg14[%c0_43, %c0_44] : memref<1x16xbf16, #tpu.memory_space<vmem>>, vector<1x16xbf16>
    %105 = arith.extf %104 : vector<1x16xbf16> to vector<1x16xf32>
    %c0_45 = arith.constant 0 : index
    %c0_46 = arith.constant 0 : index
    %106 = vector.load %arg15[%c0_45, %c0_46] : memref<1x16xbf16, #tpu.memory_space<vmem>>, vector<1x16xbf16>
    %107 = arith.extf %106 : vector<1x16xbf16> to vector<1x16xf32>
    %c0_47 = arith.constant 0 : index
    %c0_48 = arith.constant 0 : index
    %108 = vector.load %arg16[%c0_47, %c0_48] : memref<1x16xbf16, #tpu.memory_space<vmem>>, vector<1x16xbf16>
    %109 = arith.extf %108 : vector<1x16xbf16> to vector<1x16xf32>
    %110 = vector.extract_strided_slice %99 {offsets = [0, 0], sizes = [8, 16], strides = [1, 1]} : vector<8x32xf32> to vector<8x16xf32>
    %111 = arith.mulf %110, %110 : vector<8x16xf32>
    %cst_49 = arith.constant dense<0.000000e+00> : vector<8xf32>
    %112 = vector.multi_reduction <add>, %111, %cst_49 [1] : vector<8x16xf32> to vector<8xf32>
    %113 = vector.shape_cast %112 : vector<8xf32> to vector<8x1xf32>
    %cst_50 = arith.constant 1.600000e+01 : f32
    %114 = vector.broadcast %cst_50 : f32 to vector<8x1xf32>
    %115 = arith.divf %113, %114 : vector<8x1xf32>
    %cst_51 = arith.constant 9.99999997E-7 : f32
    %116 = vector.broadcast %cst_51 : f32 to vector<8x1xf32>
    %117 = arith.addf %115, %116 : vector<8x1xf32>
    %118 = math.rsqrt %117 : vector<8x1xf32>
    %119 = vector.broadcast %118 : vector<8x1xf32> to vector<8x16xf32>
    %120 = arith.mulf %110, %119 : vector<8x16xf32>
    %121 = vector.broadcast %107 : vector<1x16xf32> to vector<8x16xf32>
    %122 = arith.mulf %120, %121 : vector<8x16xf32>
    %123 = vector.extract_strided_slice %96 {offsets = [0, 0], sizes = [16, 16], strides = [1, 1]} : vector<16x32xf32> to vector<16x16xf32>
    %124 = arith.mulf %123, %123 : vector<16x16xf32>
    %cst_52 = arith.constant dense<0.000000e+00> : vector<16xf32>
    %125 = vector.multi_reduction <add>, %124, %cst_52 [1] : vector<16x16xf32> to vector<16xf32>
    %126 = vector.shape_cast %125 : vector<16xf32> to vector<16x1xf32>
    %cst_53 = arith.constant 1.600000e+01 : f32
    %127 = vector.broadcast %cst_53 : f32 to vector<16x1xf32>
    %128 = arith.divf %126, %127 : vector<16x1xf32>
    %cst_54 = arith.constant 9.99999997E-7 : f32
    %129 = vector.broadcast %cst_54 : f32 to vector<16x1xf32>
    %130 = arith.addf %128, %129 : vector<16x1xf32>
    %131 = math.rsqrt %130 : vector<16x1xf32>
    %132 = vector.broadcast %131 : vector<16x1xf32> to vector<16x16xf32>
    %133 = arith.mulf %123, %132 : vector<16x16xf32>
    %134 = vector.broadcast %103 : vector<1x16xf32> to vector<16x16xf32>
    %135 = arith.mulf %133, %134 : vector<16x16xf32>
    %136 = tpu.concatenate %122, %135 in 0 : vector<8x16xf32>, vector<16x16xf32> -> vector<24x16xf32>
    %137 = vector.extract_strided_slice %100 {offsets = [0, 0], sizes = [8, 16], strides = [1, 1]} : vector<8x32xf32> to vector<8x16xf32>
    %138 = arith.mulf %137, %137 : vector<8x16xf32>
    %cst_55 = arith.constant dense<0.000000e+00> : vector<8xf32>
    %139 = vector.multi_reduction <add>, %138, %cst_55 [1] : vector<8x16xf32> to vector<8xf32>
    %140 = vector.shape_cast %139 : vector<8xf32> to vector<8x1xf32>
    %cst_56 = arith.constant 1.600000e+01 : f32
    %141 = vector.broadcast %cst_56 : f32 to vector<8x1xf32>
    %142 = arith.divf %140, %141 : vector<8x1xf32>
    %cst_57 = arith.constant 9.99999997E-7 : f32
    %143 = vector.broadcast %cst_57 : f32 to vector<8x1xf32>
    %144 = arith.addf %142, %143 : vector<8x1xf32>
    %145 = math.rsqrt %144 : vector<8x1xf32>
    %146 = vector.broadcast %145 : vector<8x1xf32> to vector<8x16xf32>
    %147 = arith.mulf %137, %146 : vector<8x16xf32>
    %148 = vector.broadcast %109 : vector<1x16xf32> to vector<8x16xf32>
    %149 = arith.mulf %147, %148 : vector<8x16xf32>
    %150 = vector.extract_strided_slice %97 {offsets = [0, 0], sizes = [16, 16], strides = [1, 1]} : vector<16x32xf32> to vector<16x16xf32>
    %151 = arith.mulf %150, %150 : vector<16x16xf32>
    %cst_58 = arith.constant dense<0.000000e+00> : vector<16xf32>
    %152 = vector.multi_reduction <add>, %151, %cst_58 [1] : vector<16x16xf32> to vector<16xf32>
    %153 = vector.shape_cast %152 : vector<16xf32> to vector<16x1xf32>
    %cst_59 = arith.constant 1.600000e+01 : f32
    %154 = vector.broadcast %cst_59 : f32 to vector<16x1xf32>
    %155 = arith.divf %153, %154 : vector<16x1xf32>
    %cst_60 = arith.constant 9.99999997E-7 : f32
    %156 = vector.broadcast %cst_60 : f32 to vector<16x1xf32>
    %157 = arith.addf %155, %156 : vector<16x1xf32>
    %158 = math.rsqrt %157 : vector<16x1xf32>
    %159 = vector.broadcast %158 : vector<16x1xf32> to vector<16x16xf32>
    %160 = arith.mulf %150, %159 : vector<16x16xf32>
    %161 = vector.broadcast %105 : vector<1x16xf32> to vector<16x16xf32>
    %162 = arith.mulf %160, %161 : vector<16x16xf32>
    %163 = tpu.concatenate %149, %162 in 0 : vector<8x16xf32>, vector<16x16xf32> -> vector<24x16xf32>
    %164 = vector.extract_strided_slice %101 {offsets = [0, 0], sizes = [8, 16], strides = [1, 1]} : vector<8x32xf32> to vector<8x16xf32>
    %165 = vector.extract_strided_slice %98 {offsets = [0, 0], sizes = [16, 16], strides = [1, 1]} : vector<16x32xf32> to vector<16x16xf32>
    %166 = tpu.concatenate %164, %165 in 0 : vector<8x16xf32>, vector<16x16xf32> -> vector<24x16xf32>
    %167 = arith.truncf %166 : vector<24x16xf32> to vector<24x16xbf16>
    %168 = arith.truncf %136 : vector<24x16xf32> to vector<24x16xbf16>
    %cst_61 = arith.constant dense<0.000000e+00> : vector<24x16xf32>
    %169 = tpu.matmul %168, %13, %cst_61 {dimension_numbers = #tpu.dot_dimension_numbers<[1], [0], [0], [1], [0, 0, 1, 1], [], []>} : vector<24x16xbf16>, vector<16x16xbf16>, vector<24x16xf32> -> vector<24x16xf32>
    %170 = arith.mulf %136, %10 : vector<24x16xf32>
    %171 = arith.mulf %169, %12 : vector<24x16xf32>
    %172 = arith.addf %170, %171 : vector<24x16xf32>
    %173 = arith.truncf %163 : vector<24x16xf32> to vector<24x16xbf16>
    %cst_62 = arith.constant dense<0.000000e+00> : vector<24x16xf32>
    %174 = tpu.matmul %173, %13, %cst_62 {dimension_numbers = #tpu.dot_dimension_numbers<[1], [0], [0], [1], [0, 0, 1, 1], [], []>} : vector<24x16xbf16>, vector<16x16xbf16>, vector<24x16xf32> -> vector<24x16xf32>
    %175 = arith.mulf %163, %10 : vector<24x16xf32>
    %176 = arith.mulf %174, %12 : vector<24x16xf32>
    %177 = arith.addf %175, %176 : vector<24x16xf32>
    %178 = arith.truncf %172 : vector<24x16xf32> to vector<24x16xbf16>
    %179 = arith.truncf %177 : vector<24x16xf32> to vector<24x16xbf16>
    %cst_63 = arith.constant dense<0.000000e+00> : vector<24x24xf32>
    %180 = tpu.matmul %178, %179, %cst_63 {dimension_numbers = #tpu.dot_dimension_numbers<[1], [1], [0], [0], [0, 0, 1, 0], [], []>} : vector<24x16xbf16>, vector<24x16xbf16>, vector<24x24xf32> -> vector<24x24xf32>
    %cst_64 = arith.constant 2.500000e-01 : f32
    %181 = vector.broadcast %cst_64 : f32 to vector<24x24xf32>
    %182 = arith.mulf %180, %181 : vector<24x24xf32>
    %cst_65 = arith.constant dense<0xFF800000> : vector<24xf32>
    %183 = vector.multi_reduction <maximumf>, %182, %cst_65 [1] : vector<24x24xf32> to vector<24xf32>
    %184 = vector.shape_cast %183 : vector<24xf32> to vector<24x1xf32>
    %185 = vector.broadcast %184 : vector<24x1xf32> to vector<24x24xf32>
    %186 = arith.subf %182, %185 : vector<24x24xf32>
    %187 = math.exp %186 : vector<24x24xf32>
    %cst_66 = arith.constant dense<0.000000e+00> : vector<24xf32>
    %188 = vector.multi_reduction <add>, %187, %cst_66 [1] : vector<24x24xf32> to vector<24xf32>
    %189 = vector.shape_cast %188 : vector<24xf32> to vector<24x1xf32>
    %190 = tpu.reciprocal %189 {approx = true} : vector<24x1xf32> -> vector<24x1xf32>
    %191 = vector.broadcast %190 : vector<24x1xf32> to vector<24x24xf32>
    %192 = arith.mulf %187, %191 : vector<24x24xf32>
    %193 = arith.truncf %192 : vector<24x24xf32> to vector<24x24xbf16>
    %cst_67 = arith.constant dense<0.000000e+00> : vector<24x16xf32>
    %194 = tpu.matmul %193, %167, %cst_67 {dimension_numbers = #tpu.dot_dimension_numbers<[1], [0], [0], [1], [0, 0, 1, 1], [], []>} : vector<24x24xbf16>, vector<24x16xbf16>, vector<24x16xf32> -> vector<24x16xf32>
    %195 = vector.extract_strided_slice %99 {offsets = [0, 16], sizes = [8, 16], strides = [1, 1]} : vector<8x32xf32> to vector<8x16xf32>
    %196 = arith.mulf %195, %195 : vector<8x16xf32>
    %cst_68 = arith.constant dense<0.000000e+00> : vector<8xf32>
    %197 = vector.multi_reduction <add>, %196, %cst_68 [1] : vector<8x16xf32> to vector<8xf32>
    %198 = vector.shape_cast %197 : vector<8xf32> to vector<8x1xf32>
    %cst_69 = arith.constant 1.600000e+01 : f32
    %199 = vector.broadcast %cst_69 : f32 to vector<8x1xf32>
    %200 = arith.divf %198, %199 : vector<8x1xf32>
    %cst_70 = arith.constant 9.99999997E-7 : f32
    %201 = vector.broadcast %cst_70 : f32 to vector<8x1xf32>
    %202 = arith.addf %200, %201 : vector<8x1xf32>
    %203 = math.rsqrt %202 : vector<8x1xf32>
    %204 = vector.broadcast %203 : vector<8x1xf32> to vector<8x16xf32>
    %205 = arith.mulf %195, %204 : vector<8x16xf32>
    %206 = vector.broadcast %107 : vector<1x16xf32> to vector<8x16xf32>
    %207 = arith.mulf %205, %206 : vector<8x16xf32>
    %208 = vector.extract_strided_slice %96 {offsets = [0, 16], sizes = [16, 16], strides = [1, 1]} : vector<16x32xf32> to vector<16x16xf32>
    %209 = arith.mulf %208, %208 : vector<16x16xf32>
    %cst_71 = arith.constant dense<0.000000e+00> : vector<16xf32>
    %210 = vector.multi_reduction <add>, %209, %cst_71 [1] : vector<16x16xf32> to vector<16xf32>
    %211 = vector.shape_cast %210 : vector<16xf32> to vector<16x1xf32>
    %cst_72 = arith.constant 1.600000e+01 : f32
    %212 = vector.broadcast %cst_72 : f32 to vector<16x1xf32>
    %213 = arith.divf %211, %212 : vector<16x1xf32>
    %cst_73 = arith.constant 9.99999997E-7 : f32
    %214 = vector.broadcast %cst_73 : f32 to vector<16x1xf32>
    %215 = arith.addf %213, %214 : vector<16x1xf32>
    %216 = math.rsqrt %215 : vector<16x1xf32>
    %217 = vector.broadcast %216 : vector<16x1xf32> to vector<16x16xf32>
    %218 = arith.mulf %208, %217 : vector<16x16xf32>
    %219 = vector.broadcast %103 : vector<1x16xf32> to vector<16x16xf32>
    %220 = arith.mulf %218, %219 : vector<16x16xf32>
    %221 = tpu.concatenate %207, %220 in 0 : vector<8x16xf32>, vector<16x16xf32> -> vector<24x16xf32>
    %222 = vector.extract_strided_slice %100 {offsets = [0, 16], sizes = [8, 16], strides = [1, 1]} : vector<8x32xf32> to vector<8x16xf32>
    %223 = arith.mulf %222, %222 : vector<8x16xf32>
    %cst_74 = arith.constant dense<0.000000e+00> : vector<8xf32>
    %224 = vector.multi_reduction <add>, %223, %cst_74 [1] : vector<8x16xf32> to vector<8xf32>
    %225 = vector.shape_cast %224 : vector<8xf32> to vector<8x1xf32>
    %cst_75 = arith.constant 1.600000e+01 : f32
    %226 = vector.broadcast %cst_75 : f32 to vector<8x1xf32>
    %227 = arith.divf %225, %226 : vector<8x1xf32>
    %cst_76 = arith.constant 9.99999997E-7 : f32
    %228 = vector.broadcast %cst_76 : f32 to vector<8x1xf32>
    %229 = arith.addf %227, %228 : vector<8x1xf32>
    %230 = math.rsqrt %229 : vector<8x1xf32>
    %231 = vector.broadcast %230 : vector<8x1xf32> to vector<8x16xf32>
    %232 = arith.mulf %222, %231 : vector<8x16xf32>
    %233 = vector.broadcast %109 : vector<1x16xf32> to vector<8x16xf32>
    %234 = arith.mulf %232, %233 : vector<8x16xf32>
    %235 = vector.extract_strided_slice %97 {offsets = [0, 16], sizes = [16, 16], strides = [1, 1]} : vector<16x32xf32> to vector<16x16xf32>
    %236 = arith.mulf %235, %235 : vector<16x16xf32>
    %cst_77 = arith.constant dense<0.000000e+00> : vector<16xf32>
    %237 = vector.multi_reduction <add>, %236, %cst_77 [1] : vector<16x16xf32> to vector<16xf32>
    %238 = vector.shape_cast %237 : vector<16xf32> to vector<16x1xf32>
    %cst_78 = arith.constant 1.600000e+01 : f32
    %239 = vector.broadcast %cst_78 : f32 to vector<16x1xf32>
    %240 = arith.divf %238, %239 : vector<16x1xf32>
    %cst_79 = arith.constant 9.99999997E-7 : f32
    %241 = vector.broadcast %cst_79 : f32 to vector<16x1xf32>
    %242 = arith.addf %240, %241 : vector<16x1xf32>
    %243 = math.rsqrt %242 : vector<16x1xf32>
    %244 = vector.broadcast %243 : vector<16x1xf32> to vector<16x16xf32>
    %245 = arith.mulf %235, %244 : vector<16x16xf32>
    %246 = vector.broadcast %105 : vector<1x16xf32> to vector<16x16xf32>
    %247 = arith.mulf %245, %246 : vector<16x16xf32>
    %248 = tpu.concatenate %234, %247 in 0 : vector<8x16xf32>, vector<16x16xf32> -> vector<24x16xf32>
    %249 = vector.extract_strided_slice %101 {offsets = [0, 16], sizes = [8, 16], strides = [1, 1]} : vector<8x32xf32> to vector<8x16xf32>
    %250 = vector.extract_strided_slice %98 {offsets = [0, 16], sizes = [16, 16], strides = [1, 1]} : vector<16x32xf32> to vector<16x16xf32>
    %251 = tpu.concatenate %249, %250 in 0 : vector<8x16xf32>, vector<16x16xf32> -> vector<24x16xf32>
    %252 = arith.truncf %251 : vector<24x16xf32> to vector<24x16xbf16>
    %253 = arith.truncf %221 : vector<24x16xf32> to vector<24x16xbf16>
    %cst_80 = arith.constant dense<0.000000e+00> : vector<24x16xf32>
    %254 = tpu.matmul %253, %13, %cst_80 {dimension_numbers = #tpu.dot_dimension_numbers<[1], [0], [0], [1], [0, 0, 1, 1], [], []>} : vector<24x16xbf16>, vector<16x16xbf16>, vector<24x16xf32> -> vector<24x16xf32>
    %255 = arith.mulf %221, %10 : vector<24x16xf32>
    %256 = arith.mulf %254, %12 : vector<24x16xf32>
    %257 = arith.addf %255, %256 : vector<24x16xf32>
    %258 = arith.truncf %248 : vector<24x16xf32> to vector<24x16xbf16>
    %cst_81 = arith.constant dense<0.000000e+00> : vector<24x16xf32>
    %259 = tpu.matmul %258, %13, %cst_81 {dimension_numbers = #tpu.dot_dimension_numbers<[1], [0], [0], [1], [0, 0, 1, 1], [], []>} : vector<24x16xbf16>, vector<16x16xbf16>, vector<24x16xf32> -> vector<24x16xf32>
    %260 = arith.mulf %248, %10 : vector<24x16xf32>
    %261 = arith.mulf %259, %12 : vector<24x16xf32>
    %262 = arith.addf %260, %261 : vector<24x16xf32>
    %263 = arith.truncf %257 : vector<24x16xf32> to vector<24x16xbf16>
    %264 = arith.truncf %262 : vector<24x16xf32> to vector<24x16xbf16>
    %cst_82 = arith.constant dense<0.000000e+00> : vector<24x24xf32>
    %265 = tpu.matmul %263, %264, %cst_82 {dimension_numbers = #tpu.dot_dimension_numbers<[1], [1], [0], [0], [0, 0, 1, 0], [], []>} : vector<24x16xbf16>, vector<24x16xbf16>, vector<24x24xf32> -> vector<24x24xf32>
    %cst_83 = arith.constant 2.500000e-01 : f32
    %266 = vector.broadcast %cst_83 : f32 to vector<24x24xf32>
    %267 = arith.mulf %265, %266 : vector<24x24xf32>
    %cst_84 = arith.constant dense<0xFF800000> : vector<24xf32>
    %268 = vector.multi_reduction <maximumf>, %267, %cst_84 [1] : vector<24x24xf32> to vector<24xf32>
    %269 = vector.shape_cast %268 : vector<24xf32> to vector<24x1xf32>
    %270 = vector.broadcast %269 : vector<24x1xf32> to vector<24x24xf32>
    %271 = arith.subf %267, %270 : vector<24x24xf32>
    %272 = math.exp %271 : vector<24x24xf32>
    %cst_85 = arith.constant dense<0.000000e+00> : vector<24xf32>
    %273 = vector.multi_reduction <add>, %272, %cst_85 [1] : vector<24x24xf32> to vector<24xf32>
    %274 = vector.shape_cast %273 : vector<24xf32> to vector<24x1xf32>
    %275 = tpu.reciprocal %274 {approx = true} : vector<24x1xf32> -> vector<24x1xf32>
    %276 = vector.broadcast %275 : vector<24x1xf32> to vector<24x24xf32>
    %277 = arith.mulf %272, %276 : vector<24x24xf32>
    %278 = arith.truncf %277 : vector<24x24xf32> to vector<24x24xbf16>
    %cst_86 = arith.constant dense<0.000000e+00> : vector<24x16xf32>
    %279 = tpu.matmul %278, %252, %cst_86 {dimension_numbers = #tpu.dot_dimension_numbers<[1], [0], [0], [1], [0, 0, 1, 1], [], []>} : vector<24x24xbf16>, vector<24x16xbf16>, vector<24x16xf32> -> vector<24x16xf32>
    %280 = tpu.concatenate %194, %279 in 1 : vector<24x16xf32>, vector<24x16xf32> -> vector<24x32xf32>
    %281 = vector.extract_strided_slice %280 {offsets = [0, 0], sizes = [8, 32], strides = [1, 1]} : vector<24x32xf32> to vector<8x32xf32>
    %282 = arith.truncf %281 : vector<8x32xf32> to vector<8x32xbf16>
    %c0_87 = arith.constant 0 : index
    %c0_88 = arith.constant 0 : index
    %283 = vector.load %arg19[%c0_87, %c0_88] : memref<32x32xbf16, #tpu.memory_space<vmem>>, vector<32x32xbf16>
    %cst_89 = arith.constant dense<0.000000e+00> : vector<8x32xf32>
    %284 = tpu.matmul %282, %283, %cst_89 {dimension_numbers = #tpu.dot_dimension_numbers<[1], [0], [0], [1], [0, 0, 1, 1], [], []>} : vector<8x32xbf16>, vector<32x32xbf16>, vector<8x32xf32> -> vector<8x32xf32>
    %c0_90 = arith.constant 0 : index
    %c0_91 = arith.constant 0 : index
    %285 = vector.load %arg20[%c0_90, %c0_91] : memref<1x32xbf16, #tpu.memory_space<vmem>>, vector<1x32xbf16>
    %286 = arith.extf %285 : vector<1x32xbf16> to vector<1x32xf32>
    %287 = vector.broadcast %286 : vector<1x32xf32> to vector<8x32xf32>
    %288 = arith.addf %284, %287 : vector<8x32xf32>
    %289 = vector.extract_strided_slice %280 {offsets = [8, 0], sizes = [16, 32], strides = [1, 1]} : vector<24x32xf32> to vector<16x32xf32>
    %290 = arith.truncf %289 : vector<16x32xf32> to vector<16x32xbf16>
    %c0_92 = arith.constant 0 : index
    %c0_93 = arith.constant 0 : index
    %291 = vector.load %arg17[%c0_92, %c0_93] : memref<32x32xbf16, #tpu.memory_space<vmem>>, vector<32x32xbf16>
    %cst_94 = arith.constant dense<0.000000e+00> : vector<16x32xf32>
    %292 = tpu.matmul %290, %291, %cst_94 {dimension_numbers = #tpu.dot_dimension_numbers<[1], [0], [0], [1], [0, 0, 1, 1], [], []>} : vector<16x32xbf16>, vector<32x32xbf16>, vector<16x32xf32> -> vector<16x32xf32>
    %c0_95 = arith.constant 0 : index
    %c0_96 = arith.constant 0 : index
    %293 = vector.load %arg18[%c0_95, %c0_96] : memref<1x32xbf16, #tpu.memory_space<vmem>>, vector<1x32xbf16>
    %294 = arith.extf %293 : vector<1x32xbf16> to vector<1x32xf32>
    %295 = vector.broadcast %294 : vector<1x32xf32> to vector<16x32xf32>
    %296 = arith.addf %292, %295 : vector<16x32xf32>
    %297 = vector.broadcast %28 : vector<1x32xf32> to vector<16x32xf32>
    %298 = arith.mulf %297, %296 : vector<16x32xf32>
    %299 = arith.addf %2, %298 : vector<16x32xf32>
    %cst_97 = arith.constant dense<0.000000e+00> : vector<16xf32>
    %300 = vector.multi_reduction <add>, %299, %cst_97 [1] : vector<16x32xf32> to vector<16xf32>
    %301 = vector.shape_cast %300 : vector<16xf32> to vector<16x1xf32>
    %cst_98 = arith.constant 3.200000e+01 : f32
    %302 = vector.broadcast %cst_98 : f32 to vector<16x1xf32>
    %303 = arith.divf %301, %302 : vector<16x1xf32>
    %304 = vector.broadcast %303 : vector<16x1xf32> to vector<16x32xf32>
    %305 = arith.subf %299, %304 : vector<16x32xf32>
    %306 = arith.mulf %305, %305 : vector<16x32xf32>
    %cst_99 = arith.constant dense<0.000000e+00> : vector<16xf32>
    %307 = vector.multi_reduction <add>, %306, %cst_99 [1] : vector<16x32xf32> to vector<16xf32>
    %308 = vector.shape_cast %307 : vector<16xf32> to vector<16x1xf32>
    %cst_100 = arith.constant 3.200000e+01 : f32
    %309 = vector.broadcast %cst_100 : f32 to vector<16x1xf32>
    %310 = arith.divf %308, %309 : vector<16x1xf32>
    %cst_101 = arith.constant 9.99999997E-7 : f32
    %311 = vector.broadcast %cst_101 : f32 to vector<16x1xf32>
    %312 = arith.addf %310, %311 : vector<16x1xf32>
    %313 = math.rsqrt %312 : vector<16x1xf32>
    %314 = vector.broadcast %313 : vector<16x1xf32> to vector<16x32xf32>
    %315 = arith.mulf %305, %314 : vector<16x32xf32>
    %cst_102 = arith.constant 1.000000e+00 : f32
    %316 = vector.broadcast %cst_102 : f32 to vector<1x32xf32>
    %317 = arith.addf %316, %30 : vector<1x32xf32>
    %318 = vector.broadcast %317 : vector<1x32xf32> to vector<16x32xf32>
    %319 = arith.mulf %315, %318 : vector<16x32xf32>
    %320 = vector.broadcast %29 : vector<1x32xf32> to vector<16x32xf32>
    %321 = arith.addf %319, %320 : vector<16x32xf32>
    %322 = arith.truncf %321 : vector<16x32xf32> to vector<16x32xbf16>
    %c0_103 = arith.constant 0 : index
    %c0_104 = arith.constant 0 : index
    %323 = vector.load %arg21[%c0_103, %c0_104] : memref<32x128xbf16, #tpu.memory_space<vmem>>, vector<32x128xbf16>
    %cst_105 = arith.constant dense<0.000000e+00> : vector<16x128xf32>
    %324 = tpu.matmul %322, %323, %cst_105 {dimension_numbers = #tpu.dot_dimension_numbers<[1], [0], [0], [1], [0, 0, 1, 1], [], []>} : vector<16x32xbf16>, vector<32x128xbf16>, vector<16x128xf32> -> vector<16x128xf32>
    %c0_106 = arith.constant 0 : index
    %c0_107 = arith.constant 0 : index
    %325 = vector.load %arg22[%c0_106, %c0_107] : memref<1x128xbf16, #tpu.memory_space<vmem>>, vector<1x128xbf16>
    %326 = arith.extf %325 : vector<1x128xbf16> to vector<1x128xf32>
    %327 = vector.broadcast %326 : vector<1x128xf32> to vector<16x128xf32>
    %328 = arith.addf %324, %327 : vector<16x128xf32>
    %329 = arith.mulf %328, %328 : vector<16x128xf32>
    %330 = arith.mulf %328, %329 : vector<16x128xf32>
    %cst_108 = arith.constant 4.471500e-02 : f32
    %331 = vector.broadcast %cst_108 : f32 to vector<16x128xf32>
    %332 = arith.mulf %331, %330 : vector<16x128xf32>
    %333 = arith.addf %328, %332 : vector<16x128xf32>
    %cst_109 = arith.constant 0.797884583 : f32
    %334 = vector.broadcast %cst_109 : f32 to vector<16x128xf32>
    %335 = arith.mulf %334, %333 : vector<16x128xf32>
    %336 = math.tanh %335 : vector<16x128xf32>
    %cst_110 = arith.constant 1.000000e+00 : f32
    %337 = vector.broadcast %cst_110 : f32 to vector<16x128xf32>
    %338 = arith.addf %337, %336 : vector<16x128xf32>
    %cst_111 = arith.constant 5.000000e-01 : f32
    %339 = vector.broadcast %cst_111 : f32 to vector<16x128xf32>
    %340 = arith.mulf %339, %338 : vector<16x128xf32>
    %341 = arith.mulf %328, %340 : vector<16x128xf32>
    %342 = arith.truncf %341 : vector<16x128xf32> to vector<16x128xbf16>
    %c0_112 = arith.constant 0 : index
    %c0_113 = arith.constant 0 : index
    %343 = vector.load %arg23[%c0_112, %c0_113] : memref<128x32xbf16, #tpu.memory_space<vmem>>, vector<128x32xbf16>
    %cst_114 = arith.constant dense<0.000000e+00> : vector<16x32xf32>
    %344 = tpu.matmul %342, %343, %cst_114 {dimension_numbers = #tpu.dot_dimension_numbers<[1], [0], [0], [1], [0, 0, 1, 1], [], []>} : vector<16x128xbf16>, vector<128x32xbf16>, vector<16x32xf32> -> vector<16x32xf32>
    %c0_115 = arith.constant 0 : index
    %c0_116 = arith.constant 0 : index
    %345 = vector.load %arg24[%c0_115, %c0_116] : memref<1x32xbf16, #tpu.memory_space<vmem>>, vector<1x32xbf16>
    %346 = arith.extf %345 : vector<1x32xbf16> to vector<1x32xf32>
    %347 = vector.broadcast %346 : vector<1x32xf32> to vector<16x32xf32>
    %348 = arith.addf %344, %347 : vector<16x32xf32>
    %349 = vector.broadcast %31 : vector<1x32xf32> to vector<16x32xf32>
    %350 = arith.mulf %349, %348 : vector<16x32xf32>
    %351 = arith.addf %299, %350 : vector<16x32xf32>
    %352 = vector.broadcast %34 : vector<1x32xf32> to vector<8x32xf32>
    %353 = arith.mulf %352, %288 : vector<8x32xf32>
    %354 = arith.addf %5, %353 : vector<8x32xf32>
    %cst_117 = arith.constant dense<0.000000e+00> : vector<8xf32>
    %355 = vector.multi_reduction <add>, %354, %cst_117 [1] : vector<8x32xf32> to vector<8xf32>
    %356 = vector.shape_cast %355 : vector<8xf32> to vector<8x1xf32>
    %cst_118 = arith.constant 3.200000e+01 : f32
    %357 = vector.broadcast %cst_118 : f32 to vector<8x1xf32>
    %358 = arith.divf %356, %357 : vector<8x1xf32>
    %359 = vector.broadcast %358 : vector<8x1xf32> to vector<8x32xf32>
    %360 = arith.subf %354, %359 : vector<8x32xf32>
    %361 = arith.mulf %360, %360 : vector<8x32xf32>
    %cst_119 = arith.constant dense<0.000000e+00> : vector<8xf32>
    %362 = vector.multi_reduction <add>, %361, %cst_119 [1] : vector<8x32xf32> to vector<8xf32>
    %363 = vector.shape_cast %362 : vector<8xf32> to vector<8x1xf32>
    %cst_120 = arith.constant 3.200000e+01 : f32
    %364 = vector.broadcast %cst_120 : f32 to vector<8x1xf32>
    %365 = arith.divf %363, %364 : vector<8x1xf32>
    %cst_121 = arith.constant 9.99999997E-7 : f32
    %366 = vector.broadcast %cst_121 : f32 to vector<8x1xf32>
    %367 = arith.addf %365, %366 : vector<8x1xf32>
    %368 = math.rsqrt %367 : vector<8x1xf32>
    %369 = vector.broadcast %368 : vector<8x1xf32> to vector<8x32xf32>
    %370 = arith.mulf %360, %369 : vector<8x32xf32>
    %cst_122 = arith.constant 1.000000e+00 : f32
    %371 = vector.broadcast %cst_122 : f32 to vector<1x32xf32>
    %372 = arith.addf %371, %36 : vector<1x32xf32>
    %373 = vector.broadcast %372 : vector<1x32xf32> to vector<8x32xf32>
    %374 = arith.mulf %370, %373 : vector<8x32xf32>
    %375 = vector.broadcast %35 : vector<1x32xf32> to vector<8x32xf32>
    %376 = arith.addf %374, %375 : vector<8x32xf32>
    %377 = arith.truncf %376 : vector<8x32xf32> to vector<8x32xbf16>
    %c0_123 = arith.constant 0 : index
    %c0_124 = arith.constant 0 : index
    %378 = vector.load %arg25[%c0_123, %c0_124] : memref<32x128xbf16, #tpu.memory_space<vmem>>, vector<32x128xbf16>
    %cst_125 = arith.constant dense<0.000000e+00> : vector<8x128xf32>
    %379 = tpu.matmul %377, %378, %cst_125 {dimension_numbers = #tpu.dot_dimension_numbers<[1], [0], [0], [1], [0, 0, 1, 1], [], []>} : vector<8x32xbf16>, vector<32x128xbf16>, vector<8x128xf32> -> vector<8x128xf32>
    %c0_126 = arith.constant 0 : index
    %c0_127 = arith.constant 0 : index
    %380 = vector.load %arg26[%c0_126, %c0_127] : memref<1x128xbf16, #tpu.memory_space<vmem>>, vector<1x128xbf16>
    %381 = arith.extf %380 : vector<1x128xbf16> to vector<1x128xf32>
    %382 = vector.broadcast %381 : vector<1x128xf32> to vector<8x128xf32>
    %383 = arith.addf %379, %382 : vector<8x128xf32>
    %384 = arith.mulf %383, %383 : vector<8x128xf32>
    %385 = arith.mulf %383, %384 : vector<8x128xf32>
    %cst_128 = arith.constant 4.471500e-02 : f32
    %386 = vector.broadcast %cst_128 : f32 to vector<8x128xf32>
    %387 = arith.mulf %386, %385 : vector<8x128xf32>
    %388 = arith.addf %383, %387 : vector<8x128xf32>
    %cst_129 = arith.constant 0.797884583 : f32
    %389 = vector.broadcast %cst_129 : f32 to vector<8x128xf32>
    %390 = arith.mulf %389, %388 : vector<8x128xf32>
    %391 = math.tanh %390 : vector<8x128xf32>
    %cst_130 = arith.constant 1.000000e+00 : f32
    %392 = vector.broadcast %cst_130 : f32 to vector<8x128xf32>
    %393 = arith.addf %392, %391 : vector<8x128xf32>
    %cst_131 = arith.constant 5.000000e-01 : f32
    %394 = vector.broadcast %cst_131 : f32 to vector<8x128xf32>
    %395 = arith.mulf %394, %393 : vector<8x128xf32>
    %396 = arith.mulf %383, %395 : vector<8x128xf32>
    %397 = arith.truncf %396 : vector<8x128xf32> to vector<8x128xbf16>
    %c0_132 = arith.constant 0 : index
    %c0_133 = arith.constant 0 : index
    %398 = vector.load %arg27[%c0_132, %c0_133] : memref<128x32xbf16, #tpu.memory_space<vmem>>, vector<128x32xbf16>
    %cst_134 = arith.constant dense<0.000000e+00> : vector<8x32xf32>
    %399 = tpu.matmul %397, %398, %cst_134 {dimension_numbers = #tpu.dot_dimension_numbers<[1], [0], [0], [1], [0, 0, 1, 1], [], []>} : vector<8x128xbf16>, vector<128x32xbf16>, vector<8x32xf32> -> vector<8x32xf32>
    %c0_135 = arith.constant 0 : index
    %c0_136 = arith.constant 0 : index
    %400 = vector.load %arg28[%c0_135, %c0_136] : memref<1x32xbf16, #tpu.memory_space<vmem>>, vector<1x32xbf16>
    %401 = arith.extf %400 : vector<1x32xbf16> to vector<1x32xf32>
    %402 = vector.broadcast %401 : vector<1x32xf32> to vector<8x32xf32>
    %403 = arith.addf %399, %402 : vector<8x32xf32>
    %404 = vector.broadcast %37 : vector<1x32xf32> to vector<8x32xf32>
    %405 = arith.mulf %404, %403 : vector<8x32xf32>
    %406 = arith.addf %354, %405 : vector<8x32xf32>
    %407 = vector.shape_cast %351 : vector<16x32xf32> to vector<1x16x32xf32>
    %408 = arith.truncf %407 : vector<1x16x32xf32> to vector<1x16x32xbf16>
    %c0_137 = arith.constant 0 : index
    %c0_138 = arith.constant 0 : index
    %c0_139 = arith.constant 0 : index
    %409 = vector.load %arg29[%c0_137, %c0_138, %c0_139] : memref<1x16x32xbf16, #tpu.memory_space<vmem>>, vector<1x16x32xbf16>
    tpu.vector_store %arg29[%c0_137, %c0_138, %c0_139], %408 {strides = array<i32>} : memref<1x16x32xbf16, #tpu.memory_space<vmem>>, vector<1x16x32xbf16>,
    %410 = vector.shape_cast %406 : vector<8x32xf32> to vector<1x8x32xf32>
    %411 = arith.truncf %410 : vector<1x8x32xf32> to vector<1x8x32xbf16>
    %c0_140 = arith.constant 0 : index
    %c0_141 = arith.constant 0 : index
    %c0_142 = arith.constant 0 : index
    %412 = vector.load %arg30[%c0_140, %c0_141, %c0_142] : memref<1x8x32xbf16, #tpu.memory_space<vmem>>, vector<1x8x32xbf16>
    tpu.vector_store %arg30[%c0_140, %c0_141, %c0_142], %411 {strides = array<i32>} : memref<1x8x32xbf16, #tpu.memory_space<vmem>>, vector<1x8x32xbf16>,
    return
  }
  func.func @transform_0(%arg0: i32) -> (i32, i32, i32) {
    %c0_i32 = arith.constant 0 : i32
    %c0_i32_0 = arith.constant 0 : i32
    %c0_i32_1 = arith.constant 0 : i32
    return %arg0, %c0_i32, %c0_i32_0 : i32, i32, i32
  }
  func.func @transform_1(%arg0: i32) -> (i32, i32, i32) {
    %c0_i32 = arith.constant 0 : i32
    %c0_i32_0 = arith.constant 0 : i32
    %c0_i32_1 = arith.constant 0 : i32
    return %arg0, %c0_i32, %c0_i32_0 : i32, i32, i32
  }
  func.func @transform_2(%arg0: i32) -> (i32, i32, i32) {
    %c0_i32 = arith.constant 0 : i32
    %c0_i32_0 = arith.constant 0 : i32
    %c0_i32_1 = arith.constant 0 : i32
    return %arg0, %c0_i32, %c0_i32_0 : i32, i32, i32
  }
  func.func @transform_3(%arg0: i32) -> (i32, i32) {
    %c0_i32 = arith.constant 0 : i32
    %c0_i32_0 = arith.constant 0 : i32
    %c0_i32_1 = arith.constant 0 : i32
    return %c0_i32, %c0_i32_0 : i32, i32
  }
  func.func @transform_4(%arg0: i32) -> (i32, i32) {
    %c0_i32 = arith.constant 0 : i32
    %c0_i32_0 = arith.constant 0 : i32
    %c0_i32_1 = arith.constant 0 : i32
    return %c0_i32, %c0_i32_0 : i32, i32
  }
  func.func @transform_5(%arg0: i32) -> (i32, i32) {
    %c0_i32 = arith.constant 0 : i32
    %c0_i32_0 = arith.constant 0 : i32
    %c0_i32_1 = arith.constant 0 : i32
    return %c0_i32, %c0_i32_0 : i32, i32
  }
  func.func @transform_6(%arg0: i32) -> (i32, i32) {
    %c0_i32 = arith.constant 0 : i32
    %c0_i32_0 = arith.constant 0 : i32
    %c0_i32_1 = arith.constant 0 : i32
    return %c0_i32, %c0_i32_0 : i32, i32
  }
  func.func @transform_7(%arg0: i32) -> (i32, i32) {
    %c0_i32 = arith.constant 0 : i32
    %c0_i32_0 = arith.constant 0 : i32
    %c0_i32_1 = arith.constant 0 : i32
    return %c0_i32, %c0_i32_0 : i32, i32
  }
  func.func @transform_8(%arg0: i32) -> (i32, i32) {
    %c0_i32 = arith.constant 0 : i32
    %c0_i32_0 = arith.constant 0 : i32
    %c0_i32_1 = arith.constant 0 : i32
    return %c0_i32, %c0_i32_0 : i32, i32
  }
  func.func @transform_9(%arg0: i32) -> (i32, i32) {
    %c0_i32 = arith.constant 0 : i32
    %c0_i32_0 = arith.constant 0 : i32
    %c0_i32_1 = arith.constant 0 : i32
    return %c0_i32, %c0_i32_0 : i32, i32
  }
  func.func @transform_10(%arg0: i32) -> (i32, i32) {
    %c0_i32 = arith.constant 0 : i32
    %c0_i32_0 = arith.constant 0 : i32
    %c0_i32_1 = arith.constant 0 : i32
    return %c0_i32, %c0_i32_0 : i32, i32
  }
  func.func @transform_11(%arg0: i32) -> (i32, i32) {
    %c0_i32 = arith.constant 0 : i32
    %c0_i32_0 = arith.constant 0 : i32
    %c0_i32_1 = arith.constant 0 : i32
    return %c0_i32, %c0_i32_0 : i32, i32
  }
  func.func @transform_12(%arg0: i32) -> (i32, i32) {
    %c0_i32 = arith.constant 0 : i32
    %c0_i32_0 = arith.constant 0 : i32
    %c0_i32_1 = arith.constant 0 : i32
    return %c0_i32, %c0_i32_0 : i32, i32
  }
  func.func @transform_13(%arg0: i32) -> (i32, i32) {
    %c0_i32 = arith.constant 0 : i32
    %c0_i32_0 = arith.constant 0 : i32
    %c0_i32_1 = arith.constant 0 : i32
    return %c0_i32, %c0_i32_0 : i32, i32
  }
  func.func @transform_14(%arg0: i32) -> (i32, i32) {
    %c0_i32 = arith.constant 0 : i32
    %c0_i32_0 = arith.constant 0 : i32
    %c0_i32_1 = arith.constant 0 : i32
    return %c0_i32, %c0_i32_0 : i32, i32
  }
  func.func @transform_15(%arg0: i32) -> (i32, i32) {
    %c0_i32 = arith.constant 0 : i32
    %c0_i32_0 = arith.constant 0 : i32
    %c0_i32_1 = arith.constant 0 : i32
    return %c0_i32, %c0_i32_0 : i32, i32
  }
  func.func @transform_16(%arg0: i32) -> (i32, i32) {
    %c0_i32 = arith.constant 0 : i32
    %c0_i32_0 = arith.constant 0 : i32
    %c0_i32_1 = arith.constant 0 : i32
    return %c0_i32, %c0_i32_0 : i32, i32
  }
  func.func @transform_17(%arg0: i32) -> (i32, i32) {
    %c0_i32 = arith.constant 0 : i32
    %c0_i32_0 = arith.constant 0 : i32
    %c0_i32_1 = arith.constant 0 : i32
    return %c0_i32, %c0_i32_0 : i32, i32
  }
  func.func @transform_18(%arg0: i32) -> (i32, i32) {
    %c0_i32 = arith.constant 0 : i32
    %c0_i32_0 = arith.constant 0 : i32
    %c0_i32_1 = arith.constant 0 : i32
    return %c0_i32, %c0_i32_0 : i32, i32
  }
  func.func @transform_19(%arg0: i32) -> (i32, i32) {
    %c0_i32 = arith.constant 0 : i32
    %c0_i32_0 = arith.constant 0 : i32
    %c0_i32_1 = arith.constant 0 : i32
    return %c0_i32, %c0_i32_0 : i32, i32
  }
  func.func @transform_20(%arg0: i32) -> (i32, i32) {
    %c0_i32 = arith.constant 0 : i32
    %c0_i32_0 = arith.constant 0 : i32
    %c0_i32_1 = arith.constant 0 : i32
    return %c0_i32, %c0_i32_0 : i32, i32
  }
  func.func @transform_21(%arg0: i32) -> (i32, i32) {
    %c0_i32 = arith.constant 0 : i32
    %c0_i32_0 = arith.constant 0 : i32
    %c0_i32_1 = arith.constant 0 : i32
    return %c0_i32, %c0_i32_0 : i32, i32
  }
  func.func @transform_22(%arg0: i32) -> (i32, i32) {
    %c0_i32 = arith.constant 0 : i32
    %c0_i32_0 = arith.constant 0 : i32
    %c0_i32_1 = arith.constant 0 : i32
    return %c0_i32, %c0_i32_0 : i32, i32
  }
  func.func @transform_23(%arg0: i32) -> (i32, i32) {
    %c0_i32 = arith.constant 0 : i32
    %c0_i32_0 = arith.constant 0 : i32
    %c0_i32_1 = arith.constant 0 : i32
    return %c0_i32, %c0_i32_0 : i32, i32
  }
  func.func @transform_24(%arg0: i32) -> (i32, i32) {
    %c0_i32 = arith.constant 0 : i32
    %c0_i32_0 = arith.constant 0 : i32
    %c0_i32_1 = arith.constant 0 : i32
    return %c0_i32, %c0_i32_0 : i32, i32
  }
  func.func @transform_25(%arg0: i32) -> (i32, i32) {
    %c0_i32 = arith.constant 0 : i32
    %c0_i32_0 = arith.constant 0 : i32
    %c0_i32_1 = arith.constant 0 : i32
    return %c0_i32, %c0_i32_0 : i32, i32
  }
  func.func @transform_26(%arg0: i32) -> (i32, i32) {
    %c0_i32 = arith.constant 0 : i32
    %c0_i32_0 = arith.constant 0 : i32
    %c0_i32_1 = arith.constant 0 : i32
    return %c0_i32, %c0_i32_0 : i32, i32
  }
  func.func @transform_27(%arg0: i32) -> (i32, i32) {
    %c0_i32 = arith.constant 0 : i32
    %c0_i32_0 = arith.constant 0 : i32
    %c0_i32_1 = arith.constant 0 : i32
    return %c0_i32, %c0_i32_0 : i32, i32
  }
  func.func @transform_28(%arg0: i32) -> (i32, i32, i32) {
    %c0_i32 = arith.constant 0 : i32
    %c0_i32_0 = arith.constant 0 : i32
    %c0_i32_1 = arith.constant 0 : i32
    return %arg0, %c0_i32, %c0_i32_0 : i32, i32, i32
  }
  func.func @transform_29(%arg0: i32) -> (i32, i32, i32) {
    %c0_i32 = arith.constant 0 : i32
    %c0_i32_0 = arith.constant 0 : i32
    %c0_i32_1 = arith.constant 0 : i32
    return %arg0, %c0_i32, %c0_i32_0 : i32, i32, i32
  }
}

module attributes {stable_mosaic.version = 11 : i64} {
  func.func @_single_block_kernel(%arg0: i32, %arg1: memref<1x24x32xbf16, #tpu.memory_space<vmem>>, %arg2: memref<1x1x32xbf16, #tpu.memory_space<vmem>>, %arg3: memref<24x16xbf16, #tpu.memory_space<vmem>>, %arg4: memref<24x16xbf16, #tpu.memory_space<vmem>>, %arg5: memref<16x16xbf16, #tpu.memory_space<vmem>>, %arg6: memref<32x96xbf16, #tpu.memory_space<vmem>>, %arg7: memref<1x96xbf16, #tpu.memory_space<vmem>>, %arg8: memref<32x96xbf16, #tpu.memory_space<vmem>>, %arg9: memref<1x96xbf16, #tpu.memory_space<vmem>>, %arg10: memref<1x16xbf16, #tpu.memory_space<vmem>>, %arg11: memref<1x16xbf16, #tpu.memory_space<vmem>>, %arg12: memref<32x128xbf16, #tpu.memory_space<vmem>>, %arg13: memref<1x128xbf16, #tpu.memory_space<vmem>>, %arg14: memref<160x32xbf16, #tpu.memory_space<vmem>>, %arg15: memref<1x32xbf16, #tpu.memory_space<vmem>>, %arg16: memref<1x24x32xbf16, #tpu.memory_space<vmem>>) attributes {dimension_semantics = [#tpu.dimension_semantics<parallel>], iteration_bounds = array<i64: 2>, scalar_prefetch = 0 : i64, scratch_operands = 0 : i64, tpu.core_type = #tpu.core_type<tc>, window_params = [{transform_indices = @transform_0, window_bounds = array<i64: 1, 24, 32>}, {transform_indices = @transform_1, window_bounds = array<i64: 1, 1, 32>}, {pipeline_mode = #tpu.pipeline_mode<synchronous>, transform_indices = @transform_2, window_bounds = array<i64: 24, 16>}, {pipeline_mode = #tpu.pipeline_mode<synchronous>, transform_indices = @transform_3, window_bounds = array<i64: 24, 16>}, {pipeline_mode = #tpu.pipeline_mode<synchronous>, transform_indices = @transform_4, window_bounds = array<i64: 16, 16>}, {pipeline_mode = #tpu.pipeline_mode<synchronous>, transform_indices = @transform_5, window_bounds = array<i64: 32, 96>}, {pipeline_mode = #tpu.pipeline_mode<synchronous>, transform_indices = @transform_6, window_bounds = array<i64: 1, 96>}, {pipeline_mode = #tpu.pipeline_mode<synchronous>, transform_indices = @transform_7, window_bounds = array<i64: 32, 96>}, {pipeline_mode = #tpu.pipeline_mode<synchronous>, transform_indices = @transform_8, window_bounds = array<i64: 1, 96>}, {pipeline_mode = #tpu.pipeline_mode<synchronous>, transform_indices = @transform_9, window_bounds = array<i64: 1, 16>}, {pipeline_mode = #tpu.pipeline_mode<synchronous>, transform_indices = @transform_10, window_bounds = array<i64: 1, 16>}, {pipeline_mode = #tpu.pipeline_mode<synchronous>, transform_indices = @transform_11, window_bounds = array<i64: 32, 128>}, {pipeline_mode = #tpu.pipeline_mode<synchronous>, transform_indices = @transform_12, window_bounds = array<i64: 1, 128>}, {pipeline_mode = #tpu.pipeline_mode<synchronous>, transform_indices = @transform_13, window_bounds = array<i64: 160, 32>}, {pipeline_mode = #tpu.pipeline_mode<synchronous>, transform_indices = @transform_14, window_bounds = array<i64: 1, 32>}, {transform_indices = @transform_15, window_bounds = array<i64: 1, 24, 32>}]} {
    %c0 = arith.constant 0 : index
    %c0_0 = arith.constant 0 : index
    %c0_1 = arith.constant 0 : index
    %0 = vector.load %arg1[%c0, %c0_0, %c0_1] : memref<1x24x32xbf16, #tpu.memory_space<vmem>>, vector<1x24x32xbf16>
    %1 = vector.shape_cast %0 : vector<1x24x32xbf16> to vector<24x32xbf16>
    %2 = arith.extf %1 : vector<24x32xbf16> to vector<24x32xf32>
    %c0_2 = arith.constant 0 : index
    %c0_3 = arith.constant 0 : index
    %c0_4 = arith.constant 0 : index
    %3 = vector.load %arg2[%c0_2, %c0_3, %c0_4] : memref<1x1x32xbf16, #tpu.memory_space<vmem>>, vector<1x1x32xbf16>
    %4 = vector.shape_cast %3 : vector<1x1x32xbf16> to vector<1x32xbf16>
    %5 = arith.extf %4 : vector<1x32xbf16> to vector<1x32xf32>
    %c0_5 = arith.constant 0 : index
    %c0_6 = arith.constant 0 : index
    %6 = vector.load %arg3[%c0_5, %c0_6] : memref<24x16xbf16, #tpu.memory_space<vmem>>, vector<24x16xbf16>
    %7 = arith.extf %6 : vector<24x16xbf16> to vector<24x16xf32>
    %c0_7 = arith.constant 0 : index
    %c0_8 = arith.constant 0 : index
    %8 = vector.load %arg4[%c0_7, %c0_8] : memref<24x16xbf16, #tpu.memory_space<vmem>>, vector<24x16xbf16>
    %9 = arith.extf %8 : vector<24x16xbf16> to vector<24x16xf32>
    %c0_9 = arith.constant 0 : index
    %c0_10 = arith.constant 0 : index
    %10 = vector.load %arg5[%c0_9, %c0_10] : memref<16x16xbf16, #tpu.memory_space<vmem>>, vector<16x16xbf16>
    %c0_11 = arith.constant 0 : index
    %c0_12 = arith.constant 0 : index
    %11 = vector.load %arg10[%c0_11, %c0_12] : memref<1x16xbf16, #tpu.memory_space<vmem>>, vector<1x16xbf16>
    %12 = arith.extf %11 : vector<1x16xbf16> to vector<1x16xf32>
    %c0_13 = arith.constant 0 : index
    %c0_14 = arith.constant 0 : index
    %13 = vector.load %arg11[%c0_13, %c0_14] : memref<1x16xbf16, #tpu.memory_space<vmem>>, vector<1x16xbf16>
    %14 = arith.extf %13 : vector<1x16xbf16> to vector<1x16xf32>
    %15 = arith.negf %5 : vector<1x32xf32>
    %16 = math.exp %15 : vector<1x32xf32>
    %cst = arith.constant 1.000000e+00 : f32
    %17 = vector.broadcast %cst : f32 to vector<1x32xf32>
    %18 = arith.addf %17, %16 : vector<1x32xf32>
    %19 = arith.divf %17, %18 : vector<1x32xf32>
    %20 = arith.mulf %5, %19 : vector<1x32xf32>
    %21 = arith.truncf %20 : vector<1x32xf32> to vector<1x32xbf16>
    %c0_15 = arith.constant 0 : index
    %c0_16 = arith.constant 0 : index
    %22 = vector.load %arg6[%c0_15, %c0_16] : memref<32x96xbf16, #tpu.memory_space<vmem>>, vector<32x96xbf16>
    %cst_17 = arith.constant dense<0.000000e+00> : vector<1x96xf32>
    %23 = tpu.matmul %21, %22, %cst_17 {dimension_numbers = #tpu.dot_dimension_numbers<[1], [0], [0], [1], [0, 0, 1, 1], [], []>} : vector<1x32xbf16>, vector<32x96xbf16>, vector<1x96xf32> -> vector<1x96xf32>
    %c0_18 = arith.constant 0 : index
    %c0_19 = arith.constant 0 : index
    %24 = vector.load %arg7[%c0_18, %c0_19] : memref<1x96xbf16, #tpu.memory_space<vmem>>, vector<1x96xbf16>
    %25 = arith.extf %24 : vector<1x96xbf16> to vector<1x96xf32>
    %26 = arith.addf %23, %25 : vector<1x96xf32>
    %27 = vector.extract_strided_slice %26 {offsets = [0, 0], sizes = [1, 32], strides = [1, 1]} : vector<1x96xf32> to vector<1x32xf32>
    %28 = vector.extract_strided_slice %26 {offsets = [0, 32], sizes = [1, 32], strides = [1, 1]} : vector<1x96xf32> to vector<1x32xf32>
    %29 = vector.extract_strided_slice %26 {offsets = [0, 64], sizes = [1, 32], strides = [1, 1]} : vector<1x96xf32> to vector<1x32xf32>
    %cst_20 = arith.constant dense<0.000000e+00> : vector<24xf32>
    %30 = vector.multi_reduction <add>, %2, %cst_20 [1] : vector<24x32xf32> to vector<24xf32>
    %31 = vector.shape_cast %30 : vector<24xf32> to vector<24x1xf32>
    %cst_21 = arith.constant 3.200000e+01 : f32
    %32 = vector.broadcast %cst_21 : f32 to vector<24x1xf32>
    %33 = arith.divf %31, %32 : vector<24x1xf32>
    %34 = vector.broadcast %33 : vector<24x1xf32> to vector<24x32xf32>
    %35 = arith.subf %2, %34 : vector<24x32xf32>
    %36 = arith.mulf %35, %35 : vector<24x32xf32>
    %cst_22 = arith.constant dense<0.000000e+00> : vector<24xf32>
    %37 = vector.multi_reduction <add>, %36, %cst_22 [1] : vector<24x32xf32> to vector<24xf32>
    %38 = vector.shape_cast %37 : vector<24xf32> to vector<24x1xf32>
    %cst_23 = arith.constant 3.200000e+01 : f32
    %39 = vector.broadcast %cst_23 : f32 to vector<24x1xf32>
    %40 = arith.divf %38, %39 : vector<24x1xf32>
    %cst_24 = arith.constant 9.99999997E-7 : f32
    %41 = vector.broadcast %cst_24 : f32 to vector<24x1xf32>
    %42 = arith.addf %40, %41 : vector<24x1xf32>
    %43 = math.rsqrt %42 : vector<24x1xf32>
    %44 = vector.broadcast %43 : vector<24x1xf32> to vector<24x32xf32>
    %45 = arith.mulf %35, %44 : vector<24x32xf32>
    %cst_25 = arith.constant 1.000000e+00 : f32
    %46 = vector.broadcast %cst_25 : f32 to vector<1x32xf32>
    %47 = arith.addf %46, %28 : vector<1x32xf32>
    %48 = vector.broadcast %47 : vector<1x32xf32> to vector<24x32xf32>
    %49 = arith.mulf %45, %48 : vector<24x32xf32>
    %50 = vector.broadcast %27 : vector<1x32xf32> to vector<24x32xf32>
    %51 = arith.addf %49, %50 : vector<24x32xf32>
    %52 = arith.truncf %51 : vector<24x32xf32> to vector<24x32xbf16>
    %c0_26 = arith.constant 0 : index
    %c0_27 = arith.constant 0 : index
    %53 = vector.load %arg12[%c0_26, %c0_27] : memref<32x128xbf16, #tpu.memory_space<vmem>>, vector<32x128xbf16>
    %cst_28 = arith.constant dense<0.000000e+00> : vector<24x128xf32>
    %54 = tpu.matmul %52, %53, %cst_28 {dimension_numbers = #tpu.dot_dimension_numbers<[1], [0], [0], [1], [0, 0, 1, 1], [], []>} : vector<24x32xbf16>, vector<32x128xbf16>, vector<24x128xf32> -> vector<24x128xf32>
    %c0_29 = arith.constant 0 : index
    %c0_30 = arith.constant 0 : index
    %55 = vector.load %arg13[%c0_29, %c0_30] : memref<1x128xbf16, #tpu.memory_space<vmem>>, vector<1x128xbf16>
    %56 = arith.extf %55 : vector<1x128xbf16> to vector<1x128xf32>
    %57 = vector.broadcast %56 : vector<1x128xf32> to vector<24x128xf32>
    %58 = arith.addf %54, %57 : vector<24x128xf32>
    %59 = arith.mulf %58, %58 : vector<24x128xf32>
    %60 = arith.mulf %58, %59 : vector<24x128xf32>
    %cst_31 = arith.constant 4.471500e-02 : f32
    %61 = vector.broadcast %cst_31 : f32 to vector<24x128xf32>
    %62 = arith.mulf %61, %60 : vector<24x128xf32>
    %63 = arith.addf %58, %62 : vector<24x128xf32>
    %cst_32 = arith.constant 0.797884583 : f32
    %64 = vector.broadcast %cst_32 : f32 to vector<24x128xf32>
    %65 = arith.mulf %64, %63 : vector<24x128xf32>
    %66 = math.tanh %65 : vector<24x128xf32>
    %cst_33 = arith.constant 1.000000e+00 : f32
    %67 = vector.broadcast %cst_33 : f32 to vector<24x128xf32>
    %68 = arith.addf %67, %66 : vector<24x128xf32>
    %cst_34 = arith.constant 5.000000e-01 : f32
    %69 = vector.broadcast %cst_34 : f32 to vector<24x128xf32>
    %70 = arith.mulf %69, %68 : vector<24x128xf32>
    %71 = arith.mulf %58, %70 : vector<24x128xf32>
    %72 = arith.truncf %51 : vector<24x32xf32> to vector<24x32xbf16>
    %c0_35 = arith.constant 0 : index
    %c0_36 = arith.constant 0 : index
    %73 = vector.load %arg8[%c0_35, %c0_36] : memref<32x96xbf16, #tpu.memory_space<vmem>>, vector<32x96xbf16>
    %cst_37 = arith.constant dense<0.000000e+00> : vector<24x96xf32>
    %74 = tpu.matmul %72, %73, %cst_37 {dimension_numbers = #tpu.dot_dimension_numbers<[1], [0], [0], [1], [0, 0, 1, 1], [], []>} : vector<24x32xbf16>, vector<32x96xbf16>, vector<24x96xf32> -> vector<24x96xf32>
    %c0_38 = arith.constant 0 : index
    %c0_39 = arith.constant 0 : index
    %75 = vector.load %arg9[%c0_38, %c0_39] : memref<1x96xbf16, #tpu.memory_space<vmem>>, vector<1x96xbf16>
    %76 = arith.extf %75 : vector<1x96xbf16> to vector<1x96xf32>
    %77 = vector.broadcast %76 : vector<1x96xf32> to vector<24x96xf32>
    %78 = arith.addf %74, %77 : vector<24x96xf32>
    %79 = vector.extract_strided_slice %78 {offsets = [0, 0], sizes = [24, 32], strides = [1, 1]} : vector<24x96xf32> to vector<24x32xf32>
    %80 = vector.extract_strided_slice %78 {offsets = [0, 32], sizes = [24, 32], strides = [1, 1]} : vector<24x96xf32> to vector<24x32xf32>
    %81 = vector.extract_strided_slice %78 {offsets = [0, 64], sizes = [24, 32], strides = [1, 1]} : vector<24x96xf32> to vector<24x32xf32>
    %82 = vector.extract_strided_slice %79 {offsets = [0, 0], sizes = [24, 16], strides = [1, 1]} : vector<24x32xf32> to vector<24x16xf32>
    %83 = arith.mulf %82, %82 : vector<24x16xf32>
    %cst_40 = arith.constant dense<0.000000e+00> : vector<24xf32>
    %84 = vector.multi_reduction <add>, %83, %cst_40 [1] : vector<24x16xf32> to vector<24xf32>
    %85 = vector.shape_cast %84 : vector<24xf32> to vector<24x1xf32>
    %cst_41 = arith.constant 1.600000e+01 : f32
    %86 = vector.broadcast %cst_41 : f32 to vector<24x1xf32>
    %87 = arith.divf %85, %86 : vector<24x1xf32>
    %cst_42 = arith.constant 9.99999997E-7 : f32
    %88 = vector.broadcast %cst_42 : f32 to vector<24x1xf32>
    %89 = arith.addf %87, %88 : vector<24x1xf32>
    %90 = math.rsqrt %89 : vector<24x1xf32>
    %91 = vector.broadcast %90 : vector<24x1xf32> to vector<24x16xf32>
    %92 = arith.mulf %82, %91 : vector<24x16xf32>
    %93 = vector.broadcast %12 : vector<1x16xf32> to vector<24x16xf32>
    %94 = arith.mulf %92, %93 : vector<24x16xf32>
    %95 = arith.truncf %94 : vector<24x16xf32> to vector<24x16xbf16>
    %cst_43 = arith.constant dense<0.000000e+00> : vector<24x16xf32>
    %96 = tpu.matmul %95, %10, %cst_43 {dimension_numbers = #tpu.dot_dimension_numbers<[1], [0], [0], [1], [0, 0, 1, 1], [], []>} : vector<24x16xbf16>, vector<16x16xbf16>, vector<24x16xf32> -> vector<24x16xf32>
    %97 = arith.mulf %94, %7 : vector<24x16xf32>
    %98 = arith.mulf %96, %9 : vector<24x16xf32>
    %99 = arith.addf %97, %98 : vector<24x16xf32>
    %100 = vector.extract_strided_slice %80 {offsets = [0, 0], sizes = [24, 16], strides = [1, 1]} : vector<24x32xf32> to vector<24x16xf32>
    %101 = arith.mulf %100, %100 : vector<24x16xf32>
    %cst_44 = arith.constant dense<0.000000e+00> : vector<24xf32>
    %102 = vector.multi_reduction <add>, %101, %cst_44 [1] : vector<24x16xf32> to vector<24xf32>
    %103 = vector.shape_cast %102 : vector<24xf32> to vector<24x1xf32>
    %cst_45 = arith.constant 1.600000e+01 : f32
    %104 = vector.broadcast %cst_45 : f32 to vector<24x1xf32>
    %105 = arith.divf %103, %104 : vector<24x1xf32>
    %cst_46 = arith.constant 9.99999997E-7 : f32
    %106 = vector.broadcast %cst_46 : f32 to vector<24x1xf32>
    %107 = arith.addf %105, %106 : vector<24x1xf32>
    %108 = math.rsqrt %107 : vector<24x1xf32>
    %109 = vector.broadcast %108 : vector<24x1xf32> to vector<24x16xf32>
    %110 = arith.mulf %100, %109 : vector<24x16xf32>
    %111 = vector.broadcast %14 : vector<1x16xf32> to vector<24x16xf32>
    %112 = arith.mulf %110, %111 : vector<24x16xf32>
    %113 = arith.truncf %112 : vector<24x16xf32> to vector<24x16xbf16>
    %cst_47 = arith.constant dense<0.000000e+00> : vector<24x16xf32>
    %114 = tpu.matmul %113, %10, %cst_47 {dimension_numbers = #tpu.dot_dimension_numbers<[1], [0], [0], [1], [0, 0, 1, 1], [], []>} : vector<24x16xbf16>, vector<16x16xbf16>, vector<24x16xf32> -> vector<24x16xf32>
    %115 = arith.mulf %112, %7 : vector<24x16xf32>
    %116 = arith.mulf %114, %9 : vector<24x16xf32>
    %117 = arith.addf %115, %116 : vector<24x16xf32>
    %118 = vector.extract_strided_slice %81 {offsets = [0, 0], sizes = [24, 16], strides = [1, 1]} : vector<24x32xf32> to vector<24x16xf32>
    %119 = arith.truncf %118 : vector<24x16xf32> to vector<24x16xbf16>
    %120 = arith.truncf %99 : vector<24x16xf32> to vector<24x16xbf16>
    %121 = arith.truncf %117 : vector<24x16xf32> to vector<24x16xbf16>
    %cst_48 = arith.constant dense<0.000000e+00> : vector<24x24xf32>
    %122 = tpu.matmul %120, %121, %cst_48 {dimension_numbers = #tpu.dot_dimension_numbers<[1], [1], [0], [0], [0, 0, 1, 0], [], []>} : vector<24x16xbf16>, vector<24x16xbf16>, vector<24x24xf32> -> vector<24x24xf32>
    %cst_49 = arith.constant 2.500000e-01 : f32
    %123 = vector.broadcast %cst_49 : f32 to vector<24x24xf32>
    %124 = arith.mulf %122, %123 : vector<24x24xf32>
    %cst_50 = arith.constant dense<0xFF800000> : vector<24xf32>
    %125 = vector.multi_reduction <maximumf>, %124, %cst_50 [1] : vector<24x24xf32> to vector<24xf32>
    %126 = vector.shape_cast %125 : vector<24xf32> to vector<24x1xf32>
    %127 = vector.broadcast %126 : vector<24x1xf32> to vector<24x24xf32>
    %128 = arith.subf %124, %127 : vector<24x24xf32>
    %129 = math.exp %128 : vector<24x24xf32>
    %cst_51 = arith.constant dense<0.000000e+00> : vector<24xf32>
    %130 = vector.multi_reduction <add>, %129, %cst_51 [1] : vector<24x24xf32> to vector<24xf32>
    %131 = vector.shape_cast %130 : vector<24xf32> to vector<24x1xf32>
    %132 = tpu.reciprocal %131 {approx = true} : vector<24x1xf32> -> vector<24x1xf32>
    %133 = vector.broadcast %132 : vector<24x1xf32> to vector<24x24xf32>
    %134 = arith.mulf %129, %133 : vector<24x24xf32>
    %135 = arith.truncf %134 : vector<24x24xf32> to vector<24x24xbf16>
    %cst_52 = arith.constant dense<0.000000e+00> : vector<24x16xf32>
    %136 = tpu.matmul %135, %119, %cst_52 {dimension_numbers = #tpu.dot_dimension_numbers<[1], [0], [0], [1], [0, 0, 1, 1], [], []>} : vector<24x24xbf16>, vector<24x16xbf16>, vector<24x16xf32> -> vector<24x16xf32>
    %137 = vector.extract_strided_slice %79 {offsets = [0, 16], sizes = [24, 16], strides = [1, 1]} : vector<24x32xf32> to vector<24x16xf32>
    %138 = arith.mulf %137, %137 : vector<24x16xf32>
    %cst_53 = arith.constant dense<0.000000e+00> : vector<24xf32>
    %139 = vector.multi_reduction <add>, %138, %cst_53 [1] : vector<24x16xf32> to vector<24xf32>
    %140 = vector.shape_cast %139 : vector<24xf32> to vector<24x1xf32>
    %cst_54 = arith.constant 1.600000e+01 : f32
    %141 = vector.broadcast %cst_54 : f32 to vector<24x1xf32>
    %142 = arith.divf %140, %141 : vector<24x1xf32>
    %cst_55 = arith.constant 9.99999997E-7 : f32
    %143 = vector.broadcast %cst_55 : f32 to vector<24x1xf32>
    %144 = arith.addf %142, %143 : vector<24x1xf32>
    %145 = math.rsqrt %144 : vector<24x1xf32>
    %146 = vector.broadcast %145 : vector<24x1xf32> to vector<24x16xf32>
    %147 = arith.mulf %137, %146 : vector<24x16xf32>
    %148 = vector.broadcast %12 : vector<1x16xf32> to vector<24x16xf32>
    %149 = arith.mulf %147, %148 : vector<24x16xf32>
    %150 = arith.truncf %149 : vector<24x16xf32> to vector<24x16xbf16>
    %cst_56 = arith.constant dense<0.000000e+00> : vector<24x16xf32>
    %151 = tpu.matmul %150, %10, %cst_56 {dimension_numbers = #tpu.dot_dimension_numbers<[1], [0], [0], [1], [0, 0, 1, 1], [], []>} : vector<24x16xbf16>, vector<16x16xbf16>, vector<24x16xf32> -> vector<24x16xf32>
    %152 = arith.mulf %149, %7 : vector<24x16xf32>
    %153 = arith.mulf %151, %9 : vector<24x16xf32>
    %154 = arith.addf %152, %153 : vector<24x16xf32>
    %155 = vector.extract_strided_slice %80 {offsets = [0, 16], sizes = [24, 16], strides = [1, 1]} : vector<24x32xf32> to vector<24x16xf32>
    %156 = arith.mulf %155, %155 : vector<24x16xf32>
    %cst_57 = arith.constant dense<0.000000e+00> : vector<24xf32>
    %157 = vector.multi_reduction <add>, %156, %cst_57 [1] : vector<24x16xf32> to vector<24xf32>
    %158 = vector.shape_cast %157 : vector<24xf32> to vector<24x1xf32>
    %cst_58 = arith.constant 1.600000e+01 : f32
    %159 = vector.broadcast %cst_58 : f32 to vector<24x1xf32>
    %160 = arith.divf %158, %159 : vector<24x1xf32>
    %cst_59 = arith.constant 9.99999997E-7 : f32
    %161 = vector.broadcast %cst_59 : f32 to vector<24x1xf32>
    %162 = arith.addf %160, %161 : vector<24x1xf32>
    %163 = math.rsqrt %162 : vector<24x1xf32>
    %164 = vector.broadcast %163 : vector<24x1xf32> to vector<24x16xf32>
    %165 = arith.mulf %155, %164 : vector<24x16xf32>
    %166 = vector.broadcast %14 : vector<1x16xf32> to vector<24x16xf32>
    %167 = arith.mulf %165, %166 : vector<24x16xf32>
    %168 = arith.truncf %167 : vector<24x16xf32> to vector<24x16xbf16>
    %cst_60 = arith.constant dense<0.000000e+00> : vector<24x16xf32>
    %169 = tpu.matmul %168, %10, %cst_60 {dimension_numbers = #tpu.dot_dimension_numbers<[1], [0], [0], [1], [0, 0, 1, 1], [], []>} : vector<24x16xbf16>, vector<16x16xbf16>, vector<24x16xf32> -> vector<24x16xf32>
    %170 = arith.mulf %167, %7 : vector<24x16xf32>
    %171 = arith.mulf %169, %9 : vector<24x16xf32>
    %172 = arith.addf %170, %171 : vector<24x16xf32>
    %173 = vector.extract_strided_slice %81 {offsets = [0, 16], sizes = [24, 16], strides = [1, 1]} : vector<24x32xf32> to vector<24x16xf32>
    %174 = arith.truncf %173 : vector<24x16xf32> to vector<24x16xbf16>
    %175 = arith.truncf %154 : vector<24x16xf32> to vector<24x16xbf16>
    %176 = arith.truncf %172 : vector<24x16xf32> to vector<24x16xbf16>
    %cst_61 = arith.constant dense<0.000000e+00> : vector<24x24xf32>
    %177 = tpu.matmul %175, %176, %cst_61 {dimension_numbers = #tpu.dot_dimension_numbers<[1], [1], [0], [0], [0, 0, 1, 0], [], []>} : vector<24x16xbf16>, vector<24x16xbf16>, vector<24x24xf32> -> vector<24x24xf32>
    %cst_62 = arith.constant 2.500000e-01 : f32
    %178 = vector.broadcast %cst_62 : f32 to vector<24x24xf32>
    %179 = arith.mulf %177, %178 : vector<24x24xf32>
    %cst_63 = arith.constant dense<0xFF800000> : vector<24xf32>
    %180 = vector.multi_reduction <maximumf>, %179, %cst_63 [1] : vector<24x24xf32> to vector<24xf32>
    %181 = vector.shape_cast %180 : vector<24xf32> to vector<24x1xf32>
    %182 = vector.broadcast %181 : vector<24x1xf32> to vector<24x24xf32>
    %183 = arith.subf %179, %182 : vector<24x24xf32>
    %184 = math.exp %183 : vector<24x24xf32>
    %cst_64 = arith.constant dense<0.000000e+00> : vector<24xf32>
    %185 = vector.multi_reduction <add>, %184, %cst_64 [1] : vector<24x24xf32> to vector<24xf32>
    %186 = vector.shape_cast %185 : vector<24xf32> to vector<24x1xf32>
    %187 = tpu.reciprocal %186 {approx = true} : vector<24x1xf32> -> vector<24x1xf32>
    %188 = vector.broadcast %187 : vector<24x1xf32> to vector<24x24xf32>
    %189 = arith.mulf %184, %188 : vector<24x24xf32>
    %190 = arith.truncf %189 : vector<24x24xf32> to vector<24x24xbf16>
    %cst_65 = arith.constant dense<0.000000e+00> : vector<24x16xf32>
    %191 = tpu.matmul %190, %174, %cst_65 {dimension_numbers = #tpu.dot_dimension_numbers<[1], [0], [0], [1], [0, 0, 1, 1], [], []>} : vector<24x24xbf16>, vector<24x16xbf16>, vector<24x16xf32> -> vector<24x16xf32>
    %192 = tpu.concatenate %136, %191 in 1 : vector<24x16xf32>, vector<24x16xf32> -> vector<24x32xf32>
    %c0_66 = arith.constant 0 : index
    %c0_67 = arith.constant 0 : index
    %193 = vector.load %arg14[%c0_66, %c0_67] : memref<160x32xbf16, #tpu.memory_space<vmem>>, vector<160x32xbf16>
    %194 = arith.truncf %192 : vector<24x32xf32> to vector<24x32xbf16>
    %195 = vector.extract_strided_slice %193 {offsets = [0, 0], sizes = [32, 32], strides = [1, 1]} : vector<160x32xbf16> to vector<32x32xbf16>
    %cst_68 = arith.constant dense<0.000000e+00> : vector<24x32xf32>
    %196 = tpu.matmul %194, %195, %cst_68 {dimension_numbers = #tpu.dot_dimension_numbers<[1], [0], [0], [1], [0, 0, 1, 1], [], []>} : vector<24x32xbf16>, vector<32x32xbf16>, vector<24x32xf32> -> vector<24x32xf32>
    %197 = arith.truncf %71 : vector<24x128xf32> to vector<24x128xbf16>
    %198 = vector.extract_strided_slice %193 {offsets = [32, 0], sizes = [128, 32], strides = [1, 1]} : vector<160x32xbf16> to vector<128x32xbf16>
    %cst_69 = arith.constant dense<0.000000e+00> : vector<24x32xf32>
    %199 = tpu.matmul %197, %198, %cst_69 {dimension_numbers = #tpu.dot_dimension_numbers<[1], [0], [0], [1], [0, 0, 1, 1], [], []>} : vector<24x128xbf16>, vector<128x32xbf16>, vector<24x32xf32> -> vector<24x32xf32>
    %200 = arith.addf %196, %199 : vector<24x32xf32>
    %c0_70 = arith.constant 0 : index
    %c0_71 = arith.constant 0 : index
    %201 = vector.load %arg15[%c0_70, %c0_71] : memref<1x32xbf16, #tpu.memory_space<vmem>>, vector<1x32xbf16>
    %202 = arith.extf %201 : vector<1x32xbf16> to vector<1x32xf32>
    %203 = vector.broadcast %202 : vector<1x32xf32> to vector<24x32xf32>
    %204 = arith.addf %200, %203 : vector<24x32xf32>
    %205 = vector.broadcast %29 : vector<1x32xf32> to vector<24x32xf32>
    %206 = arith.mulf %205, %204 : vector<24x32xf32>
    %207 = arith.addf %2, %206 : vector<24x32xf32>
    %208 = vector.shape_cast %207 : vector<24x32xf32> to vector<1x24x32xf32>
    %209 = arith.truncf %208 : vector<1x24x32xf32> to vector<1x24x32xbf16>
    %c0_72 = arith.constant 0 : index
    %c0_73 = arith.constant 0 : index
    %c0_74 = arith.constant 0 : index
    %210 = vector.load %arg16[%c0_72, %c0_73, %c0_74] : memref<1x24x32xbf16, #tpu.memory_space<vmem>>, vector<1x24x32xbf16>
    tpu.vector_store %arg16[%c0_72, %c0_73, %c0_74], %209 {strides = array<i32>} : memref<1x24x32xbf16, #tpu.memory_space<vmem>>, vector<1x24x32xbf16>,
    return
  }
  func.func @transform_0(%arg0: i32) -> (i32, i32, i32) {
    %c0_i32 = arith.constant 0 : i32
    %c0_i32_0 = arith.constant 0 : i32
    %c0_i32_1 = arith.constant 0 : i32
    return %arg0, %c0_i32, %c0_i32_0 : i32, i32, i32
  }
  func.func @transform_1(%arg0: i32) -> (i32, i32, i32) {
    %c0_i32 = arith.constant 0 : i32
    %c0_i32_0 = arith.constant 0 : i32
    %c0_i32_1 = arith.constant 0 : i32
    return %arg0, %c0_i32, %c0_i32_0 : i32, i32, i32
  }
  func.func @transform_2(%arg0: i32) -> (i32, i32) {
    %c0_i32 = arith.constant 0 : i32
    %c0_i32_0 = arith.constant 0 : i32
    %c0_i32_1 = arith.constant 0 : i32
    return %c0_i32, %c0_i32_0 : i32, i32
  }
  func.func @transform_3(%arg0: i32) -> (i32, i32) {
    %c0_i32 = arith.constant 0 : i32
    %c0_i32_0 = arith.constant 0 : i32
    %c0_i32_1 = arith.constant 0 : i32
    return %c0_i32, %c0_i32_0 : i32, i32
  }
  func.func @transform_4(%arg0: i32) -> (i32, i32) {
    %c0_i32 = arith.constant 0 : i32
    %c0_i32_0 = arith.constant 0 : i32
    %c0_i32_1 = arith.constant 0 : i32
    return %c0_i32, %c0_i32_0 : i32, i32
  }
  func.func @transform_5(%arg0: i32) -> (i32, i32) {
    %c0_i32 = arith.constant 0 : i32
    %c0_i32_0 = arith.constant 0 : i32
    %c0_i32_1 = arith.constant 0 : i32
    return %c0_i32, %c0_i32_0 : i32, i32
  }
  func.func @transform_6(%arg0: i32) -> (i32, i32) {
    %c0_i32 = arith.constant 0 : i32
    %c0_i32_0 = arith.constant 0 : i32
    %c0_i32_1 = arith.constant 0 : i32
    return %c0_i32, %c0_i32_0 : i32, i32
  }
  func.func @transform_7(%arg0: i32) -> (i32, i32) {
    %c0_i32 = arith.constant 0 : i32
    %c0_i32_0 = arith.constant 0 : i32
    %c0_i32_1 = arith.constant 0 : i32
    return %c0_i32, %c0_i32_0 : i32, i32
  }
  func.func @transform_8(%arg0: i32) -> (i32, i32) {
    %c0_i32 = arith.constant 0 : i32
    %c0_i32_0 = arith.constant 0 : i32
    %c0_i32_1 = arith.constant 0 : i32
    return %c0_i32, %c0_i32_0 : i32, i32
  }
  func.func @transform_9(%arg0: i32) -> (i32, i32) {
    %c0_i32 = arith.constant 0 : i32
    %c0_i32_0 = arith.constant 0 : i32
    %c0_i32_1 = arith.constant 0 : i32
    return %c0_i32, %c0_i32_0 : i32, i32
  }
  func.func @transform_10(%arg0: i32) -> (i32, i32) {
    %c0_i32 = arith.constant 0 : i32
    %c0_i32_0 = arith.constant 0 : i32
    %c0_i32_1 = arith.constant 0 : i32
    return %c0_i32, %c0_i32_0 : i32, i32
  }
  func.func @transform_11(%arg0: i32) -> (i32, i32) {
    %c0_i32 = arith.constant 0 : i32
    %c0_i32_0 = arith.constant 0 : i32
    %c0_i32_1 = arith.constant 0 : i32
    return %c0_i32, %c0_i32_0 : i32, i32
  }
  func.func @transform_12(%arg0: i32) -> (i32, i32) {
    %c0_i32 = arith.constant 0 : i32
    %c0_i32_0 = arith.constant 0 : i32
    %c0_i32_1 = arith.constant 0 : i32
    return %c0_i32, %c0_i32_0 : i32, i32
  }
  func.func @transform_13(%arg0: i32) -> (i32, i32) {
    %c0_i32 = arith.constant 0 : i32
    %c0_i32_0 = arith.constant 0 : i32
    %c0_i32_1 = arith.constant 0 : i32
    return %c0_i32, %c0_i32_0 : i32, i32
  }
  func.func @transform_14(%arg0: i32) -> (i32, i32) {
    %c0_i32 = arith.constant 0 : i32
    %c0_i32_0 = arith.constant 0 : i32
    %c0_i32_1 = arith.constant 0 : i32
    return %c0_i32, %c0_i32_0 : i32, i32
  }
  func.func @transform_15(%arg0: i32) -> (i32, i32, i32) {
    %c0_i32 = arith.constant 0 : i32
    %c0_i32_0 = arith.constant 0 : i32
    %c0_i32_1 = arith.constant 0 : i32
    return %arg0, %c0_i32, %c0_i32_0 : i32, i32, i32
  }
}

module attributes {stable_mosaic.version = 11 : i64} {
  func.func @_out_layers_kernel(%arg0: i32, %arg1: memref<1x24x32xbf16, #tpu.memory_space<vmem>>, %arg2: memref<1x1x32xbf16, #tpu.memory_space<vmem>>, %arg3: memref<32x64xbf16, #tpu.memory_space<vmem>>, %arg4: memref<1x64xbf16, #tpu.memory_space<vmem>>, %arg5: memref<32x16xbf16, #tpu.memory_space<vmem>>, %arg6: memref<1x16xbf16, #tpu.memory_space<vmem>>, %arg7: memref<1x16x16xbf16, #tpu.memory_space<vmem>>) attributes {dimension_semantics = [#tpu.dimension_semantics<parallel>], iteration_bounds = array<i64: 2>, scalar_prefetch = 0 : i64, scratch_operands = 0 : i64, tpu.core_type = #tpu.core_type<tc>, window_params = [{transform_indices = @transform_0, window_bounds = array<i64: 1, 24, 32>}, {transform_indices = @transform_1, window_bounds = array<i64: 1, 1, 32>}, {pipeline_mode = #tpu.pipeline_mode<synchronous>, transform_indices = @transform_2, window_bounds = array<i64: 32, 64>}, {pipeline_mode = #tpu.pipeline_mode<synchronous>, transform_indices = @transform_3, window_bounds = array<i64: 1, 64>}, {pipeline_mode = #tpu.pipeline_mode<synchronous>, transform_indices = @transform_4, window_bounds = array<i64: 32, 16>}, {pipeline_mode = #tpu.pipeline_mode<synchronous>, transform_indices = @transform_5, window_bounds = array<i64: 1, 16>}, {transform_indices = @transform_6, window_bounds = array<i64: 1, 16, 16>}]} {
    %c0 = arith.constant 0 : index
    %c0_0 = arith.constant 0 : index
    %c0_1 = arith.constant 0 : index
    %0 = vector.load %arg1[%c0, %c0_0, %c0_1] : memref<1x24x32xbf16, #tpu.memory_space<vmem>>, vector<1x24x32xbf16>
    %1 = vector.shape_cast %0 : vector<1x24x32xbf16> to vector<24x32xbf16>
    %2 = arith.extf %1 : vector<24x32xbf16> to vector<24x32xf32>
    %3 = vector.extract_strided_slice %2 {offsets = [8, 0], sizes = [16, 32], strides = [1, 1]} : vector<24x32xf32> to vector<16x32xf32>
    %c0_2 = arith.constant 0 : index
    %c0_3 = arith.constant 0 : index
    %c0_4 = arith.constant 0 : index
    %4 = vector.load %arg2[%c0_2, %c0_3, %c0_4] : memref<1x1x32xbf16, #tpu.memory_space<vmem>>, vector<1x1x32xbf16>
    %5 = vector.shape_cast %4 : vector<1x1x32xbf16> to vector<1x32xbf16>
    %6 = arith.extf %5 : vector<1x32xbf16> to vector<1x32xf32>
    %7 = arith.negf %6 : vector<1x32xf32>
    %8 = math.exp %7 : vector<1x32xf32>
    %cst = arith.constant 1.000000e+00 : f32
    %9 = vector.broadcast %cst : f32 to vector<1x32xf32>
    %10 = arith.addf %9, %8 : vector<1x32xf32>
    %11 = arith.divf %9, %10 : vector<1x32xf32>
    %12 = arith.mulf %6, %11 : vector<1x32xf32>
    %13 = arith.truncf %12 : vector<1x32xf32> to vector<1x32xbf16>
    %c0_5 = arith.constant 0 : index
    %c0_6 = arith.constant 0 : index
    %14 = vector.load %arg3[%c0_5, %c0_6] : memref<32x64xbf16, #tpu.memory_space<vmem>>, vector<32x64xbf16>
    %cst_7 = arith.constant dense<0.000000e+00> : vector<1x64xf32>
    %15 = tpu.matmul %13, %14, %cst_7 {dimension_numbers = #tpu.dot_dimension_numbers<[1], [0], [0], [1], [0, 0, 1, 1], [], []>} : vector<1x32xbf16>, vector<32x64xbf16>, vector<1x64xf32> -> vector<1x64xf32>
    %c0_8 = arith.constant 0 : index
    %c0_9 = arith.constant 0 : index
    %16 = vector.load %arg4[%c0_8, %c0_9] : memref<1x64xbf16, #tpu.memory_space<vmem>>, vector<1x64xbf16>
    %17 = arith.extf %16 : vector<1x64xbf16> to vector<1x64xf32>
    %18 = arith.addf %15, %17 : vector<1x64xf32>
    %19 = vector.extract_strided_slice %18 {offsets = [0, 0], sizes = [1, 32], strides = [1, 1]} : vector<1x64xf32> to vector<1x32xf32>
    %20 = vector.extract_strided_slice %18 {offsets = [0, 32], sizes = [1, 32], strides = [1, 1]} : vector<1x64xf32> to vector<1x32xf32>
    %cst_10 = arith.constant dense<0.000000e+00> : vector<16xf32>
    %21 = vector.multi_reduction <add>, %3, %cst_10 [1] : vector<16x32xf32> to vector<16xf32>
    %22 = vector.shape_cast %21 : vector<16xf32> to vector<16x1xf32>
    %cst_11 = arith.constant 3.200000e+01 : f32
    %23 = vector.broadcast %cst_11 : f32 to vector<16x1xf32>
    %24 = arith.divf %22, %23 : vector<16x1xf32>
    %25 = vector.broadcast %24 : vector<16x1xf32> to vector<16x32xf32>
    %26 = arith.subf %3, %25 : vector<16x32xf32>
    %27 = arith.mulf %26, %26 : vector<16x32xf32>
    %cst_12 = arith.constant dense<0.000000e+00> : vector<16xf32>
    %28 = vector.multi_reduction <add>, %27, %cst_12 [1] : vector<16x32xf32> to vector<16xf32>
    %29 = vector.shape_cast %28 : vector<16xf32> to vector<16x1xf32>
    %cst_13 = arith.constant 3.200000e+01 : f32
    %30 = vector.broadcast %cst_13 : f32 to vector<16x1xf32>
    %31 = arith.divf %29, %30 : vector<16x1xf32>
    %cst_14 = arith.constant 9.99999997E-7 : f32
    %32 = vector.broadcast %cst_14 : f32 to vector<16x1xf32>
    %33 = arith.addf %31, %32 : vector<16x1xf32>
    %34 = math.rsqrt %33 : vector<16x1xf32>
    %35 = vector.broadcast %34 : vector<16x1xf32> to vector<16x32xf32>
    %36 = arith.mulf %26, %35 : vector<16x32xf32>
    %cst_15 = arith.constant 1.000000e+00 : f32
    %37 = vector.broadcast %cst_15 : f32 to vector<1x32xf32>
    %38 = arith.addf %37, %19 : vector<1x32xf32>
    %39 = vector.broadcast %38 : vector<1x32xf32> to vector<16x32xf32>
    %40 = arith.mulf %36, %39 : vector<16x32xf32>
    %41 = vector.broadcast %20 : vector<1x32xf32> to vector<16x32xf32>
    %42 = arith.addf %40, %41 : vector<16x32xf32>
    %43 = arith.truncf %42 : vector<16x32xf32> to vector<16x32xbf16>
    %c0_16 = arith.constant 0 : index
    %c0_17 = arith.constant 0 : index
    %44 = vector.load %arg5[%c0_16, %c0_17] : memref<32x16xbf16, #tpu.memory_space<vmem>>, vector<32x16xbf16>
    %cst_18 = arith.constant dense<0.000000e+00> : vector<16x16xf32>
    %45 = tpu.matmul %43, %44, %cst_18 {dimension_numbers = #tpu.dot_dimension_numbers<[1], [0], [0], [1], [0, 0, 1, 1], [], []>} : vector<16x32xbf16>, vector<32x16xbf16>, vector<16x16xf32> -> vector<16x16xf32>
    %c0_19 = arith.constant 0 : index
    %c0_20 = arith.constant 0 : index
    %46 = vector.load %arg6[%c0_19, %c0_20] : memref<1x16xbf16, #tpu.memory_space<vmem>>, vector<1x16xbf16>
    %47 = arith.extf %46 : vector<1x16xbf16> to vector<1x16xf32>
    %48 = vector.broadcast %47 : vector<1x16xf32> to vector<16x16xf32>
    %49 = arith.addf %45, %48 : vector<16x16xf32>
    %50 = vector.shape_cast %49 : vector<16x16xf32> to vector<1x16x16xf32>
    %51 = arith.truncf %50 : vector<1x16x16xf32> to vector<1x16x16xbf16>
    %c0_21 = arith.constant 0 : index
    %c0_22 = arith.constant 0 : index
    %c0_23 = arith.constant 0 : index
    %52 = vector.load %arg7[%c0_21, %c0_22, %c0_23] : memref<1x16x16xbf16, #tpu.memory_space<vmem>>, vector<1x16x16xbf16>
    tpu.vector_store %arg7[%c0_21, %c0_22, %c0_23], %51 {strides = array<i32>} : memref<1x16x16xbf16, #tpu.memory_space<vmem>>, vector<1x16x16xbf16>,
    return
  }
  func.func @transform_0(%arg0: i32) -> (i32, i32, i32) {
    %c0_i32 = arith.constant 0 : i32
    %c0_i32_0 = arith.constant 0 : i32
    %c0_i32_1 = arith.constant 0 : i32
    return %arg0, %c0_i32, %c0_i32_0 : i32, i32, i32
  }
  func.func @transform_1(%arg0: i32) -> (i32, i32, i32) {
    %c0_i32 = arith.constant 0 : i32
    %c0_i32_0 = arith.constant 0 : i32
    %c0_i32_1 = arith.constant 0 : i32
    return %arg0, %c0_i32, %c0_i32_0 : i32, i32, i32
  }
  func.func @transform_2(%arg0: i32) -> (i32, i32) {
    %c0_i32 = arith.constant 0 : i32
    %c0_i32_0 = arith.constant 0 : i32
    %c0_i32_1 = arith.constant 0 : i32
    return %c0_i32, %c0_i32_0 : i32, i32
  }
  func.func @transform_3(%arg0: i32) -> (i32, i32) {
    %c0_i32 = arith.constant 0 : i32
    %c0_i32_0 = arith.constant 0 : i32
    %c0_i32_1 = arith.constant 0 : i32
    return %c0_i32, %c0_i32_0 : i32, i32
  }
  func.func @transform_4(%arg0: i32) -> (i32, i32) {
    %c0_i32 = arith.constant 0 : i32
    %c0_i32_0 = arith.constant 0 : i32
    %c0_i32_1 = arith.constant 0 : i32
    return %c0_i32, %c0_i32_0 : i32, i32
  }
  func.func @transform_5(%arg0: i32) -> (i32, i32) {
    %c0_i32 = arith.constant 0 : i32
    %c0_i32_0 = arith.constant 0 : i32
    %c0_i32_1 = arith.constant 0 : i32
    return %c0_i32, %c0_i32_0 : i32, i32
  }
  func.func @transform_6(%arg0: i32) -> (i32, i32, i32) {
    %c0_i32 = arith.constant 0 : i32
    %c0_i32_0 = arith.constant 0 : i32
    %c0_i32_1 = arith.constant 0 : i32
    return %arg0, %c0_i32, %c0_i32_0 : i32, i32, i32
  }
}

</mosaic_0001>

<bundles_post_ra>
// kernel: flux_transformer_forward.5
= control target key start
LH: loop header
LB: loop body
LE: loop exit
PB: predicated region body
PF: predicated region fallthrough
CT: control target
= control target key end

     0   :  { %s660_s24 = smov 0   ;;  %s702_s0 = inlined_call_operand.vmem [shape: bf16[2,16,16], index: 0, kind: input, shape index: {}]   ;;  %s703_s1 = inlined_call_operand.vmem [shape: bf16[2,8,32], index: 1, kind: input, shape index: {}]   ;;  %s704_s2 = inlined_call_operand.vmem [shape: bf16[16,32], index: 2, kind: input, shape index: {}]   ;;  %s705_s3 = inlined_call_operand.vmem [shape: bf16[1,32], index: 3, kind: input, shape index: {}]   ;;  %s706_s4 = inlined_call_operand.vmem [shape: bf16[32,32], index: 4, kind: input, shape index: {}]   ;;  %s707_s5 = inlined_call_operand.vmem [shape: bf16[1,32], index: 5, kind: input, shape index: {}]   ;;  %s708_s6 = inlined_call_operand.vmem [shape: bf16[2,16,32], index: 6, kind: output, shape index: {0}]   ;;  %s709_s7 = inlined_call_operand.vmem [shape: bf16[2,8,32], index: 7, kind: output, shape index: {1}]  }
   0x1 LB: > { %s552_s25 = sadd.s32 4294967295, %s616_s24   ;;  %p556_p0 = scmp.ge.s32.totalorder %s616_s24, 1  ;;  %s616_s24 = sphi %s660_s24, %s18_s24  }
   0x2   : > { %p249_p1 = scmp.lt.s32.totalorder %s616_s24, 3 }
   0x4   : > { %p250_p2 = pnand %p556_p0, %p249_p1 }
   0x5   : > { %v606_v0 = vld [vmem:[%s706_s4] sm:$0xff] (!%p250_p2)   ;;  %v618_v1 = vmov (!%p250_p2), 0.0   ;;  %v608_v3 = vld [vmem:[%s706_s4 + $0x8] sm:$0xff] (!%p250_p2)   ;;  %vm619_vm0 = vmmov (!%p250_p2), 0   ;;  %p289_p3 = scmp.lt.s32.totalorder (!%p250_p2), %s552_s25, 1  ;;  %vm329_vm1 = vcmask (!%p250_p2), 130048   ;;  %v314_v6 = vlaneseq (!%p250_p2) }
   0x6   : > { %253 = sbr.rel (%p250_p2) target bundleno = 236 (0xec), region = 44  ;;  %588 = vmatprep.subr.bf16.mxu1 (!%p250_p2), %v618_v1  ;;  %582 = vmatprep.subr.bf16.mxu0 (!%p250_p2), %v618_v1  ;;  %v607_v2 = vld [vmem:[%s704_s2] sm:$0xff] (!%p250_p2)   ;;  %vm408_vm2 = vcmask (!%p250_p2), 261120   ;;  %vm382_vm3 = vcmask (!%p250_p2), 257024  }
   0x7   : > { %589 = vmatpush3.bf16.msra.mxu1 (!%p250_p2), %v606_v0  ;;  %584 = vmatprep.mubr.msk.bf16.mxu0 (!%p250_p2), %vm619_vm0, %v618_v1  ;;  %v315_v7 = vshrl.u32 (!%p250_p2), %v314_v6, 7  ;;  %v312_v8 = vld [vmem:[%s705_s3] sm:$0x1] (!%p250_p2) }
   0x8   : > { %583 = vmatpush3.bf16.msra.mxu0 (!%p250_p2), %v607_v2  ;;  %590 = vmatprep.subr.bf16.mxu1 (!%p250_p2), %v618_v1  ;;  %v390_v9 = vld [vmem:[%s707_s5] sm:$0x1] (!%p250_p2)  ;;  %v313_v10 = vunpack.c.l.bf16 (!%p250_p2), %v312_v8 }
   0x9   : > { %592 = vmatprep.mubr.msk.bf16.mxu1 (!%p250_p2), %vm619_vm0, %v618_v1  ;;  %v316_v11 = vsub.s32 (!%p250_p2), 0, %v315_v7  ;;  %v391_v12 = vunpack.c.l.bf16 (!%p250_p2), %v390_v9 }
   0xb   : > { %591 = vmatpush3.bf16.msra.mxu1 (!%p250_p2), %v608_v3  ;;  %v317_v13 = vrot.slane (!%p250_p2), %v313_v10, %v316_v11  ;;  %v395_v14 = vrot.slane (!%p250_p2), %v391_v12, %v316_v11 }
   0xd   : > { %s711_s25 = smov (!%p289_p3, %s552_s25), 1 }
   0xe   : > { %s573_s9 = sshll.u32 %s711_s25, 3  ;;  %s559_s10 = sshll.u32 %s711_s25, 2 }
   0xf   : > { %s293_s13 = scalar_lea.vmem %s702_s0, %s573_s9  ;;  %s297_s16 = scalar_lea.vmem %s703_s1, %s559_s10 }
  0x10   : > { %v609_v4 = vld [vmem:[%s293_s13] sm:$0xff]   ;;  %s306_s23 = scalar_lea.vmem %s709_s7, %s559_s10  ;;  %s302_s27 = scalar_lea.vmem %s708_s6, %s573_s9 }
  0x11   : > { %v385_v5 = vld [vmem:[%s297_s16] sm:$0xf]  ;;  %585 = vmatmul.mubr.msk.bf16.vlgmr.msra.gmra.mrb[0].mxu0 %vm329_vm1, %v609_v4 }
  0x12   : > { %593 = vmatmul.mubr.msk.bf16.vlgmr.msra.gmra.mrb[0].mxu1 %vm408_vm2, %v385_v5 }
  0xe4   : > { %v367_v15 = vpop.f32.mrb[0].mxu0 }
  0xe5   : > { %v446_v16 = vpop.f32.mrb[0].mxu1  ;;  %v368_v17 = vadd.f32 %v367_v15, %v317_v13  ;;  %v586_v18 = vpop.f32.mrb[1].mxu0 }
  0xe6   : > { %v447_v19 = vadd.f32 %v446_v16, %v395_v14  ;;  %v594_v20 = vpop.f32.mrb[1].mxu1  ;;  %v370_v21 = vpop.f32.mrb[2].mxu0 }
  0xe7   : > { %v449_v22 = vpop.f32.mrb[2].mxu1  ;;  %v575_v23 = vpack.c.bf16 %v368_v17, %v368_v17  ;;  %v371_v25 = vadd.f32 %v370_v21, %v317_v13  ;;  %v587_v26 = vpop.f32.mrb[3].mxu0 }
  0xe8   : > { %v452_v24 = vpack.c.bf16 %v447_v19, %v447_v19  ;;  %v595_v27 = vpop.f32.mrb[3].mxu1 }
  0xe9   : > { %383 = vst.msk [vmem:[%s302_s27] sm:$0xf] %vm382_vm3, %v575_v23  ;;  %v576_v28 = vpack.c.bf16 %v371_v25, %v371_v25 }
  0xea   : > { %453 = vst.msk [vmem:[%s306_s23] sm:$0xf] %vm382_vm3, %v452_v24 }
  0xeb   : > { %384 = vst.msk [vmem:[%s302_s27 + $0x4] sm:$0xf] %vm382_vm3, %v576_v28 }
  0xec PF: > { %s18_s24 = sadd.s32 1, %s616_s24  }
  0xed   : > { %p15_p4 = scmp.ge.s32.totalorder %s18_s24, 4  }
  0xef   :  { %17 = sbr.rel (!%p15_p4) target bundleno = 1 (0x1), region = 89 }

// kernel: flux_transformer_forward.6
= control target key start
LH: loop header
LB: loop body
LE: loop exit
PB: predicated region body
PF: predicated region fallthrough
CT: control target
= control target key end

     0   :  { %v603_v0 = vmov 0.0   ;;  %vm604_vm0 = vmmov 0   ;;  %vm74_vm1 = vcmask 261120   ;;  %vm354_vm2 = vcmask 1043456   ;;  %s788_s3 = inlined_call_operand.vmem [shape: bf16[32,32], index: 3, kind: input, shape index: {}]   ;;  %s789_s7 = inlined_call_operand.vmem [shape: bf16[32,32], index: 7, kind: input, shape index: {}]   ;;  %s790_s0 = inlined_call_operand.vmem [shape: bf16[2,32], index: 0, kind: input, shape index: {}]   ;;  %s791_s11 = inlined_call_operand.vmem [shape: bf16[24,32], index: 11, kind: input, shape index: {}]   ;;  %s792_s1 = inlined_call_operand.vmem [shape: bf16[2,32], index: 1, kind: input, shape index: {}]   ;;  %s793_s2 = inlined_call_operand.vmem [shape: bf16[2,24], index: 2, kind: input, shape index: {}]   ;;  %s794_s5 = inlined_call_operand.vmem [shape: bf16[32,32], index: 5, kind: input, shape index: {}]   ;;  %s795_s9 = inlined_call_operand.vmem [shape: bf16[32,32], index: 9, kind: input, shape index: {}]   ;;  %s796_s13 = inlined_call_operand.vmem [shape: bf16[32,32], index: 13, kind: input, shape index: {}]   ;;  %s797_s4 = inlined_call_operand.vmem [shape: bf16[1,32], index: 4, kind: input, shape index: {}]   ;;  %s798_s8 = inlined_call_operand.vmem [shape: bf16[1,32], index: 8, kind: input, shape index: {}]   ;;  %s799_s12 = inlined_call_operand.vmem [shape: bf16[1,32], index: 12, kind: input, shape index: {}]   ;;  %s800_s6 = inlined_call_operand.vmem [shape: bf16[1,32], index: 6, kind: input, shape index: {}]   ;;  %s801_s10 = inlined_call_operand.vmem [shape: bf16[1,32], index: 10, kind: input, shape index: {}]   ;;  %s802_s14 = inlined_call_operand.vmem [shape: bf16[1,32], index: 14, kind: input, shape index: {}]   ;;  %s803_s15 = inlined_call_operand.vmem [shape: bf16[2,32], index: 15, kind: output, shape index: {}]  }
   0x1   :  { %518 = vmatprep.subr.bf16.mxu0 %v603_v0  ;;  %v579_v1 = vld [vmem:[%s788_s3] sm:$0xff]   ;;  %522 = vmatprep.mubr.msk.bf16.mxu0 %vm604_vm0, %v603_v0  ;;  %v580_v2 = vld [vmem:[%s788_s3 + $0x8] sm:$0xff]   ;;  %vm350_vm3 = vcmask 195584   ;;  %v58_v13 = vlaneseq  ;;  %vm473_vm4 = vcmask 253952  }
   0x2   :  { %526 = vmatprep.subr.bf16.mxu1 %v603_v0  ;;  %530 = vmatprep.mubr.msk.bf16.mxu1 %vm604_vm0, %v603_v0  ;;  %v51_v3 = vld [vmem:[%s790_s0] sm:$0x1]  ;;  %v582_v5 = vld [vmem:[%s789_s7 + $0x8] sm:$0xff]  }
   0x3   :  { %519 = vmatpush3.bf16.msra.mxu0 %v579_v1  ;;  %v581_v4 = vld [vmem:[%s789_s7] sm:$0xff]   ;;  %v584_v8 = vld [vmem:[%s791_s11 + $0x8] ss:$0 sps:$4 sm:$0xff]   ;;  %v59_v14 = vshrl.u32 %v58_v13, 7 }
   0x4   :  { %520 = vmatprep.subr.bf16.mxu0 %v603_v0  ;;  %v191_v6 = vld [vmem:[%s792_s1] sm:$0x1]  ;;  %v356_v9 = vsel %vm354_vm2, %v584_v8, 0  ;;  %v586_v12 = vld [vmem:[%s794_s5 + $0x8] sm:$0xff]  }
   0x5   :  { %v583_v7 = vld [vmem:[%s791_s11] sm:$0xff]   ;;  %v740_v17 = vsub.s32 0, %v59_v14  ;;  %v588_v53 = vld [vmem:[%s795_s9 + $0x8] sm:$0xff]  }
   0x6   :  { %v331_v10 = vld [vmem:[%s793_s2] sm:$0x1]  ;;  %v590_v58 = vld [vmem:[%s796_s13 + $0x8] sm:$0xff]  }
   0x7   :  { %521 = vmatpush3.bf16.msra.mxu0 %v580_v2  ;;  %v585_v11 = vld [vmem:[%s794_s5] sm:$0xff]  }
   0x8   :  { %534 = vmatprep.subr.bf16.mxu0 %v603_v0  ;;  %527 = vmatpush3.bf16.msra.mxu1 %v585_v11  ;;  %v56_v15 = vld [vmem:[%s797_s4] sm:$0x1] }
   0x9   :  { %528 = vmatprep.subr.bf16.mxu1 %v603_v0  ;;  %v57_v16 = vunpack.c.l.bf16 %v56_v15  ;;  %v196_v19 = vld [vmem:[%s798_s8] sm:$0x1] }
   0xa   :  { %523 = vmatmul.mubr.msk.bf16.vlgmr.msra.gmra.mrb[0].mxu0 %vm74_vm1, %v51_v3  ;;  %v197_v23 = vunpack.c.l.bf16 %v196_v19  ;;  %v335_v28 = vld [vmem:[%s799_s12] sm:$0x1] }
   0xb   :  { %535 = vmatpush3.bf16.msra.mxu0 %v581_v4  ;;  %538 = vmatprep.mubr.msk.bf16.mxu0 %vm604_vm0, %v603_v0  ;;  %v61_v18 = vrot.slane %v57_v16, %v740_v17  ;;  %v336_v32 = vunpack.c.l.bf16 %v335_v28  ;;  %v587_v49 = vld [vmem:[%s795_s9] sm:$0xff]  }
   0xc   :  { %536 = vmatprep.subr.bf16.mxu0 %v603_v0  ;;  %529 = vmatpush3.bf16.msra.mxu1 %v586_v12  ;;  %v201_v27 = vrot.slane %v197_v23, %v740_v17  ;;  %v589_v56 = vld [vmem:[%s796_s13] sm:$0xff]  }
   0xd   :  { %542 = vmatprep.subr.bf16.mxu1 %v603_v0  ;;  %v340_v36 = vrot.slane %v336_v32, %v740_v17  ;;  %v130_v62 = vld [vmem:[%s800_s6] sm:$0x1] }
   0xe   :  { %v269_v63 = vld [vmem:[%s801_s10] sm:$0x1]  ;;  %v131_v1 = vunpack.c.l.bf16 %v130_v62 }
   0xf   :  { %537 = vmatpush3.bf16.msra.mxu0 %v582_v5  ;;  %v270_v2 = vunpack.c.l.bf16 %v269_v63 }
  0x10   :  { %550 = vmatprep.subr.bf16.mxu0 %v603_v0  ;;  %v135_v3 = vrot.slane %v131_v1, %v740_v17 }
  0x11   :  { %v274_v4 = vrot.slane %v270_v2, %v740_v17 }
  0x12   :  { %539 = vmatmul.mubr.msk.bf16.vlgmr.msra.gmra.mrb[4].mxu0 %vm74_vm1, %v191_v6 }
  0x13   :  { %551 = vmatpush3.bf16.msra.mxu0 %v583_v7  ;;  %554 = vmatprep.mubr.msk.bf16.mxu0 %vm604_vm0, %v603_v0  ;;  %v566_v7 = vadd.f32 %v274_v4, %v135_v3 }
  0x14   :  { %552 = vmatprep.subr.bf16.mxu0 %v603_v0 }
  0x17   :  { %553 = vmatpush3.bf16.msra.mxu0 %v356_v9 }
  0x1a   :  { %555 = vmatmul.mubr.msk.bf16.vlgmr.msra.gmra.mrb[8].mxu0 %vm350_vm3, %v331_v10 }
  0xdd   :  { %v112_v20 = vpop.f32.mrb[0].mxu0 }
  0xde   :  { %v113_v21 = vadd.f32 %v112_v20, %v61_v18  ;;  %v524_v22 = vpop.f32.mrb[1].mxu0 }
  0xdf   :  { %v115_v24 = vpop.f32.mrb[2].mxu0 }
  0xe0   :  { %v482_v25 = vmul.f32 -1.442695, %v113_v21  ;;  %v525_v26 = vpop.f32.mrb[3].mxu0 }
  0xe2   :  { %591 = vpow2.f32 %v482_v25 }
  0xe5   :  { %v251_v29 = vpop.f32.mrb[4].mxu0 }
  0xe6   :  { %v252_v30 = vadd.f32 %v251_v29, %v201_v27  ;;  %v540_v31 = vpop.f32.mrb[5].mxu0 }
  0xe7   :  { %v254_v33 = vpop.f32.mrb[6].mxu0 }
  0xe8   :  { %v489_v34 = vmul.f32 -1.442695, %v252_v30  ;;  %v541_v35 = vpop.f32.mrb[7].mxu0 }
  0xea   :  { %593 = vpow2.f32 %v489_v34 }
  0xec   :  { %v592_v37 = vpop.eup %591 }
  0xed   :  { %v121_v38 = vadd.f32 1.0, %v592_v37  ;;  %v392_v39 = vpop.f32.mrb[8].mxu0 }
  0xee   :  { %v393_v40 = vadd.f32 %v392_v39, %v340_v36  ;;  %v556_v41 = vpop.f32.mrb[9].mxu0 }
  0xef   :  { %595 = vrcp.f32 %v121_v38  ;;  %v395_v42 = vpop.f32.mrb[10].mxu0 }
  0xf0   :  { %v496_v43 = vmul.f32 -1.442695, %v393_v40  ;;  %v557_v44 = vpop.f32.mrb[11].mxu0 }
  0xf2   :  { %597 = vpow2.f32 %v496_v43 }
  0xf4   :  { %v594_v45 = vpop.eup %593 }
  0xf5   :  { %v260_v46 = vadd.f32 1.0, %v594_v45 }
  0xf7   :  { %599 = vrcp.f32 %v260_v46 }
  0xf9   :  { %v596_v47 = vpop.eup %595 }
  0xfa   :  { %v124_v48 = vmul.f32 %v596_v47, %v113_v21 }
  0xfc   :  { %v598_v50 = vpop.eup %597  ;;  %v125_v51 = vpack.c.bf16 %v124_v48, %v124_v48 }
  0xfd   :  { %v401_v52 = vadd.f32 1.0, %v598_v50 }
  0xfe   :  { %531 = vmatmul.mubr.msk.bf16.vlgmr.msra.gmra.mrb[0].mxu1 %vm74_vm1, %v125_v51 }
  0xff   :  { %543 = vmatpush3.bf16.msra.mxu1 %v587_v49  ;;  %546 = vmatprep.mubr.msk.bf16.mxu1 %vm604_vm0, %v603_v0  ;;  %601 = vrcp.f32 %v401_v52 }
 0x100   :  { %544 = vmatprep.subr.bf16.mxu1 %v603_v0 }
 0x101   :  { %v600_v54 = vpop.eup %599 }
 0x102   :  { %v263_v55 = vmul.f32 %v600_v54, %v252_v30 }
 0x103   :  { %545 = vmatpush3.bf16.msra.mxu1 %v588_v53 }
 0x104   :  { %558 = vmatprep.subr.bf16.mxu1 %v603_v0  ;;  %v264_v57 = vpack.c.bf16 %v263_v55, %v263_v55 }
 0x109   :  { %v602_v59 = vpop.eup %601 }
 0x10a   :  { %547 = vmatmul.mubr.msk.bf16.vlgmr.msra.gmra.mrb[0].mxu1 %vm74_vm1, %v264_v57  ;;  %v404_v60 = vmul.f32 %v602_v59, %v393_v40 }
 0x10b   :  { %559 = vmatpush3.bf16.msra.mxu1 %v589_v56  ;;  %562 = vmatprep.mubr.msk.bf16.mxu1 %vm604_vm0, %v603_v0 }
 0x10c   :  { %560 = vmatprep.subr.bf16.mxu1 %v603_v0  ;;  %v405_v61 = vpack.c.bf16 %v404_v60, %v404_v60  ;;  %v410_v0 = vld [vmem:[%s802_s14] sm:$0x1] }
 0x10d   :  { %v411_v5 = vunpack.c.l.bf16 %v410_v0 }
 0x10f   :  { %561 = vmatpush3.bf16.msra.mxu1 %v590_v58  ;;  %v415_v6 = vrot.slane %v411_v5, %v740_v17 }
 0x111   :  { %v567_v8 = vadd.f32 %v566_v7, %v415_v6 }
 0x116   :  { %563 = vmatmul.mubr.msk.bf16.vlgmr.msra.gmra.mrb[0].mxu1 %vm74_vm1, %v405_v61 }
 0x1e9   :  { %v465_v9 = vpop.f32.mrb[0].mxu1 }
 0x1ea   :  { %v568_v10 = vadd.f32 %v567_v8, %v465_v9  ;;  %v564_v11 = vpop.f32.mrb[1].mxu1 }
 0x1eb   :  { %v468_v12 = vpop.f32.mrb[2].mxu1 }
 0x1ec   :  { %v472_v13 = vpack.c.bf16 %v568_v10, %v568_v10  ;;  %v565_v14 = vpop.f32.mrb[3].mxu1 }
 0x1ee   :  { %474 = vst.msk [vmem:[%s803_s15] sm:$0x1] %vm473_vm4, %v472_v13 }

// kernel: flux_transformer_forward.9
= control target key start
LH: loop header
LB: loop body
LE: loop exit
PB: predicated region body
PF: predicated region fallthrough
CT: control target
= control target key end

     0   :  { %11 = vsyncpa [#allocation3], 0  ;;  %s885_s0 = inlined_call_operand.vmem [shape: bf16[2,24,32], index: 0, kind: input, shape index: {}]   ;;  %s886_s1 = inlined_call_operand.vmem [shape: bf16[2,1,32], index: 1, kind: input, shape index: {}]   ;;  %s887_s2 = inlined_call_operand.vmem [shape: bf16[32,64], index: 2, kind: input, shape index: {}]   ;;  %s888_s3 = inlined_call_operand.vmem [shape: bf16[1,64], index: 3, kind: input, shape index: {}]   ;;  %s889_s4 = inlined_call_operand.vmem [shape: bf16[32,16], index: 4, kind: input, shape index: {}]   ;;  %s890_s5 = inlined_call_operand.vmem [shape: bf16[1,16], index: 5, kind: input, shape index: {}]   ;;  %s891_s6 = inlined_call_operand.hbm [shape: bf16[2,16,16], index: 6, kind: output, shape index: {}]  }
   0x1   :  { %13 = vsyncpa [#allocation3 + $0x1], 0  ;;  %s755_s21 = smov 0   ;;  %s757_s22 = smov 0  }
   0x2   :  { %s759_s23 = smov 0   ;;  %s761_s24 = smov 0  }
   0x3 LB: > { %s776_s25 = sadd.s32 4294967295, %s712_s24   ;;  %s548_s26 = sadd.s32 4294967294, %s712_s24   ;;  %s712_s24 = sphi %s761_s24, %s897_s24   ;;  %s708_s23 = sphi %s759_s23, %s896_s23   ;;  %s704_s22 = sphi %s757_s22, %s895_s22   ;;  %s700_s21 = sphi %s755_s21, %s894_s21  }
   0x4   : > { %s780_s27 = sadd.s32 1, %s712_s24   ;;  %s162_s28 = sadd.s32 1, %s708_s23 }
   0x5   : > { %s159_s29 = ssub.s32 %s712_s24, %s780_s27  ;;  %p172_p0 = scmp.ne.s32.totalorder %s708_s23, %s704_s22 }
   0x6   : > { %p160_p1 = scmp.eq.s32.totalorder %s159_s29, 0  ;;  %p173_p2 = scmp.eq.s32.totalorder %s776_s25, 1 }
   0x7   : > { %p178_p3 = scmp.ne.s32.totalorder %s704_s22, %s700_s21  ;;  %p179_p4 = scmp.eq.s32.totalorder %s548_s26, 1 }
   0x8   : > { %s791_s30 = scalar_select %p160_p1, %s708_s23, %s162_s28  }
   0x9   : > { %p793_p5 = por %p173_p2, %p172_p0  ;;  %p797_p6 = por %p179_p4, %p178_p3 }
   0xa   : > { %p551_p7 = scmp.ge.s32.totalorder %s712_s24, 1  ;;  %p223_p8 = scmp.lt.s32.totalorder %s712_s24, 3 }
   0xc   : > { %p224_p9 = pnand %p551_p7, %p223_p8 }
   0xd   : > { %p256_p10 = scmp.lt.s32.totalorder (!%p224_p9), %s776_s25, 1  ;;  %v638_v0 = vld [vmem:[%s887_s2] sm:$0xff] (!%p224_p9)   ;;  %v714_v1 = vmov (!%p224_p9), 0.0   ;;  %v639_v2 = vld [vmem:[%s887_s2 + $0x8] sm:$0xff] (!%p224_p9)   ;;  %vm715_vm0 = vmmov (!%p224_p9), 0   ;;  %vm297_vm1 = vcmask (!%p224_p9), 261120   ;;  %v369_v27 = vlaneseq (!%p224_p9) }
   0xe   : > { %227 = sbr.rel (%p224_p9) target bundleno = 625 (0x271), region = 44  ;;  %577 = vmatprep.subr.bf16.mxu0 (!%p224_p9), %v714_v1  ;;  %585 = vmatprep.subr.bf16.mxu1 (!%p224_p9), %v714_v1  ;;  %v640_v26 = vld [vmem:[%s889_s4] sm:$0xff] (!%p224_p9)   ;;  %v641_v28 = vld [vmem:[%s889_s4 + $0x8] sm:$0xff] (!%p224_p9)   ;;  %s716_s12 = smov (!%p224_p9), 96   ;;  %vm460_vm2 = vcmask (!%p224_p9), 125952  }
   0xf   : > { %578 = vmatpush3.bf16.msra.mxu0 (!%p224_p9), %v638_v0  ;;  %581 = vmatprep.mubr.msk.bf16.mxu0 (!%p224_p9), %vm715_vm0, %v714_v1  ;;  %v283_v29 = vld [vmem:[%s888_s3] sm:$0x1] (!%p224_p9)  ;;  %v370_v30 = vshrl.u32 (!%p224_p9), %v369_v27, 7  ;;  %s253_s15 = sand.u32 (!%p224_p9), 1, %s704_s22   ;;  %s570_s19 = sshll.u32 (!%p224_p9), %s776_s25, 7 }
  0x10   : > { %579 = vmatprep.subr.bf16.mxu0 (!%p224_p9), %v714_v1  ;;  %589 = vmatprep.mubr.msk.bf16.mxu1 (!%p224_p9), %vm715_vm0, %v714_v1  ;;  %v284_v31 = vunpack.c.l.bf16 (!%p224_p9), %v283_v29  ;;  %v390_v57 = vld [vmem:[%s890_s5] sm:$0x1] (!%p224_p9)  ;;  %s552_s16 = sshll.u32 (!%p224_p9), %s253_s15, 3  ;;  %s842_s28 = scalar_lea.hbm (!%p224_p9), %s891_s6, %s570_s19 }
  0x11   : > { %586 = vmatpush3.bf16.msra.mxu1 (!%p224_p9), %v640_v26  ;;  %v371_v32 = vsub.s32 (!%p224_p9), 0, %v370_v30  ;;  %v391_v58 = vunpack.c.l.bf16 (!%p224_p9), %v390_v57  ;;  %s844_s29 = scalar_lea.sflag (!%p224_p9), [#allocation3], %s253_s15  ;;  %s717_s9 = smov (!%p224_p9), [#allocation2]  }
  0x12   : > { %587 = vmatprep.subr.bf16.mxu1 (!%p224_p9), %v714_v1  ;;  %s654_s10 = sshll.u32 (!%p224_p9), %s717_s9, 4  ;;  %s655_s10 = int_to_ptr.vmem [resolvable:$false] %s654_s10 }
  0x13   : > { %580 = vmatpush3.bf16.msra.mxu0 (!%p224_p9), %v639_v2  ;;  %v395_v59 = vrot.slane (!%p224_p9), %v391_v58, %v371_v32 }
  0x15   : > { %s257_s11 = scalar_select %p256_p10, %s776_s25, 1  ;;  %588 = vmatpush3.bf16.msra.mxu1 %v641_v28 }
  0x17   : > { %s593_s14 = smul.u32 12, %s257_s11  ;;  %s263_s17 = scalar_lea.vmem %s886_s1, %s257_s11 }
  0x18   : > { %v269_v3 = vld [vmem:[%s263_s17] sm:$0x1]  ;;  %s255_s17 = scalar_lea.vmem [#allocation2], %s552_s16  ;;  %s656_s11 = scalar_lea.vmem %s655_s10, 256 }
  0x19   : > { %s260_s20 = scalar_lea.vmem %s885_s0, %s593_s14  ;;  %v270_v4 = vunpack.c.l.bf16 %v269_v3  ;;  %s477_s18 = sshll.u32 %s255_s17, 4  ;;  %s837_s18 = int_to_ptr.vmem [resolvable:$true] %s477_s18 }
  0x1a   : > { %v265_v5 = vld [vmem:[%s260_s20 + $0x4] sm:$0xff]   ;;  %s650_s25 = scalar_lea.vmem %s837_s18, 128  ;;  %p657_p0 = scmp.lt.s32.totalorder %s837_s18, %s655_s10 }
  0x1b   : > { %v267_v6 = vunpack.c.l.bf16 %v265_v5  ;;  %v554_v7 = vmul.f32 -1.442695, %v270_v4  ;;  %v268_v8 = vunpack.c.h.bf16 %v265_v5  ;;  %p651_p11 = scmp.ne.s32.totalorder %s837_s18, %s650_s25  ;;  %p658_p1 = scmp.lt.s32.totalorder %s656_s11, %s650_s25 }
  0x1d   : > { %642 = vpow2.f32 %v554_v7  ;;  %v341_v9 = vsel %vm297_vm1, %v267_v6, 0.0  ;;  %v344_v10 = vsel %vm297_vm1, %v268_v8, 0.0  ;;  %p652_p12 = pnand %p651_p11, %p793_p5  ;;  %p659_p2 = por %p658_p1, %p657_p0 }
  0x1e   : > { %342 = vadd.xlane.f32.xlu0 %v341_v9 }
  0x1f   : > { %p653_p13 = pneg %p652_p12 }
  0x21   : > { %p660_p3 = pnand %p659_p2, %p653_p13 }
  0x22   : > { %345 = vadd.xlane.f32.xlu0 %v344_v10 }
  0x27   : > { %v643_v11 = vpop.eup %642 }
  0x28   : > { %v274_v12 = vadd.f32 1.0, %v643_v11 }
  0x2a   : > { %644 = vrcp.f32 %v274_v12 }
  0x34   : > { %v645_v13 = vpop.eup %644 }
  0x35   : > { %v277_v14 = vmul.f32 %v645_v13, %v270_v4 }
  0x37   : > { %v278_v15 = vpack.c.bf16 %v277_v14, %v277_v14 }
  0x39   : > { %582 = vmatmul.mubr.msk.bf16.vlgmr.msra.gmra.mrb[0].mxu0 %vm297_vm1, %v278_v15 }
  0xab   : > { %v343_v16 = vpop.xlane.xlu0 %342 }
  0xac   : > { %v348_v17 = vmul.f32 0.03125, %v343_v16 }
  0xae   : > { %v350_v18 = vsub.f32 %v267_v6, %v348_v17 }
  0xaf   : > { %v346_v19 = vpop.xlane.xlu0 %345 }
  0xb0   : > { %v349_v20 = vmul.f32 0.03125, %v346_v19  ;;  %v352_v21 = vmul.f32 %v350_v18, %v350_v18 }
  0xb2   : > { %v351_v22 = vsub.f32 %v268_v8, %v349_v20  ;;  %v354_v23 = vsel %vm297_vm1, %v352_v21, 0.0 }
  0xb3   : > { %355 = vadd.xlane.f32.xlu1 %v354_v23 }
  0xb4   : > { %v353_v24 = vmul.f32 %v351_v22, %v351_v22 }
  0xb6   : > { %v357_v25 = vsel %vm297_vm1, %v353_v24, 0.0 }
  0xb7   : > { %358 = vadd.xlane.f32.xlu1 %v357_v25 }
 0x10c   : > { %v335_v33 = vpop.f32.mrb[0].mxu0 }
 0x10d   : > { %v336_v34 = vadd.f32 %v335_v33, %v284_v31  ;;  %v583_v35 = vpop.f32.mrb[1].mxu0 }
 0x10e   : > { %v338_v36 = vpop.f32.mrb[2].mxu0 }
 0x10f   : > { %v368_v37 = vadd.f32 1.0, %v336_v34  ;;  %v378_v38 = vrot.slane %v336_v34, %v371_v32  ;;  %v584_v39 = vpop.f32.mrb[3].mxu0 }
 0x111   : > { %380 = vrot.lane.b32.xlu0 %v378_v38, %s716_s12  ;;  %v372_v40 = vrot.slane %v368_v37, %v371_v32 }
 0x140   : > { %v356_v41 = vpop.xlane.xlu1 %355 }
 0x141   : > { %v360_v43 = vmul.f32 0.03125, %v356_v41 }
 0x143   : > { %v362_v45 = vadd.f32 1e-06, %v360_v43 }
 0x144   : > { %v359_v42 = vpop.xlane.xlu1 %358 }
 0x145   : > { %v361_v44 = vmul.f32 0.03125, %v359_v42  ;;  %646 = vrsqrt.f32 %v362_v45 }
 0x147   : > { %v363_v46 = vadd.f32 1e-06, %v361_v44 }
 0x149   : > { %648 = vrsqrt.f32 %v363_v46 }
 0x14f   : > { %v647_v47 = vpop.eup %646 }
 0x150   : > { %v366_v49 = vmul.f32 %v647_v47, %v350_v18 }
 0x152   : > { %v373_v51 = vmul.f32 %v372_v40, %v366_v49 }
 0x153   : > { %v649_v48 = vpop.eup %648 }
 0x154   : > { %v367_v50 = vmul.f32 %v649_v48, %v351_v22 }
 0x156   : > { %v374_v52 = vmul.f32 %v372_v40, %v367_v50 }
 0x183   : > { %v381_v53 = vpop.permute.xlu0 %380 }
 0x184   : > { %v383_v54 = vadd.f32 %v381_v53, %v373_v51  ;;  %v384_v55 = vadd.f32 %v381_v53, %v374_v52 }
 0x186   : > { %v385_v56 = vpack.c.bf16 %v384_v55, %v383_v54 }
 0x188   : > { %590 = vmatmul.mubr.msk.bf16.vlgmr.msra.gmra.mrb[0].mxu1 %vm297_vm1, %v385_v56 }
 0x25b   : > { %v445_v60 = vpop.f32.mrb[0].mxu1 }
 0x25c   : > { %v446_v61 = vadd.f32 %v445_v60, %v395_v59  ;;  %v591_v62 = vpop.f32.mrb[1].mxu1 }
 0x25d   : > { %v448_v63 = vpop.f32.mrb[2].mxu1 }
 0x25e   : > { %v568_v0 = vpack.c.bf16 %v446_v61, %v446_v61  ;;  %v449_v1 = vadd.f32 %v448_v63, %v395_v59  ;;  %v592_v2 = vpop.f32.mrb[3].mxu1 }
 0x260   : > { %461 = vst.msk [vmem:[%s255_s17] sm:$0xf] %vm460_vm2, %v568_v0  ;;  %v569_v3 = vpack.c.bf16 %v449_v1, %v449_v1 }
 0x262   : > { %462 = vst.msk [vmem:[%s255_s17 + $0x4] sm:$0xf] %vm460_vm2, %v569_v3 }
 0x263   : > { %663 = shalt.err (!%p660_p3)
}
 0x264   : > { %s664_s12 = scalar_lea.hbm %s842_s28, 128  ;;  %s668_s15 = scalar_lea.hbm %s891_s6, 256 }
 0x265   : > { %p665_p4 = scmp.ne.s32.totalorder %s842_s28, %s664_s12  ;;  %p669_p9 = scmp.lt.u32.totalorder %s842_s28, %s891_s6 }
 0x266   : > { %p670_p10 = scmp.lt.u32.totalorder %s668_s15, %s664_s12  ;;  %p672_p12 = scmp.lt.u32.totalorder %s664_s12, %s842_s28 }
 0x267   : > { %p666_p7 = pnand %p665_p4, %p793_p5 }
 0x268   : > { %p671_p11 = por %p670_p10, %p669_p9 }
 0x269   : > { %p667_p8 = pneg %p666_p7 }
 0x26a   : > { %p673_p13 = por %p672_p12, %p671_p11 }
 0x26c   : > { %p674_p0 = pnand %p673_p13, %p667_p8 }
 0x26e   : > { %677 = shalt.err (!%p674_p0)
}
 0x26f   : > { %s718_s19 = smov 64   ;;  %s719_s20 = smov 4  }
 0x270   : > { %594 = dma.vmem_to_hbm [thread:$0]  (%p793_p5), %s837_s18, 128, %s842_s28, %s844_s29, %s718_s19, %s718_s19, %s719_s20  }
 0x271 PF: > { %p600_p1 = scmp.ge.s32.totalorder %s712_s24, 2  ;;  %s492_s26 = sand.u32 1, %s700_s21  }
 0x272   : > { %s493_s25 = scalar_lea.sflag [#allocation3], %s492_s26 }
 0x273   : > { %p597_p2 = pnand %p600_p1, %p797_p6 }
 0x275   : > { %695 = dma.done.wait (!%p597_p2), %s493_s25, 128  }
 0x276   : > { %697 = vsyncadd (!%p597_p2), %s493_s25, 4294967168  ;;  %p16_p3 = scmp.ge.s32.totalorder %s780_s27, 4   ;;  %s894_s21 = smov %s704_s22 }
 0x277   : > { %s895_s22 = smov %s708_s23  ;;  %s896_s23 = smov %s791_s30 }
 0x278   : > { %s897_s24 = smov %s780_s27  ;;  %18 = sbr.rel (!%p16_p3) target bundleno = 3 (0x3), region = 82 }
 0x27f   :  { %498 = vsyncpa [#allocation3], 1 }
 0x280   :  { %500 = vsyncpa [#allocation3 + $0x1], 1 }

// kernel: flux_transformer_forward.8
= control target key start
LH: loop header
LB: loop body
LE: loop exit
PB: predicated region body
PF: predicated region fallthrough
CT: control target
= control target key end

     0   :  { %s2464_s18 = smov 0   ;;  %s2917_s0 = inlined_call_operand.vmem [shape: bf16[2,24,32], index: 0, kind: input, shape index: {}]   ;;  %s2918_s1 = inlined_call_operand.vmem [shape: bf16[2,1,32], index: 1, kind: input, shape index: {}]   ;;  %s2919_s2 = inlined_call_operand.vmem [shape: bf16[24,16], index: 2, kind: input, shape index: {}]   ;;  %s2920_s3 = inlined_call_operand.vmem [shape: bf16[24,16], index: 3, kind: input, shape index: {}]   ;;  %s2921_s4 = inlined_call_operand.vmem [shape: bf16[16,16], index: 4, kind: input, shape index: {}]   ;;  %s2922_s5 = inlined_call_operand.vmem [shape: bf16[32,96], index: 5, kind: input, shape index: {}]   ;;  %s2923_s6 = inlined_call_operand.vmem [shape: bf16[1,96], index: 6, kind: input, shape index: {}]   ;;  %s2924_s7 = inlined_call_operand.vmem [shape: bf16[32,96], index: 7, kind: input, shape index: {}]   ;;  %s2925_s8 = inlined_call_operand.vmem [shape: bf16[1,96], index: 8, kind: input, shape index: {}]   ;;  %s2926_s9 = inlined_call_operand.vmem [shape: bf16[1,16], index: 9, kind: input, shape index: {}]   ;;  %s2927_s10 = inlined_call_operand.vmem [shape: bf16[1,16], index: 10, kind: input, shape index: {}]   ;;  %s2928_s11 = inlined_call_operand.vmem [shape: bf16[32,128], index: 11, kind: input, shape index: {}]   ;;  %s2929_s12 = inlined_call_operand.vmem [shape: bf16[1,128], index: 12, kind: input, shape index: {}]   ;;  %s2930_s13 = inlined_call_operand.vmem [shape: bf16[160,32], index: 13, kind: input, shape index: {}]   ;;  %s2931_s14 = inlined_call_operand.vmem [shape: bf16[1,32], index: 14, kind: input, shape index: {}]   ;;  %s2932_s15 = inlined_call_operand.vmem [shape: bf16[2,24,32], index: 15, kind: output, shape index: {}]  }
   0x1 LB: > { %s2013_s19 = sadd.s32 4294967295, %s2373_s18   ;;  %p2017_p0 = scmp.ge.s32.totalorder %s2373_s18, 1  ;;  %s2373_s18 = sphi %s2464_s18, %s25_s18  }
   0x2   : > { %p445_p1 = scmp.lt.s32.totalorder %s2373_s18, 3 }
   0x4   : > { %p446_p2 = pnand %p2017_p0, %p445_p1 }
   0x5   : > { %p496_p3 = scmp.lt.s32.totalorder (!%p446_p2), %s2013_s19, 1  ;;  %v2286_v0 = vld [vmem:[%s2922_s5] sm:$0xff] (!%p446_p2)   ;;  %v2375_v1 = vmov (!%p446_p2), 0.0   ;;  %v2287_v2 = vld [vmem:[%s2922_s5 + $0x8] sm:$0xff] (!%p446_p2)   ;;  %vm2376_vm0 = vmmov (!%p446_p2), 0   ;;  %vm562_vm1 = vcmask (!%p446_p2), 261120   ;;  %v647_v36 = vlaneseq (!%p446_p2) }
   0x6   : > { %449 = sbr.rel (%p446_p2) target bundleno = 3818 (0xeea), region = 80  ;;  %2134 = vmatprep.subr.bf16.mxu0 (!%p446_p2), %v2375_v1  ;;  %2138 = vmatprep.mubr.msk.bf16.mxu0 (!%p446_p2), %vm2376_vm0, %v2375_v1  ;;  %v2288_v34 = vld [vmem:[%s2928_s11] sm:$0xff] (!%p446_p2)   ;;  %v2289_v37 = vld [vmem:[%s2928_s11 + $0x8] sm:$0xff] (!%p446_p2)   ;;  %vm843_vm2 = vcmask (!%p446_p2), 130048   ;;  %s2378_s23 = smov (!%p446_p2), 32   ;;  %vm1158_vm3 = vcmask (!%p446_p2), 195584  }
   0x7   : > { %2135 = vmatpush3.bf16.msra.mxu0 (!%p446_p2), %v2286_v0  ;;  %v548_v35 = vld [vmem:[%s2923_s6] sm:$0x1] (!%p446_p2)  ;;  %v648_v39 = vshrl.u32 (!%p446_p2), %v647_v36, 7  ;;  %s2380_s28 = smov (!%p446_p2), 112   ;;  %s2382_s29 = smov (!%p446_p2), 16   ;;  %vm1207_vm4 = vcmask (!%p446_p2), 1043456  }
   0x8   : > { %2136 = vmatprep.subr.bf16.mxu0 (!%p446_p2), %v2375_v1  ;;  %v549_v38 = vunpack.c.l.bf16 (!%p446_p2), %v548_v35  ;;  %v2290_v41 = vld [vmem:[%s2924_s7] sm:$0xff] (!%p446_p2)   ;;  %vm1945_vm5 = vcmask (!%p446_p2), 257024  }
   0x9   : > { %v2521_v46 = vsub.s32 (!%p446_p2), 0, %v648_v39 }
   0xb   : > { %2137 = vmatpush3.bf16.msra.mxu0 (!%p446_p2), %v2287_v2 }
   0xc   : > { %2142 = vmatprep.subr.bf16.mxu0 (!%p446_p2), %v2288_v34 }
   0xd   : > { %s2934_s19 = smov (!%p496_p3, %s2013_s19), 1 }
   0xe   : > { %s2248_s24 = smul.u32 12, %s2934_s19  ;;  %s503_s27 = scalar_lea.vmem %s2918_s1, %s2934_s19 }
   0xf   : > { %v516_v3 = vld [vmem:[%s503_s27] sm:$0x1]  ;;  %s2377_s27 = smov 96  }
  0x10   : > { %s500_s30 = scalar_lea.vmem %s2917_s0, %s2248_s24  ;;  %v517_v4 = vunpack.c.l.bf16 %v516_v3  ;;  %s508_s21 = scalar_lea.vmem %s2932_s15, %s2248_s24 }
  0x11   : > { %v2070_v5 = vld [vmem:[%s500_s30] sm:$0xff]   ;;  %v512_v6 = vld [vmem:[%s500_s30 + $0x8] sm:$0xf]  ;;  %s2383_s30 = smov 64  }
  0x12   : > { %v2490_v7 = vunpack.c.l.bf16 %v2070_v5  ;;  %v2492_v8 = vunpack.c.l.bf16 %v512_v6  ;;  %v2494_v9 = vunpack.c.h.bf16 %v2070_v5  ;;  %v2020_v10 = vmul.f32 -1.442695, %v517_v4 }
  0x14   : > { %v606_v11 = vsel %vm562_vm1, %v2490_v7, 0.0  ;;  %v612_v12 = vsel %vm562_vm1, %v2492_v8, 0.0  ;;  %v609_v13 = vsel %vm562_vm1, %v2494_v9, 0.0  ;;  %2303 = vpow2.f32 %v2020_v10 }
  0x15   : > { %607 = vadd.xlane.f32.xlu0 %v606_v11  ;;  %613 = vadd.xlane.f32.xlu1 %v612_v12 }
  0x19   : > { %610 = vadd.xlane.f32.xlu0 %v609_v13  ;;  %v2291_v13 = vld [vmem:[%s2924_s7 + $0x8] sm:$0xff]  }
  0x1e   : > { %v2304_v14 = vpop.eup %2303 }
  0x1f   : > { %v539_v15 = vadd.f32 1.0, %v2304_v14  ;;  %v671_v14 = vld [vmem:[%s2929_s12] sm:$0x1] }
  0x21   : > { %2305 = vrcp.f32 %v539_v15  ;;  %v672_v15 = vunpack.c.l.bf16 %v671_v14 }
  0x2b   : > { %v2306_v16 = vpop.eup %2305 }
  0x2c   : > { %v542_v17 = vmul.f32 %v2306_v16, %v517_v4  ;;  %v2542_v16 = vrot.slane %v672_v15, %v2521_v46 }
  0x2e   : > { %v543_v18 = vpack.c.bf16 %v542_v17, %v542_v17  ;;  %v774_v17 = vld [vmem:[%s2925_s8] sm:$0x1] }
  0x30   : > { %2139 = vmatmul.mubr.msk.bf16.vlgmr.msra.gmra.mrb[0].mxu0 %vm562_vm1, %v543_v18 }
  0x31   : > { %2143 = vmatpush3.bf16.msra.mxu0 %v2288_v34 }
  0x32   : > { %2144 = vmatprep.subr.bf16.mxu0 %v2289_v37 }
  0x35   : > { %2145 = vmatpush3.bf16.msra.mxu0 %v2289_v37 }
  0x36   : > { %2150 = vmatprep.subr.bf16.mxu0 %v2290_v41 }
  0xa2   : > { %v608_v19 = vpop.xlane.xlu0 %607  ;;  %v614_v20 = vpop.xlane.xlu1 %613 }
  0xa3   : > { %v616_v21 = vmul.f32 0.03125, %v608_v19  ;;  %v618_v22 = vmul.f32 0.03125, %v614_v20 }
  0xa5   : > { %v619_v23 = vsub.f32 %v2490_v7, %v616_v21  ;;  %v621_v24 = vsub.f32 %v2492_v8, %v618_v22  ;;  %v775_v22 = vunpack.c.l.bf16 %v774_v17 }
  0xa6   : > { %v611_v25 = vpop.xlane.xlu0 %610 }
  0xa7   : > { %v617_v26 = vmul.f32 0.03125, %v611_v25  ;;  %v622_v27 = vmul.f32 %v619_v23, %v619_v23  ;;  %v624_v28 = vmul.f32 %v621_v24, %v621_v24 }
  0xa9   : > { %v620_v29 = vsub.f32 %v2494_v9, %v617_v26  ;;  %v625_v30 = vsel %vm562_vm1, %v622_v27, 0.0  ;;  %v631_v31 = vsel %vm562_vm1, %v624_v28, 0.0  ;;  %v779_v28 = vrot.slane %v775_v22, %v2521_v46 }
  0xaa   : > { %626 = vadd.xlane.f32.xlu1 %v625_v30 }
  0xab   : > { %v623_v32 = vmul.f32 %v620_v29, %v620_v29 }
  0xad   : > { %v628_v33 = vsel %vm562_vm1, %v623_v32, 0.0 }
  0xae   : > { %632 = vadd.xlane.f32.xlu1 %v631_v31  ;;  %629 = vadd.xlane.f32.xlu0 %v628_v33 }
 0x103   : > { %v600_v40 = vpop.f32.mrb[0].mxu0 }
 0x104   : > { %v601_v42 = vadd.f32 %v600_v40, %v549_v38  ;;  %v2140_v43 = vpop.f32.mrb[1].mxu0 }
 0x105   : > { %v603_v44 = vpop.f32.mrb[2].mxu0 }
 0x106   : > { %v646_v45 = vadd.f32 1.0, %v601_v42  ;;  %v2141_v47 = vpop.f32.mrb[3].mxu0  ;;  %v2526_v1 = vrot.slane %v601_v42, %v2521_v46 }
 0x108   : > { %v650_v48 = vrot.slane %v646_v45, %v2521_v46 }
 0x10a   : > { %652 = vrot.lane.b32.xlu0 %v650_v48, %s2377_s27 }
 0x137   : > { %v627_v49 = vpop.xlane.xlu1 %626 }
 0x138   : > { %v634_v52 = vmul.f32 0.03125, %v627_v49 }
 0x13a   : > { %v637_v55 = vadd.f32 1e-06, %v634_v52 }
 0x13b   : > { %v633_v50 = vpop.xlane.xlu1 %632  ;;  %v630_v51 = vpop.xlane.xlu0 %629 }
 0x13c   : > { %v636_v53 = vmul.f32 0.03125, %v633_v50  ;;  %v635_v54 = vmul.f32 0.03125, %v630_v51  ;;  %2307 = vrsqrt.f32 %v637_v55 }
 0x13e   : > { %v639_v56 = vadd.f32 1e-06, %v636_v53  ;;  %v638_v57 = vadd.f32 1e-06, %v635_v54 }
 0x140   : > { %2309 = vrsqrt.f32 %v639_v56 }
 0x141   : > { %2311 = vrsqrt.f32 %v638_v57 }
 0x146   : > { %v2308_v58 = vpop.eup %2307 }
 0x147   : > { %v643_v61 = vmul.f32 %v2308_v58, %v619_v23 }
 0x14a   : > { %v2310_v59 = vpop.eup %2309 }
 0x14b   : > { %v2312_v60 = vpop.eup %2311  ;;  %v645_v63 = vmul.f32 %v2310_v59, %v621_v24 }
 0x14c   : > { %v644_v62 = vmul.f32 %v2312_v60, %v620_v29 }
 0x17c   : > { %v653_v0 = vpop.permute.xlu0 %652 }
 0x17d   : > { %v655_v2 = vmul.f32 %v653_v0, %v643_v61  ;;  %v656_v3 = vmul.f32 %v653_v0, %v644_v62  ;;  %v657_v4 = vmul.f32 %v653_v0, %v645_v63  ;;  %v534_v62 = vld [vmem:[%s2927_s10] sm:$0x1] }
 0x17e   : > { %v535_v63 = vunpack.c.l.bf16 %v534_v62 }
 0x17f   : > { %v662_v5 = vadd.f32 %v2526_v1, %v655_v2  ;;  %v663_v6 = vadd.f32 %v2526_v1, %v656_v3  ;;  %v664_v10 = vadd.f32 %v2526_v1, %v657_v4  ;;  %v2600_v4 = vld [vmem:[%s2919_s2] sm:$0xff]  }
 0x180   : > { %v2589_v0 = vrot.slane %v535_v63, %v2521_v46 }
 0x181   : > { %v666_v11 = vpack.c.bf16 %v664_v10, %v664_v10  ;;  %v665_v12 = vpack.c.bf16 %v663_v6, %v662_v5  ;;  %v2075_v5 = vunpack.c.l.bf16 %v2600_v4  ;;  %v2076_v6 = vunpack.c.h.bf16 %v2600_v4 }
 0x183   : > { %2146 = vmatprep.mubr.msk.bf16.mxu0 %vm562_vm1, %v665_v12  ;;  %v2608_v10 = vpack.i.bf16 %v2076_v6, %v2075_v5 }
 0x184   : > { %2147 = vmatmul.mubr.msk.bf16.vlgmr.msra.gmra.mrb[4].mxu0 %vm562_vm1, %v666_v11 }
 0x185   : > { %2151 = vmatpush3.bf16.msra.mxu0 %v2290_v41  ;;  %2154 = vmatprep.mubr.msk.bf16.mxu0 %vm562_vm1, %v665_v12 }
 0x186   : > { %2152 = vmatprep.subr.bf16.mxu0 %v2291_v13 }
 0x189   : > { %2153 = vmatpush3.bf16.msra.mxu0 %v2291_v13  ;;  %v2620_v13 = vld [vmem:[%s2921_s4] sm:$0xff]  }
 0x18a   : > { %2164 = vmatprep.subr.bf16.mxu0 %v2620_v13  ;;  %2158 = vmatprep.subr.bf16.mxu1 %v2620_v13 }
 0x18b   : > { %2159 = vmatpush3.bf16.msra.mxu1 %v2620_v13 }
 0x18c   : > { %2155 = vmatmul.mubr.msk.bf16.vlgmr.msra.gmra.mrb[8].mxu0 %vm562_vm1, %v666_v11  ;;  %v520_v11 = vld [vmem:[%s2919_s2 + $0x8] sm:$0xf] }
 0x18d   : > { %v2615_v12 = vunpack.c.l.bf16 %v520_v11  ;;  %2165 = vmatpush3.bf16.msra.mxu0 %v2620_v13 }
 0x257   : > { %v2547_v18 = vpop.f32.mrb[4].mxu0 }
 0x258   : > { %v729_v19 = vpop.f32.mrb[5].mxu0 }
 0x259   : > { %v730_v20 = vadd.f32 %v729_v19, %v2542_v16  ;;  %v2149_v21 = vpop.f32.mrb[6].mxu0 }
 0x25a   : > { %v732_v23 = vpop.f32.mrb[7].mxu0 }
 0x25b   : > { %v743_v24 = vmul.f32 %v730_v20, %v730_v20  ;;  %v733_v25 = vadd.f32 %v732_v23, %v2542_v16 }
 0x25d   : > { %v746_v26 = vmul.f32 %v743_v24, %v730_v20  ;;  %v744_v27 = vmul.f32 %v733_v25, %v733_v25 }
 0x25f   : > { %v749_v29 = vmul.f32 0.044715, %v746_v26  ;;  %v747_v30 = vmul.f32 %v744_v27, %v733_v25  ;;  %v2156_v31 = vpop.f32.mrb[8].mxu0 }
 0x260   : > { %v826_v32 = vpop.f32.mrb[9].mxu0  ;;  %v2562_v43 = vadd.f32 %v2156_v31, %v779_v28 }
 0x261   : > { %v752_v33 = vadd.f32 %v749_v29, %v730_v20  ;;  %v750_v34 = vmul.f32 0.044715, %v747_v30  ;;  %v2552_v35 = vadd.f32 %v826_v32, %v779_v28  ;;  %v2157_v36 = vpop.f32.mrb[10].mxu0 }
 0x262   : > { %v829_v37 = vpop.f32.mrb[11].mxu0  ;;  %v2572_v45 = vmul.f32 %v2562_v43, %v2562_v43 }
 0x263   : > { %v755_v38 = vmul.f32 0.7978846, %v752_v33  ;;  %v753_v39 = vadd.f32 %v750_v34, %v733_v25  ;;  %v2554_v40 = vadd.f32 %v829_v37, %v779_v28  ;;  %v2558_v41 = vmul.f32 %v2552_v35, %v2552_v35 }
 0x264   : > { %v850_v3 = vsel %vm843_vm2, %v2572_v45, 0.0 }
 0x265   : > { %2313 = vtanh.f32 %v755_v38  ;;  %v756_v42 = vmul.f32 0.7978846, %v753_v39  ;;  %947 = vrot.lane.b32.xlu1 %v2558_v41, %s2377_s27  ;;  %v2566_v44 = vmul.f32 %v2554_v40, %v2554_v40  ;;  %v844_v2 = vsel %vm843_vm2, %v2558_v41, 0.0 }
 0x267   : > { %2315 = vtanh.f32 %v756_v42  ;;  %v847_v38 = vsel %vm843_vm2, %v2566_v44, 0.0 }
 0x269   : > { %949 = vrot.lane.b32.xlu1 %v2566_v44, %s2377_s27 }
 0x26d   : > { %951 = vrot.lane.b32.xlu1 %v2572_v45, %s2377_s27 }
 0x26f   : > { %v2314_v47 = vpop.eup %2313 }
 0x270   : > { %v761_v48 = vadd.f32 1.0, %v2314_v47 }
 0x271   : > { %v2316_v49 = vpop.eup %2315 }
 0x272   : > { %v762_v50 = vadd.f32 1.0, %v2316_v49  ;;  %v764_v51 = vmul.f32 0.5, %v761_v48 }
 0x274   : > { %v765_v52 = vmul.f32 0.5, %v762_v50  ;;  %v2576_v53 = vmul.f32 %v764_v51, %v730_v20 }
 0x276   : > { %v2578_v54 = vmul.f32 %v765_v52, %v733_v25 }
 0x278   : > { %v1729_v55 = vpack.c.bf16 %v2578_v54, %v2576_v53  ;;  %v2298_v53 = vld [vmem:[%s2930_s13 + $0x38] sm:$0xff]  }
 0x2d7   : > { %v948_v56 = vpop.permute.xlu1 %947 }
 0x2d8   : > { %v956_v57 = vsel %vm843_vm2, %v948_v56, 0.0 }
 0x2d9   : > { %957 = vadd.xlane.f32.xlu0 %v956_v57 }
 0x2db   : > { %v950_v58 = vpop.permute.xlu1 %949 }
 0x2dc   : > { %v959_v59 = vsel %vm843_vm2, %v950_v58, 0.0 }
 0x2dd   : > { %960 = vadd.xlane.f32.xlu1 %v959_v59  ;;  %v532_v59 = vld [vmem:[%s2926_s9] sm:$0x1] }
 0x2df   : > { %v952_v60 = vpop.permute.xlu1 %951 }
 0x2e0   : > { %v962_v61 = vsel %vm843_vm2, %v952_v60, 0.0 }
 0x2e1   : > { %963 = vadd.xlane.f32.xlu0 %v962_v61  ;;  %v533_v61 = vunpack.c.l.bf16 %v532_v59 }
 0x2f7   : > { %982 = vrot.lane.b32.xlu0 %v2589_v0, %s2378_s23 }
 0x316   : > { %845 = vadd.xlane.f32.xlu0 %v844_v2 }
 0x31a   : > { %851 = vadd.xlane.f32.xlu0 %v850_v3  ;;  %v2653_v3 = vrot.slane %v533_v61, %v2521_v46 }
 0x330   : > { %2267 = vrot.lane.b32.xlu0 %v2608_v10, %s2378_s23 }
 0x334   : > { %1057 = vrot.lane.b32.xlu0 %v2615_v12, %s2378_s23 }
 0x366   : > { %v958_v14 = vpop.xlane.xlu0 %957 }
 0x367   : > { %v965_v15 = vmul.f32 0.0625, %v958_v14 }
 0x369   : > { %v968_v17 = vadd.f32 1e-06, %v965_v15 }
 0x36a   : > { %v961_v19 = vpop.xlane.xlu1 %960 }
 0x36b   : > { %2317 = vrsqrt.f32 %v968_v17  ;;  %v966_v20 = vmul.f32 0.0625, %v961_v19 }
 0x36d   : > { %v969_v21 = vadd.f32 1e-06, %v966_v20 }
 0x36e   : > { %v964_v22 = vpop.xlane.xlu0 %963 }
 0x36f   : > { %2319 = vrsqrt.f32 %v969_v21  ;;  %v967_v23 = vmul.f32 0.0625, %v964_v22  ;;  %v2078_v22 = vld [vmem:[%s2920_s3] sm:$0xff]  }
 0x371   : > { %v970_v24 = vadd.f32 1e-06, %v967_v23  ;;  %v2664_v23 = vunpack.c.l.bf16 %v2078_v22 }
 0x372   : > { %v983_v28 = vpop.permute.xlu0 %982 }
 0x373   : > { %2321 = vrsqrt.f32 %v970_v24 }
 0x375   : > { %v2318_v25 = vpop.eup %2317 }
 0x376   : > { %v974_v26 = vmul.f32 %v2318_v25, %v2552_v35 }
 0x378   : > { %v2630_v30 = vmul.f32 %v983_v28, %v974_v26 }
 0x379   : > { %v2320_v27 = vpop.eup %2319 }
 0x37a   : > { %v975_v29 = vmul.f32 %v2320_v27, %v2554_v40 }
 0x37c   : > { %v2632_v31 = vmul.f32 %v983_v28, %v975_v29  ;;  %v526_v29 = vld [vmem:[%s2920_s3 + $0x8] sm:$0xf] }
 0x37d   : > { %v2322_v32 = vpop.eup %2321 }
 0x37e   : > { %v976_v33 = vmul.f32 %v2322_v32, %v2562_v43  ;;  %v988_v34 = vpack.c.bf16 %v2632_v31, %v2630_v30 }
 0x380   : > { %v2637_v36 = vmul.f32 %v983_v28, %v976_v33  ;;  %992 = vrot.lane.b32.xlu1 %v988_v34, %s2377_s27  ;;  %v2667_v28 = vunpack.c.h.bf16 %v2078_v22  ;;  %v2673_v33 = vunpack.c.l.bf16 %v526_v29 }
 0x382   : > { %v989_v37 = vpack.c.bf16 %v2637_v36, %v2637_v36 }
 0x384   : > { %994 = vrot.lane.b32.xlu1 %v989_v37, %s2377_s27 }
 0x3a3   : > { %v846_v47 = vpop.xlane.xlu0 %845 }
 0x3a4   : > { %v854_v50 = vmul.f32 0.0625, %v846_v47 }
 0x3a6   : > { %v857_v52 = vadd.f32 1e-06, %v854_v50 }
 0x3a7   : > { %v852_v48 = vpop.xlane.xlu0 %851 }
 0x3a8   : > { %848 = vadd.xlane.f32.xlu1 %v847_v38  ;;  %v856_v49 = vmul.f32 0.0625, %v852_v48 }
 0x3aa   : > { %v859_v51 = vadd.f32 1e-06, %v856_v49 }
 0x3ab   : > { %v2268_v61 = vpop.permute.xlu0 %2267 }
 0x3ac   : > { %2323 = vrsqrt.f32 %v859_v51 }
 0x3ad   : > { %2325 = vrsqrt.f32 %v857_v52 }
 0x3b6   : > { %v2324_v60 = vpop.eup %2323 }
 0x3b7   : > { %v2326_v62 = vpop.eup %2325  ;;  %v865_v63 = vmul.f32 %v2324_v60, %v2562_v43 }
 0x3b8   : > { %v863_v2 = vmul.f32 %v2326_v62, %v2552_v35  ;;  %v2270_v62 = vunpack.i.h.bf16 %v2268_v61 }
 0x3b9   : > { %v872_v15 = vmul.f32 %v2653_v3, %v865_v63  ;;  %v2269_v63 = vunpack.i.l.bf16 %v2268_v61 }
 0x3ba   : > { %v870_v17 = vmul.f32 %v2653_v3, %v863_v2 }
 0x3bb   : > { %v874_v21 = vpack.c.bf16 %v872_v15, %v872_v15 }
 0x3bc   : > { %v935_v52 = vmul.f32 %v2075_v5, %v870_v17 }
 0x3f2   : > { %v993_v39 = vpop.permute.xlu1 %992 }
 0x3f3   : > { %2166 = vmatprep.mubr.msk.bf16.mxu0 %vm843_vm2, %v993_v39  ;;  %v937_v39 = vmul.f32 %v872_v15, %v2615_v12  ;;  %v1058_v15 = vpop.permute.xlu0 %1057 }
 0x3f6   : > { %v995_v42 = vpop.permute.xlu1 %994 }
 0x3f7   : > { %2167 = vmatmul.mubr.msk.bf16.vlgmr.msra.gmra.mrb[12].mxu0 %vm843_vm2, %v995_v42 }
 0x435   : > { %v849_v56 = vpop.xlane.xlu1 %848 }
 0x436   : > { %v855_v57 = vmul.f32 0.0625, %v849_v56 }
 0x438   : > { %v858_v58 = vadd.f32 1e-06, %v855_v57 }
 0x43a   : > { %2327 = vrsqrt.f32 %v858_v58 }
 0x444   : > { %v2328_v11 = vpop.eup %2327 }
 0x445   : > { %v864_v14 = vmul.f32 %v2328_v11, %v2554_v40  ;;  %v1062_v11 = vmul.f32 %v2269_v63, %v2630_v30 }
 0x447   : > { %v871_v19 = vmul.f32 %v2653_v3, %v864_v14  ;;  %v1063_v14 = vmul.f32 %v2270_v62, %v2632_v31 }
 0x449   : > { %v873_v20 = vpack.c.bf16 %v871_v19, %v870_v17  ;;  %v936_v56 = vmul.f32 %v2076_v6, %v871_v19  ;;  %v1064_v6 = vmul.f32 %v1058_v15, %v2637_v36 }
 0x44b   : > { %2160 = vmatprep.mubr.msk.bf16.mxu1 %vm843_vm2, %v873_v20 }
 0x44c   : > { %2161 = vmatmul.mubr.msk.bf16.vlgmr.msra.gmra.mrb[0].mxu1 %vm843_vm2, %v874_v21 }
 0x4ca   : > { %v2168_v24 = vpop.f32.mrb[12].mxu0 }
 0x4cb   : > { %v1036_v25 = vpop.f32.mrb[13].mxu0  ;;  %v1067_v37 = vmul.f32 %v2168_v24, %v2673_v33 }
 0x4cc   : > { %v1065_v26 = vmul.f32 %v2664_v23, %v1036_v25  ;;  %v2169_v27 = vpop.f32.mrb[14].mxu0 }
 0x4cd   : > { %v1039_v32 = vpop.f32.mrb[15].mxu0 }
 0x4ce   : > { %1071 = vrot.lane.b32.xlu1 %v1065_v26, %s2378_s23  ;;  %v1066_v34 = vmul.f32 %v2667_v28, %v1039_v32 }
 0x4d2   : > { %1073 = vrot.lane.b32.xlu1 %v1066_v34, %s2378_s23 }
 0x4d6   : > { %1075 = vrot.lane.b32.xlu1 %v1067_v37, %s2378_s23  ;;  %s2379_s23 = smov 80  }
 0x51f   : > { %v2162_v38 = vpop.f32.mrb[0].mxu1 }
 0x520   : > { %v940_v42 = vmul.f32 %v2162_v38, %v2673_v33  ;;  %v921_v47 = vpop.f32.mrb[1].mxu1 }
 0x521   : > { %v938_v48 = vmul.f32 %v2664_v23, %v921_v47  ;;  %v2163_v49 = vpop.f32.mrb[2].mxu1 }
 0x522   : > { %v943_v50 = vadd.f32 %v940_v42, %v937_v39  ;;  %v924_v51 = vpop.f32.mrb[3].mxu1 }
 0x523   : > { %v939_v57 = vmul.f32 %v2667_v28, %v924_v51  ;;  %v941_v58 = vadd.f32 %v938_v48, %v935_v52 }
 0x525   : > { %v942_v59 = vadd.f32 %v939_v57, %v936_v56 }
 0x527   : > { %v1085_v60 = vpack.c.bf16 %v942_v59, %v941_v58 }
 0x529   : > { %2174 = vmatprep.mubr.msk.bf16.mxu1 %vm843_vm2, %v1085_v60 }
 0x540   : > { %v1072_v2 = vpop.permute.xlu1 %1071 }
 0x541   : > { %v1080_v17 = vadd.f32 %v1072_v2, %v1062_v11 }
 0x544   : > { %v1074_v5 = vpop.permute.xlu1 %1073 }
 0x545   : > { %v1081_v4 = vadd.f32 %v1074_v5, %v1063_v14 }
 0x547   : > { %v1087_v19 = vpack.c.bf16 %v1081_v4, %v1080_v17 }
 0x548   : > { %v1076_v20 = vpop.permute.xlu1 %1075 }
 0x549   : > { %v1082_v21 = vadd.f32 %v1076_v20, %v1064_v6  ;;  %1091 = vrot.lane.b32.xlu0 %v1087_v19, %s2377_s27 }
 0x54b   : > { %v1088_v22 = vpack.c.bf16 %v1082_v21, %v1082_v21 }
 0x54d   : > { %1093 = vrot.lane.b32.xlu1 %v1088_v22, %s2377_s27  ;;  %1388 = vrot.lane.b32.xlu0 %v2558_v41, %s2379_s23  ;;  %s2381_s27 = smov 48  }
 0x551   : > { %1390 = vrot.lane.b32.xlu1 %v2566_v44, %s2379_s23  ;;  %1392 = vrot.lane.b32.xlu0 %v2572_v45, %s2379_s23 }
 0x555   : > { %1259 = vrot.lane.b32.xlu1 %v2558_v41, %s2380_s28  ;;  %1261 = vrot.lane.b32.xlu0 %v2566_v44, %s2380_s28  ;;  %v1086_v41 = vpack.c.bf16 %v943_v50, %v943_v50 }
 0x559   : > { %1263 = vrot.lane.b32.xlu1 %v2572_v45, %s2380_s28 }
 0x5bb   : > { %v1092_v30 = vpop.permute.xlu0 %1091 }
 0x5bc   : > { %v1102_v31 = vsel %vm843_vm2, %v1092_v30, 0  ;;  %2242 = vmatprep.subr.msk.bf16.mxu1 %vm843_vm2, %v1092_v30 }
 0x5bd   : > { %2171 = vmatpush3.bf16.xpose.msra.mxu1 %v1102_v31 }
 0x5bf   : > { %v1094_v36 = vpop.permute.xlu1 %1093  ;;  %v1389_v44 = vpop.permute.xlu0 %1388 }
 0x5c0   : > { %2243 = vmatprep.subr.msk.bf16.mxu1 %vm843_vm2, %v1094_v36  ;;  %v1105_v24 = vsel %vm843_vm2, %v1094_v36, 0  ;;  %v1397_v50 = vsel %vm843_vm2, %v1389_v44, 0.0 }
 0x5c3   : > { %v1393_v38 = vpop.permute.xlu0 %1392  ;;  %v1391_v47 = vpop.permute.xlu1 %1390 }
 0x5c4   : > { %v1403_v48 = vsel %vm843_vm2, %v1393_v38, 0.0  ;;  %v1400_v56 = vsel %vm843_vm2, %v1391_v47, 0.0 }
 0x5c5   : > { %2173 = vmatpush3.bf16.xpose.msra.mxu1 %v1105_v24 }
 0x5c6   : > { %2192 = vmatprep.subr.bf16.mxu1 %v2620_v13 }
 0x5c7   : > { %v1262_v49 = vpop.permute.xlu0 %1261  ;;  %v1260_v52 = vpop.permute.xlu1 %1259 }
 0x5c8   : > { %v1271_v51 = vsel %vm843_vm2, %v1262_v49, 0.0  ;;  %v1268_v57 = vsel %vm843_vm2, %v1260_v52, 0.0 }
 0x5cb   : > { %v1264_v58 = vpop.permute.xlu1 %1263 }
 0x5cc   : > { %2175 = vmatmul.mubr.msk.bf16.vlgmr.msra.gmra.mrb[4].mxu1 %vm843_vm2, %v1086_v41  ;;  %v1274_v59 = vsel %vm843_vm2, %v1264_v58, 0.0 }
 0x5cd   : > { %2193 = vmatpush3.bf16.msra.mxu1 %v2620_v13 }
 0x69f   : > { %v2176_v45 = vpop.f32.mrb[4].mxu1 }
 0x6a0   : > { %v1141_v25 = vpop.f32.mrb[5].mxu1  ;;  %v1157_v32 = vmul.f32 0.25, %v2176_v45 }
 0x6a1   : > { %v1155_v26 = vmul.f32 0.25, %v1141_v25  ;;  %v2177_v27 = vpop.f32.mrb[6].mxu1 }
 0x6a2   : > { %v1144_v29 = vpop.f32.mrb[7].mxu1  ;;  %v1165_v42 = vsel %vm1158_vm3, %v1157_v32, -inf }
 0x6a3   : > { %v1156_v34 = vmul.f32 0.25, %v1144_v29  ;;  %v1159_v37 = vsel %vm1158_vm3, %v1155_v26, -inf }
 0x6a4   : > { %1160 = vmax.xlane.f32.xlu0 %v1159_v37 }
 0x6a5   : > { %v1162_v39 = vsel %vm1158_vm3, %v1156_v34, -inf }
 0x6a6   : > { %1163 = vmax.xlane.f32.xlu1 %v1162_v39 }
 0x6a8   : > { %1166 = vmax.xlane.f32.xlu0 %v1165_v42 }
 0x6aa   : > { %1404 = vadd.xlane.f32.xlu1 %v1403_v48 }
 0x6ac   : > { %1398 = vadd.xlane.f32.xlu0 %v1397_v50 }
 0x6ae   : > { %1272 = vadd.xlane.f32.xlu1 %v1271_v51 }
 0x6b0   : > { %1401 = vadd.xlane.f32.xlu0 %v1400_v56 }
 0x6b4   : > { %1269 = vadd.xlane.f32.xlu0 %v1268_v57 }
 0x6b8   : > { %1275 = vadd.xlane.f32.xlu0 %v1274_v59 }
 0x6bf   : > { %1418 = vrot.lane.b32.xlu1 %v2589_v0, %s2381_s27 }
 0x6ce   : > { %1290 = vrot.lane.b32.xlu0 %v2653_v3, %s2382_s29 }
 0x731   : > { %v1161_v60 = vpop.xlane.xlu0 %1160 }
 0x732   : > { %v1168_v62 = vsub.f32 %v1155_v26, %v1161_v60 }
 0x733   : > { %v1164_v61 = vpop.xlane.xlu1 %1163 }
 0x734   : > { %v1169_v63 = vsub.f32 %v1156_v34, %v1164_v61  ;;  %v1171_v15 = vmul.f32 1.442695, %v1168_v62 }
 0x735   : > { %v1167_v2 = vpop.xlane.xlu0 %1166 }
 0x736   : > { %v1173_v11 = vmul.f32 1.442695, %v1169_v63  ;;  %v1170_v14 = vsub.f32 %v1157_v32, %v1167_v2  ;;  %v2750_v63 = vpack.c.bf16 %v2554_v40, %v2552_v35 }
 0x737   : > { %v1405_v17 = vpop.xlane.xlu1 %1404 }
 0x738   : > { %2329 = vpow2.f32 %v1173_v11  ;;  %v1175_v5 = vmul.f32 1.442695, %v1170_v14  ;;  %v1408_v21 = vmul.f32 0.0625, %v1405_v17 }
 0x739   : > { %v1399_v4 = vpop.xlane.xlu0 %1398 }
 0x73a   : > { %2331 = vpow2.f32 %v1175_v5  ;;  %v1406_v0 = vmul.f32 0.0625, %v1399_v4  ;;  %v1411_v45 = vadd.f32 1e-06, %v1408_v21  ;;  %v2772_v4 = vpack.c.bf16 %v2562_v43, %v2562_v43 }
 0x73b   : > { %2333 = vpow2.f32 %v1171_v15  ;;  %v1273_v19 = vpop.xlane.xlu1 %1272 }
 0x73c   : > { %v1278_v22 = vmul.f32 0.0625, %v1273_v19  ;;  %v1409_v36 = vadd.f32 1e-06, %v1406_v0 }
 0x73d   : > { %v1402_v6 = vpop.xlane.xlu0 %1401 }
 0x73e   : > { %v1407_v20 = vmul.f32 0.0625, %v1402_v6  ;;  %v1281_v26 = vadd.f32 1e-06, %v1278_v22 }
 0x73f   : > { %v1419_v52 = vpop.permute.xlu1 %1418 }
 0x740   : > { %v1410_v3 = vadd.f32 1e-06, %v1407_v20 }
 0x741   : > { %v1270_v30 = vpop.xlane.xlu0 %1269 }
 0x742   : > { %v2725_v31 = vpop.eup %2329  ;;  %v1277_v24 = vmul.f32 0.0625, %v1270_v30  ;;  %2335 = vrsqrt.f32 %v1410_v3 }
 0x743   : > { %v1180_v41 = vsel %vm1158_vm3, %v2725_v31, 0.0  ;;  %2337 = vrsqrt.f32 %v1409_v36 }
 0x744   : > { %v2729_v44 = vpop.eup %2331  ;;  %v1280_v25 = vadd.f32 1e-06, %v1277_v24  ;;  %1181 = vadd.xlane.f32.xlu0 %v1180_v41 }
 0x745   : > { %v1276_v27 = vpop.xlane.xlu0 %1275  ;;  %v1183_v29 = vsel %vm1158_vm3, %v2729_v44, 0.0  ;;  %v2733_v32 = vpop.eup %2333 }
 0x746   : > { %1184 = vadd.xlane.f32.xlu1 %v1183_v29  ;;  %2339 = vrsqrt.f32 %v1280_v25  ;;  %v1279_v34 = vmul.f32 0.0625, %v1276_v27  ;;  %v1177_v37 = vsel %vm1158_vm3, %v2733_v32, 0.0 }
 0x747   : > { %2341 = vrsqrt.f32 %v1411_v45 }
 0x748   : > { %2343 = vrsqrt.f32 %v1281_v26  ;;  %v1282_v38 = vadd.f32 1e-06, %v1279_v34 }
 0x749   : > { %v1291_v61 = vpop.permute.xlu0 %1290 }
 0x74a   : > { %1178 = vadd.xlane.f32.xlu1 %v1177_v37  ;;  %2345 = vrsqrt.f32 %v1282_v38 }
 0x74c   : > { %v2336_v39 = vpop.eup %2335 }
 0x74d   : > { %v2338_v42 = vpop.eup %2337  ;;  %v1416_v48 = vmul.f32 %v2336_v39, %v2554_v40 }
 0x74e   : > { %v1415_v51 = vmul.f32 %v2338_v42, %v2552_v35 }
 0x74f   : > { %v2741_v58 = vmul.f32 %v1419_v52, %v1416_v48 }
 0x750   : > { %v2340_v47 = vpop.eup %2339  ;;  %v2744_v60 = vmul.f32 %v1419_v52, %v1415_v51 }
 0x751   : > { %v2342_v49 = vpop.eup %2341  ;;  %v1286_v56 = vmul.f32 %v2340_v47, %v2552_v35 }
 0x752   : > { %v2344_v50 = vpop.eup %2343  ;;  %v1417_v57 = vmul.f32 %v2342_v49, %v2562_v43  ;;  %v1424_v11 = vpack.c.bf16 %v2741_v58, %v2744_v60 }
 0x753   : > { %v1287_v59 = vmul.f32 %v2344_v50, %v2554_v40  ;;  %v2746_v62 = vmul.f32 %v1291_v61, %v1286_v56 }
 0x754   : > { %v2752_v2 = vmul.f32 %v1419_v52, %v1417_v57  ;;  %v2346_v14 = vpop.eup %2345 }
 0x755   : > { %v2756_v15 = vmul.f32 %v1291_v61, %v1287_v59  ;;  %v1288_v35 = vmul.f32 %v2346_v14, %v2562_v43 }
 0x756   : > { %v1425_v40 = vpack.c.bf16 %v2752_v2, %v2752_v2 }
 0x757   : > { %v1296_v5 = vpack.c.bf16 %v2756_v15, %v2746_v62  ;;  %v2768_v17 = vmul.f32 %v1291_v61, %v1288_v35 }
 0x759   : > { %v1297_v6 = vpack.c.bf16 %v2768_v17, %v2768_v17 }
 0x75a   : > { %1196 = vrot.lane.b32.xlu0 %v2750_v63, %s2383_s30 }
 0x75b   : > { %1428 = vrot.lane.b32.xlu1 %v1424_v11, %s2379_s23 }
 0x75e   : > { %1300 = vrot.lane.b32.xlu0 %v1296_v5, %s2380_s28 }
 0x75f   : > { %1430 = vrot.lane.b32.xlu1 %v1425_v40, %s2379_s23 }
 0x762   : > { %2272 = vrot.lane.b32.xlu0 %v2608_v10, %s2381_s27 }
 0x763   : > { %1198 = vrot.lane.b32.xlu1 %v2772_v4, %s2383_s30 }
 0x767   : > { %1302 = vrot.lane.b32.xlu1 %v1297_v6, %s2380_s28 }
 0x7d1   : > { %v1182_v0 = vpop.xlane.xlu0 %1181 }
 0x7d3   : > { %v1185_v19 = vpop.xlane.xlu1 %1184 }
 0x7d4   : > { %2347 = vrcp.f32 %v1185_v19 }
 0x7d5   : > { %v1197_v20 = vpop.permute.xlu0 %1196  ;;  %2349 = vrcp.f32 %v1182_v0 }
 0x7d6   : > { %2178 = vmatprep.subr.bf16.mxu0 %v1197_v20 }
 0x7d7   : > { %v1179_v21 = vpop.xlane.xlu1 %1178  ;;  %2179 = vmatpush3.bf16.msra.mxu0 %v1197_v20 }
 0x7d8   : > { %2351 = vrcp.f32 %v1179_v21 }
 0x7d9   : > { %v1301_v34 = vpop.permute.xlu0 %1300 }
 0x7db   : > { %v1429_v43 = vpop.permute.xlu1 %1428 }
 0x7dc   : > { %2194 = vmatprep.mubr.msk.bf16.mxu1 %vm843_vm2, %v1429_v43 }
 0x7de   : > { %v2348_v3 = vpop.eup %2347 }
 0x7df   : > { %v1431_v22 = vpop.permute.xlu1 %1430  ;;  %v2350_v30 = vpop.eup %2349  ;;  %v1191_v24 = vmul.f32 %v2348_v3, %v2729_v44 }
 0x7e0   : > { %2195 = vmatmul.mubr.msk.bf16.vlgmr.msra.gmra.mrb[8].mxu1 %vm843_vm2, %v1431_v22  ;;  %v1190_v25 = vmul.f32 %v2350_v30, %v2725_v31 }
 0x7e1   : > { %v1193_v29 = vpack.c.bf16 %v1191_v24, %v1191_v24 }
 0x7e2   : > { %v2352_v36 = vpop.eup %2351 }
 0x7e3   : > { %v1199_v41 = vpop.permute.xlu1 %1198  ;;  %v1189_v45 = vmul.f32 %v2352_v36, %v2733_v32 }
 0x7e4   : > { %v1209_v26 = vsel %vm1207_vm4, %v1199_v41, 0  ;;  %2244 = vmatprep.subr.msk.bf16.mxu0 %vm1207_vm4, %v1199_v41 }
 0x7e5   : > { %2181 = vmatpush3.bf16.msra.mxu0 %v1209_v26  ;;  %v1192_v27 = vpack.c.bf16 %v1190_v25, %v1189_v45 }
 0x7e6   : > { %2186 = vmatprep.subr.bf16.mxu0 %v2620_v13 }
 0x7e7   : > { %2182 = vmatprep.mubr.msk.bf16.mxu0 %vm1158_vm3, %v1192_v27  ;;  %v1303_v44 = vpop.permute.xlu1 %1302 }
 0x7e8   : > { %2183 = vmatmul.mubr.msk.bf16.vlgmr.msra.gmra.mrb[16].mxu0 %vm1158_vm3, %v1193_v29 }
 0x7e9   : > { %2187 = vmatpush3.bf16.msra.mxu0 %v2620_v13  ;;  %2188 = vmatprep.mubr.msk.bf16.mxu0 %vm843_vm2, %v1301_v34 }
 0x7f0   : > { %2189 = vmatmul.mubr.msk.bf16.vlgmr.msra.gmra.mrb[20].mxu0 %vm843_vm2, %v1303_v44 }
 0x8b3   : > { %v2196_v31 = vpop.f32.mrb[8].mxu1 }
 0x8b4   : > { %v1472_v32 = vpop.f32.mrb[9].mxu1  ;;  %v1500_v47 = vmul.f32 %v2196_v31, %v2673_v33 }
 0x8b5   : > { %v1498_v37 = vmul.f32 %v2664_v23, %v1472_v32  ;;  %v2197_v38 = vpop.f32.mrb[10].mxu1 }
 0x8b6   : > { %v1475_v39 = vpop.f32.mrb[11].mxu1 }
 0x8b7   : > { %v1499_v42 = vmul.f32 %v2667_v28, %v1475_v39  ;;  %1504 = vrot.lane.b32.xlu1 %v1498_v37, %s2381_s27 }
 0x8b9   : > { %1506 = vrot.lane.b32.xlu0 %v1499_v42, %s2381_s27 }
 0x8bb   : > { %1490 = vrot.lane.b32.xlu1 %v2615_v12, %s2381_s27  ;;  %v2801_v13 = vpop.f32.mrb[16].mxu0 }
 0x8bc   : > { %v2803_v48 = vpop.f32.mrb[17].mxu0 }
 0x8bd   : > { %1508 = vrot.lane.b32.xlu0 %v1500_v47, %s2381_s27  ;;  %v2185_v49 = vpop.f32.mrb[18].mxu0 }
 0x8be   : > { %v2806_v50 = vpop.f32.mrb[19].mxu0 }
 0x8bf   : > { %2277 = vrot.lane.b32.xlu1 %v2608_v10, %s2382_s29  ;;  %v2273_v10 = vpop.permute.xlu0 %2272 }
 0x8c0   : > { %v2275_v14 = vunpack.i.h.bf16 %v2273_v10  ;;  %v2274_v5 = vunpack.i.l.bf16 %v2273_v10 }
 0x8c1   : > { %1362 = vrot.lane.b32.xlu0 %v2615_v12, %s2382_s29 }
 0x8c2   : > { %v1495_v35 = vmul.f32 %v2274_v5, %v2744_v60 }
 0x8c3   : > { %v2190_v51 = vpop.f32.mrb[20].mxu0 }
 0x8c4   : > { %v1344_v52 = vpop.f32.mrb[21].mxu0  ;;  %v1372_v11 = vmul.f32 %v2190_v51, %v2673_v33 }
 0x8c5   : > { %v1370_v56 = vmul.f32 %v2664_v23, %v1344_v52  ;;  %v2191_v57 = vpop.f32.mrb[22].mxu0  ;;  %v1496_v23 = vmul.f32 %v2275_v14, %v2741_v58 }
 0x8c6   : > { %v1347_v59 = vpop.f32.mrb[23].mxu0 }
 0x8c7   : > { %v1371_v61 = vmul.f32 %v2667_v28, %v1347_v59  ;;  %1376 = vrot.lane.b32.xlu1 %v1370_v56, %s2382_s29 }
 0x8c9   : > { %1378 = vrot.lane.b32.xlu0 %v1371_v61, %s2382_s29 }
 0x8cb   : > { %1380 = vrot.lane.b32.xlu1 %v1372_v11, %s2382_s29 }
 0x929   : > { %v1505_v12 = vpop.permute.xlu1 %1504 }
 0x92a   : > { %v1513_v6 = vadd.f32 %v1505_v12, %v1495_v35 }
 0x92b   : > { %v1507_v40 = vpop.permute.xlu0 %1506 }
 0x92c   : > { %v1514_v0 = vadd.f32 %v1507_v40, %v1496_v23 }
 0x92d   : > { %v1491_v28 = vpop.permute.xlu1 %1490 }
 0x92e   : > { %v1518_v19 = vpack.c.bf16 %v1514_v0, %v1513_v6  ;;  %v1497_v20 = vmul.f32 %v1491_v28, %v2752_v2 }
 0x92f   : > { %v1509_v33 = vpop.permute.xlu0 %1508 }
 0x930   : > { %v1515_v21 = vadd.f32 %v1509_v33, %v1497_v20  ;;  %1528 = vrot.lane.b32.xlu0 %v1518_v19, %s2379_s23 }
 0x931   : > { %v2278_v3 = vpop.permute.xlu1 %2277 }
 0x932   : > { %v1519_v43 = vpack.c.bf16 %v1515_v21, %v1515_v21  ;;  %v2280_v22 = vunpack.i.h.bf16 %v2278_v3  ;;  %v2279_v30 = vunpack.i.l.bf16 %v2278_v3  ;;  %v738_v21 = vadd.f32 %v2547_v18, %v2542_v16 }
 0x933   : > { %v1363_v60 = vpop.permute.xlu0 %1362 }
 0x934   : > { %1530 = vrot.lane.b32.xlu1 %v1519_v43, %s2379_s23  ;;  %v1367_v58 = vmul.f32 %v2279_v30, %v2746_v62  ;;  %v1368_v24 = vmul.f32 %v2280_v22, %v2756_v15  ;;  %v1369_v45 = vmul.f32 %v1363_v60, %v2768_v17  ;;  %v745_v22 = vmul.f32 %v738_v21, %v738_v21 }
 0x936   : > { %v748_v60 = vmul.f32 %v745_v22, %v738_v21 }
 0x938   : > { %v751_v18 = vmul.f32 0.044715, %v748_v60 }
 0x939   : > { %v1377_v36 = vpop.permute.xlu1 %1376 }
 0x93a   : > { %v1385_v2 = vadd.f32 %v1377_v36, %v1367_v58 }
 0x93b   : > { %v1379_v41 = vpop.permute.xlu0 %1378 }
 0x93c   : > { %v1386_v25 = vadd.f32 %v1379_v41, %v1368_v24 }
 0x93d   : > { %v1381_v26 = vpop.permute.xlu1 %1380 }
 0x93e   : > { %v1516_v27 = vpack.c.bf16 %v1386_v25, %v1385_v2  ;;  %v1387_v29 = vadd.f32 %v1381_v26, %v1369_v45  ;;  %v754_v25 = vadd.f32 %v751_v18, %v738_v21 }
 0x940   : > { %v1517_v34 = vpack.c.bf16 %v1387_v29, %v1387_v29  ;;  %1522 = vrot.lane.b32.xlu0 %v1516_v27, %s2380_s28  ;;  %v2294_v29 = vld [vmem:[%s2930_s13 + $0x18] sm:$0xff]  }
 0x942   : > { %1524 = vrot.lane.b32.xlu1 %v1517_v34, %s2380_s28  ;;  %v757_v34 = vmul.f32 0.7978846, %v754_v25 }
 0x9a2   : > { %v1529_v44 = vpop.permute.xlu0 %1528 }
 0x9a3   : > { %v1539_v31 = vsel %vm843_vm2, %v1529_v44, 0  ;;  %2245 = vmatprep.subr.msk.bf16.mxu0 %vm843_vm2, %v1529_v44  ;;  %v2295_v44 = vld [vmem:[%s2930_s13 + $0x20] sm:$0xff]  }
 0x9a4   : > { %2199 = vmatpush3.bf16.xpose.msra.mxu0 %v1539_v31  ;;  %v2296_v31 = vld [vmem:[%s2930_s13 + $0x28] sm:$0xff]  }
 0x9a6   : > { %v1531_v62 = vpop.permute.xlu1 %1530 }
 0x9a7   : > { %2246 = vmatprep.subr.msk.bf16.mxu0 %vm843_vm2, %v1531_v62  ;;  %v1542_v15 = vsel %vm843_vm2, %v1531_v62, 0  ;;  %v2297_v62 = vld [vmem:[%s2930_s13 + $0x30] sm:$0xff]  }
 0x9ac   : > { %2201 = vmatpush3.bf16.xpose.msra.mxu0 %v1542_v15 }
 0x9b2   : > { %v1523_v17 = vpop.permute.xlu0 %1522 }
 0x9b3   : > { %2202 = vmatprep.mubr.msk.bf16.mxu0 %vm843_vm2, %v1523_v17  ;;  %v2300_v17 = vld [vmem:[%s2930_s13 + $0x48] sm:$0xff]  }
 0x9b4   : > { %v1525_v32 = vpop.permute.xlu1 %1524 }
 0x9b5   : > { %2203 = vmatmul.mubr.msk.bf16.vlgmr.msra.gmra.mrb[24].mxu0 %vm843_vm2, %v1525_v32 }
 0xa88   : > { %v2204_v37 = vpop.f32.mrb[24].mxu0 }
 0xa89   : > { %v1578_v38 = vpop.f32.mrb[25].mxu0  ;;  %v1594_v49 = vmul.f32 0.25, %v2204_v37 }
 0xa8a   : > { %v1592_v39 = vmul.f32 0.25, %v1578_v38  ;;  %v2205_v42 = vpop.f32.mrb[26].mxu0 }
 0xa8b   : > { %v1581_v47 = vpop.f32.mrb[27].mxu0  ;;  %v1601_v57 = vsel %vm1158_vm3, %v1594_v49, -inf  ;;  %v2302_v42 = vld [vmem:[%s2930_s13 + $0x8] sm:$0xff]  }
 0xa8c   : > { %v1593_v51 = vmul.f32 0.25, %v1581_v47  ;;  %v1595_v52 = vsel %vm1158_vm3, %v1592_v39, -inf }
 0xa8d   : > { %1596 = vmax.xlane.f32.xlu0 %v1595_v52 }
 0xa8e   : > { %v1598_v56 = vsel %vm1158_vm3, %v1593_v51, -inf }
 0xa8f   : > { %1599 = vmax.xlane.f32.xlu1 %v1598_v56 }
 0xa91   : > { %1602 = vmax.xlane.f32.xlu0 %v1601_v57 }
 0xb1a   : > { %v1597_v59 = vpop.xlane.xlu0 %1596 }
 0xb1b   : > { %v1604_v61 = vsub.f32 %v1592_v39, %v1597_v59  ;;  %v2301_v39 = vld [vmem:[%s2930_s13] sm:$0xff]  }
 0xb1c   : > { %v1600_v11 = vpop.xlane.xlu1 %1599  ;;  %2234 = vmatprep.subr.bf16.mxu0 %v2301_v39 }
 0xb1d   : > { %v1607_v10 = vmul.f32 1.442695, %v1604_v61  ;;  %v1605_v14 = vsub.f32 %v1593_v51, %v1600_v11  ;;  %2235 = vmatpush3.bf16.msra.mxu0 %v2301_v39 }
 0xb1e   : > { %v1603_v5 = vpop.xlane.xlu0 %1602  ;;  %2236 = vmatprep.subr.bf16.mxu0 %v2302_v42 }
 0xb1f   : > { %2353 = vpow2.f32 %v1607_v10  ;;  %v1609_v12 = vmul.f32 1.442695, %v1605_v14  ;;  %v1606_v35 = vsub.f32 %v1594_v49, %v1603_v5 }
 0xb21   : > { %2355 = vpow2.f32 %v1609_v12  ;;  %v1611_v23 = vmul.f32 1.442695, %v1606_v35  ;;  %2237 = vmatpush3.bf16.msra.mxu0 %v2302_v42 }
 0xb23   : > { %2357 = vpow2.f32 %v1611_v23 }
 0xb29   : > { %v2354_v40 = vpop.eup %2353 }
 0xb2a   : > { %v1613_v6 = vsel %vm1158_vm3, %v2354_v40, 0.0 }
 0xb2b   : > { %v2356_v0 = vpop.eup %2355  ;;  %1614 = vadd.xlane.f32.xlu0 %v1613_v6 }
 0xb2c   : > { %v1616_v20 = vsel %vm1158_vm3, %v2356_v0, 0.0 }
 0xb2d   : > { %v2358_v28 = vpop.eup %2357 }
 0xb2e   : > { %v1619_v19 = vsel %vm1158_vm3, %v2358_v28, 0.0 }
 0xb2f   : > { %1620 = vadd.xlane.f32.xlu1 %v1619_v19  ;;  %1617 = vadd.xlane.f32.xlu0 %v1616_v20 }
 0xb40   : > { %1632 = vrot.lane.b32.xlu1 %v2772_v4, %s2381_s27 }
 0xb45   : > { %1630 = vrot.lane.b32.xlu0 %v2750_v63, %s2381_s27  ;;  %v2293_v63 = vld [vmem:[%s2930_s13 + $0x10] sm:$0xff]  }
 0xbb8   : > { %v1615_v33 = vpop.xlane.xlu0 %1614 }
 0xbb9   : > { %2359 = vrcp.f32 %v1615_v33 }
 0xbbc   : > { %v1618_v43 = vpop.xlane.xlu0 %1617  ;;  %v1621_v3 = vpop.xlane.xlu1 %1620 }
 0xbbd   : > { %2361 = vrcp.f32 %v1618_v43 }
 0xbbe   : > { %2363 = vrcp.f32 %v1621_v3 }
 0xbbf   : > { %2365 = vtanh.f32 %v757_v34 }
 0xbc0   : > { %v1631_v30 = vpop.permute.xlu0 %1630  ;;  %v1633_v36 = vpop.permute.xlu1 %1632 }
 0xbc1   : > { %2206 = vmatprep.subr.bf16.mxu1 %v1631_v30  ;;  %v1642_v16 = vsel %vm1207_vm4, %v1633_v36, 0 }
 0xbc2   : > { %2207 = vmatpush3.bf16.msra.mxu1 %v1631_v30 }
 0xbc3   : > { %2247 = vmatprep.subr.msk.bf16.mxu1 %vm1207_vm4, %v1633_v36  ;;  %v2360_v4 = vpop.eup %2359 }
 0xbc4   : > { %v1625_v41 = vmul.f32 %v2360_v4, %v2354_v40 }
 0xbc6   : > { %2209 = vmatpush3.bf16.msra.mxu1 %v1642_v16 }
 0xbc7   : > { %v2362_v58 = vpop.eup %2361  ;;  %2214 = vmatprep.subr.bf16.mxu1 %v2293_v63 }
 0xbc8   : > { %v2364_v24 = vpop.eup %2363  ;;  %v1626_v45 = vmul.f32 %v2362_v58, %v2356_v0 }
 0xbc9   : > { %v1627_v2 = vmul.f32 %v2364_v24, %v2358_v28  ;;  %v2366_v54 = vpop.eup %2365  ;;  %v1893_v28 = vld [vmem:[%s2931_s14] sm:$0x1] }
 0xbca   : > { %v1628_v26 = vpack.c.bf16 %v1626_v45, %v1625_v41  ;;  %v763_v15 = vadd.f32 1.0, %v2366_v54  ;;  %v1894_v19 = vunpack.c.l.bf16 %v1893_v28 }
 0xbcb   : > { %v1629_v27 = vpack.c.bf16 %v1627_v2, %v1627_v2 }
 0xbcc   : > { %2210 = vmatprep.mubr.msk.bf16.mxu1 %vm1158_vm3, %v1628_v26  ;;  %v766_v32 = vmul.f32 0.5, %v763_v15 }
 0xbcd   : > { %2211 = vmatmul.mubr.msk.bf16.vlgmr.msra.gmra.mrb[12].mxu1 %vm1158_vm3, %v1629_v27 }
 0xbce   : > { %2215 = vmatpush3.bf16.msra.mxu1 %v2293_v63  ;;  %2230 = vmatprep.mubr.bf16.mxu1 %v1729_v55  ;;  %v2299_v55 = vld [vmem:[%s2930_s13 + $0x40] sm:$0xff]   ;;  %v769_v37 = vmul.f32 %v766_v32, %v738_v21 }
 0xbcf   : > { %2216 = vmatprep.subr.bf16.mxu1 %v2294_v29 }
 0xbd0   : > { %v1730_v38 = vpack.c.bf16 %v769_v37, %v769_v37 }
 0xbd2   : > { %2217 = vmatpush3.bf16.msra.mxu1 %v2294_v29 }
 0xbd3   : > { %2218 = vmatprep.subr.bf16.mxu1 %v2295_v44 }
 0xbd6   : > { %2219 = vmatpush3.bf16.msra.mxu1 %v2295_v44 }
 0xbd7   : > { %2220 = vmatprep.subr.bf16.mxu1 %v2296_v31 }
 0xbda   : > { %2221 = vmatpush3.bf16.msra.mxu1 %v2296_v31 }
 0xbdb   : > { %2222 = vmatprep.subr.bf16.mxu1 %v2297_v62 }
 0xbde   : > { %2223 = vmatpush3.bf16.msra.mxu1 %v2297_v62 }
 0xbdf   : > { %2224 = vmatprep.subr.bf16.mxu1 %v2298_v53 }
 0xbe2   : > { %2225 = vmatpush3.bf16.msra.mxu1 %v2298_v53 }
 0xbe3   : > { %2226 = vmatprep.subr.bf16.mxu1 %v2299_v55 }
 0xbe6   : > { %2227 = vmatpush3.bf16.msra.mxu1 %v2299_v55 }
 0xbe7   : > { %2228 = vmatprep.subr.bf16.mxu1 %v2300_v17 }
 0xbea   : > { %2229 = vmatpush3.bf16.msra.mxu1 %v2300_v17 }
 0xbed   : > { %2231 = vmatmul.mubr.bf16.vlgmr.msra.gmra.mrb[16].mxu1 %v1730_v38 }
 0xca0   : > { %v2212_v47 = vpop.f32.mrb[12].mxu1 }
 0xca1   : > { %v1678_v49 = vpop.f32.mrb[13].mxu1 }
 0xca2   : > { %v2213_v51 = vpop.f32.mrb[14].mxu1 }
 0xca3   : > { %v1681_v52 = vpop.f32.mrb[15].mxu1 }
 0xca4   : > { %v2281_v56 = vpack.i.bf16 %v1681_v52, %v1678_v49 }
 0xca6   : > { %2282 = vrot.lane.b32.xlu1 %v2281_v56, %s2382_s29 }
 0xcaa   : > { %1699 = vrot.lane.b32.xlu1 %v2212_v47, %s2382_s29 }
 0xcc0   : > { %v2232_v57 = vpop.f32.mrb[16].mxu1 }
 0xcc1   : > { %v1813_v59 = vpop.f32.mrb[17].mxu1 }
 0xcc2   : > { %v2233_v61 = vpop.f32.mrb[18].mxu1 }
 0xcc3   : > { %v1816_v11 = vpop.f32.mrb[19].mxu1 }
 0xd18   : > { %v2283_v10 = vpop.permute.xlu1 %2282 }
 0xd19   : > { %v2285_v14 = vunpack.i.h.bf16 %v2283_v10  ;;  %v2284_v5 = vunpack.i.l.bf16 %v2283_v10 }
 0xd1b   : > { %v1705_v12 = vsel %vm843_vm2, %v2806_v50, %v2285_v14  ;;  %v1704_v35 = vsel %vm843_vm2, %v2803_v48, %v2284_v5  ;;  %v1898_v50 = vrot.slane %v1894_v19, %v2521_v46 }
 0xd1c   : > { %v1727_v23 = vpack.c.bf16 %v1705_v12, %v1704_v35  ;;  %v1700_v40 = vpop.permute.xlu1 %1699 }
 0xd1d   : > { %v1706_v6 = vsel %vm843_vm2, %v2801_v13, %v1700_v40 }
 0xd1e   : > { %v1728_v0 = vpack.c.bf16 %v1706_v6, %v1706_v6  ;;  %2238 = vmatprep.mubr.msk.bf16.mxu0 %vm562_vm1, %v1727_v23 }
 0xd20   : > { %2239 = vmatmul.mubr.msk.bf16.vlgmr.msra.gmra.mrb[28].mxu0 %vm562_vm1, %v1728_v0 }
 0xdf3   : > { %v2240_v20 = vpop.f32.mrb[28].mxu0 }
 0xdf4   : > { %v1888_v33 = vadd.f32 %v2240_v20, %v2232_v57  ;;  %v1879_v48 = vpop.f32.mrb[29].mxu0 }
 0xdf5   : > { %v1880_v21 = vadd.f32 %v1879_v48, %v1813_v59  ;;  %v2241_v43 = vpop.f32.mrb[30].mxu0 }
 0xdf6   : > { %v1882_v3 = vpop.f32.mrb[31].mxu0  ;;  %v1901_v60 = vadd.f32 %v1898_v50, %v1888_v33 }
 0xdf7   : > { %v1899_v22 = vadd.f32 %v1898_v50, %v1880_v21  ;;  %v1883_v13 = vadd.f32 %v1882_v3, %v1816_v11 }
 0xdf9   : > { %v1900_v30 = vadd.f32 %v1898_v50, %v1883_v13  ;;  %1905 = vrot.lane.b32.xlu0 %v1899_v22, %s2383_s30 }
 0xdfb   : > { %1907 = vrot.lane.b32.xlu1 %v1900_v30, %s2383_s30 }
 0xdfd   : > { %1909 = vrot.lane.b32.xlu0 %v1901_v60, %s2383_s30 }
 0xe6b   : > { %v1906_v36 = vpop.permute.xlu0 %1905 }
 0xe6c   : > { %v1914_v63 = vmul.f32 %v1906_v36, %v2526_v1 }
 0xe6d   : > { %v1908_v46 = vpop.permute.xlu1 %1907 }
 0xe6e   : > { %v1915_v4 = vmul.f32 %v1908_v46, %v2526_v1  ;;  %1920 = vrot.lane.b32.xlu1 %v1914_v63, %s2383_s30 }
 0xe6f   : > { %v1910_v16 = vpop.permute.xlu0 %1909 }
 0xe70   : > { %v1916_v18 = vmul.f32 %v1910_v16, %v2526_v1  ;;  %1922 = vrot.lane.b32.xlu0 %v1915_v4, %s2383_s30 }
 0xe72   : > { %1924 = vrot.lane.b32.xlu1 %v1916_v18, %s2383_s30 }
 0xee0   : > { %v1921_v58 = vpop.permute.xlu1 %1920 }
 0xee1   : > { %v1929_v24 = vadd.f32 %v2490_v7, %v1921_v58 }
 0xee2   : > { %v1923_v41 = vpop.permute.xlu0 %1922 }
 0xee3   : > { %v2066_v45 = vpack.c.bf16 %v1929_v24, %v1929_v24  ;;  %v1930_v2 = vadd.f32 %v2494_v9, %v1923_v41 }
 0xee4   : > { %v1925_v25 = vpop.permute.xlu1 %1924 }
 0xee5   : > { %1946 = vst.msk [vmem:[%s508_s21] sm:$0xf] %vm1945_vm5, %v2066_v45  ;;  %v2067_v1 = vpack.c.bf16 %v1930_v2, %v1930_v2  ;;  %v1931_v26 = vadd.f32 %v1925_v25, %v2492_v8 }
 0xee7   : > { %1947 = vst.msk [vmem:[%s508_s21 + $0x4] sm:$0xf] %vm1945_vm5, %v2067_v1  ;;  %v2068_v27 = vpack.c.bf16 %v1931_v26, %v1931_v26 }
 0xee9   : > { %1948 = vst.msk [vmem:[%s508_s21 + $0x8] sm:$0xf] %vm1945_vm5, %v2068_v27 }
 0xeea PF: > { %s25_s18 = sadd.s32 1, %s2373_s18  }
 0xeeb   : > { %p22_p4 = scmp.ge.s32.totalorder %s25_s18, 4  }
 0xeed   :  { %24 = sbr.rel (!%p22_p4) target bundleno = 1 (0x1), region = 113 }

// kernel: flux_transformer_forward.7
= control target key start
LH: loop header
LB: loop body
LE: loop exit
PB: predicated region body
PF: predicated region fallthrough
CT: control target
= control target key end

     0   :  { %s3518_s6 = smov 1   ;;  %s3519_s10 = smov 2   ;;  %s4256_s0 = inlined_call_operand.smem [shape: u32[30], index: -1, kind: input, shape index: {}] }
   0x1   :  { %s3565_s5 = sld [smem:[%s4256_s0]]   ;;  %s3520_s14 = smov 3  }
   0x2   :  { %s3570_s9 = sld [smem:[%s4256_s0 + %s3518_s6]]   ;;  %s3521_s18 = smov 4  }
   0x3   :  { %s3575_s13 = sld [smem:[%s4256_s0 + %s3519_s10]]   ;;  %s3522_s22 = smov 5  }
   0x4   :  { %s3580_s17 = sld [smem:[%s4256_s0 + %s3520_s14]]   ;;  %s3523_s26 = smov 6  }
   0x5   :  { %s3585_s21 = sld [smem:[%s4256_s0 + %s3521_s18]]   ;;  %s3524_s30 = smov 7  }
   0x6   :  { %s3590_s25 = sld [smem:[%s4256_s0 + %s3522_s22]]   ;;  %s3525_s4 = smov 8  }
   0x7   :  { %s3595_s29 = sld [smem:[%s4256_s0 + %s3523_s26]]   ;;  %s3526_s10 = smov 9  }
   0x8   :  { %s3600_s3 = sld [smem:[%s4256_s0 + %s3524_s30]]   ;;  %s3527_s15 = smov 10  }
   0x9   :  { %s3605_s8 = sld [smem:[%s4256_s0 + %s3525_s4]]   ;;  %s3528_s20 = smov 11  }
   0xa   :  { %s3610_s14 = sld [smem:[%s4256_s0 + %s3526_s10]]   ;;  %s3529_s26 = smov 12  }
   0xb   :  { %4264 = sst [smem:[#allocation2_spill]] %s3585_s21  ;;  %s3530_s1 = smov 13  }
   0xc   :  { %s3615_s19 = sld [smem:[%s4256_s0 + %s3527_s15]]   ;;  %s3531_s7 = smov 14  }
   0xd   :  { %s3620_s24 = sld [smem:[%s4256_s0 + %s3528_s20]]   ;;  %s3532_s15 = smov 15  }
   0xe   :  { %s3625_s30 = sld [smem:[%s4256_s0 + %s3529_s26]]   ;;  %s3533_s22 = smov 16  }
   0xf   :  { %s3630_s6 = sld [smem:[%s4256_s0 + %s3530_s1]]   ;;  %s3534_s28 = smov 17  }
  0x10   :  { %s3635_s12 = sld [smem:[%s4256_s0 + %s3531_s7]]   ;;  %s3535_s7 = smov 18  }
  0x11   :  { %s3640_s20 = sld [smem:[%s4256_s0 + %s3532_s15]]   ;;  %s3536_s15 = smov 19  }
  0x12   :  { %s3645_s27 = sld [smem:[%s4256_s0 + %s3533_s22]]   ;;  %s3537_s22 = smov 20  }
  0x13   :  { %s3650_s4 = sld [smem:[%s4256_s0 + %s3534_s28]]   ;;  %s3538_s28 = smov 21  }
  0x14   :  { %s3655_s21 = sld [smem:[%s4256_s0 + %s3535_s7]]   ;;  %s3539_s7 = smov 22  }
  0x16   :  { %4265 = sst [smem:[#allocation3_spill]] %s3635_s12 }
  0x17   :  { %s3660_s12 = sld [smem:[%s4256_s0 + %s3536_s15]]   ;;  %s3540_s15 = smov 23  }
  0x18   :  { %4266 = sst [smem:[#allocation4_spill]] %s3645_s27 }
  0x19   :  { %4267 = sst [smem:[#allocation5_spill]] %s3650_s4 }
  0x1a   :  { %4268 = sst [smem:[#allocation6_spill]] %s3655_s21 }
  0x1b   :  { %s3665_s27 = sld [smem:[%s4256_s0 + %s3537_s22]]   ;;  %s3541_s22 = smov 24  }
  0x1c   :  { %s3670_s4 = sld [smem:[%s4256_s0 + %s3538_s28]]   ;;  %s3542_s28 = smov 25  }
  0x1d   :  { %4269 = sst [smem:[#allocation7_spill]] %s3660_s12 }
  0x1e   :  { %s3675_s21 = sld [smem:[%s4256_s0 + %s3539_s7]]   ;;  %s3543_s7 = smov 26  }
  0x1f   :  { %s3680_s12 = sld [smem:[%s4256_s0 + %s3540_s15]]   ;;  %s3544_s15 = smov 27  }
  0x21   :  { %4270 = sst [smem:[#allocation8_spill]] %s3665_s27 }
  0x22   :  { %4271 = sst [smem:[#allocation9_spill]] %s3670_s4 }
  0x23   :  { %s3685_s27 = sld [smem:[%s4256_s0 + %s3541_s22]]   ;;  %s3545_s22 = smov 28  }
  0x24   :  { %4272 = sst [smem:[#allocation10_spill]] %s3675_s21 }
  0x25   :  { %4273 = sst [smem:[#allocation11_spill]] %s3680_s12 }
  0x26   :  { %s3690_s4 = sld [smem:[%s4256_s0 + %s3542_s28]]   ;;  %s3546_s28 = smov 29  }
  0x27   :  { %s3695_s21 = sld [smem:[%s4256_s0 + %s3543_s7]]   ;;  %s3712_s7 = smov 0  }
  0x28   :  { %s3700_s12 = sld [smem:[%s4256_s0 + %s3544_s15]]  }
  0x29   :  { %4274 = sst [smem:[#allocation12_spill]] %s3685_s27 }
  0x2a   :  { %s3705_s27 = sld [smem:[%s4256_s0 + %s3545_s22]]  }
  0x2c   :  { %4275 = sst [smem:[#allocation13_spill]] %s3690_s4 }
  0x2d   :  { %s3710_s4 = sld [smem:[%s4256_s0 + %s3546_s28]]  }
  0x2e LB: > { %s3005_s10 = sadd.s32 4294967295, %s3516_s7   ;;  %p3009_p0 = scmp.ge.s32.totalorder %s3516_s7, 1  ;;  %s3516_s7 = sphi %s3712_s7, %s70_s7  }
  0x2f   : > { %p837_p1 = scmp.lt.s32.totalorder %s3516_s7, 3 }
  0x31   : > { %p838_p2 = pnand %p3009_p0, %p837_p1 }
  0x32   : > { %p924_p3 = scmp.lt.s32.totalorder (!%p838_p2), %s3005_s10, 1  ;;  %v3403_v0 = vld [vmem:[%s3595_s29 + $0x4] ss:$12 sps:$4 sm:$0xff] (!%p838_p2)   ;;  %v3405_v1 = vld [vmem:[%s3595_s29] ss:$12 sps:$4 sm:$0xff] (!%p838_p2)   ;;  %v3547_v4 = vmov (!%p838_p2), 0   ;;  %v1019_v40 = vlaneseq (!%p838_p2) }
  0x33   : > { %841 = sbr.rel (%p838_p2) target bundleno = 4979 (0x1373), region = 132  ;;  %1038 = vmatprep.subr.bf16.mxu1 (!%p838_p2), %v3403_v0  ;;  %v3406_v2 = vld [vmem:[%s3595_s29 + $0x1c] ss:$12 sps:$4 sm:$0xff] (!%p838_p2)   ;;  %v3408_v3 = vld [vmem:[%s3595_s29 + $0x18] ss:$12 sps:$4 sm:$0xff] (!%p838_p2)   ;;  %1070 = vmatprep.mubr.bf16.mxu1 (!%p838_p2), %v3547_v4  ;;  %vm1034_vm0 = vcmask (!%p838_p2), 261120  }
  0x34   : > { %1039 = vmatpush1.bf16.msra.mxu1 (!%p838_p2), %v3405_v1  ;;  %v3409_v36 = vld [vmem:[%s3595_s29 + $0x8] ss:$12 sps:$4 sm:$0xff] (!%p838_p2)   ;;  %v3548_v37 = vmov (!%p838_p2), 0.0   ;;  %vm3549_vm1 = vmmov (!%p838_p2), 0   ;;  %v3411_v38 = vld [vmem:[%s3605_s8] sm:$0xff] (!%p838_p2)   ;;  %v3782_v41 = vshrl.u32 (!%p838_p2), %v1019_v40, 7 }
  0x35   : > { %1040 = vmatprep.subr.bf16.mxu1 (!%p838_p2), %v3406_v2  ;;  %v3410_v39 = vld [vmem:[%s3595_s29 + $0x20] ss:$12 sps:$4 sm:$0xff] (!%p838_p2)   ;;  %3171 = vmatprep.subr.bf16.mxu0 (!%p838_p2), %v3548_v37  ;;  %s3550_s22 = smov (!%p838_p2), 96   ;;  %s3551_s23 = smov (!%p838_p2), 32   ;;  %vm1337_vm2 = vcmask (!%p838_p2), 130048   ;;  %vm1666_vm3 = vcmask (!%p838_p2), 195584  }
  0x36   : > { %3172 = vmatpush3.bf16.msra.mxu0 (!%p838_p2), %v3411_v38  ;;  %3175 = vmatprep.mubr.msk.bf16.mxu0 (!%p838_p2), %vm3549_vm1, %v3548_v37  ;;  %v984_v42 = vld [vmem:[%s3600_s3] sm:$0x7] (!%p838_p2)  ;;  %v3788_v44 = vsub.s32 (!%p838_p2), 0, %v3782_v41  ;;  %v1025_v45 = vsub.s32 (!%p838_p2), 2, %v3782_v41  ;;  %v3413_v47 = vld [vmem:[%s3605_s8 + $0x8] sm:$0xff] (!%p838_p2)   ;;  %s3552_s26 = smov (!%p838_p2), 64  }
  0x37   : > { %3173 = vmatprep.subr.bf16.mxu0 (!%p838_p2), %v3548_v37  ;;  %v3785_v43 = vunpack.c.l.bf16 (!%p838_p2), %v984_v42  ;;  %v3412_v46 = vld [vmem:[%s3615_s19] sm:$0xff] (!%p838_p2)   ;;  %v3414_v50 = vld [vmem:[%s3615_s19 + $0x8] sm:$0xff] (!%p838_p2)   ;;  %s4276_s28 = sld [smem:[#allocation3_spill]] (!%p838_p2)  ;;  %s4277_s1 = sld [smem:[#allocation2_spill]] (!%p838_p2)  ;;  %vm1715_vm4 = vcmask (!%p838_p2), 1043456   ;;  %vm2864_vm5 = vcmask (!%p838_p2), 257024  }
  0x38   : > { %1041 = vmatpush1.bf16.msra.mxu1 (!%p838_p2), %v3408_v3  ;;  %s3553_s2 = smov (!%p838_p2), 80  }
  0x39   : > { %3163 = vmatprep.subr.bf16.mxu1 (!%p838_p2), %v3548_v37  ;;  %v1022_v48 = vrot.slane (!%p838_p2), %v3785_v43, %v3788_v44  ;;  %v1026_v49 = vrot.slane (!%p838_p2), %v3785_v43, %v1025_v45 }
  0x3a   : > { %s4290_s10 = smov (!%p924_p3, %s3005_s10), 1  ;;  %3174 = vmatpush3.bf16.msra.mxu0 %v3413_v47 }
  0x3b   : > { %s3080_s0 = sshll.u32 %s4290_s10, 3  ;;  %s4263_s11 = sshll.u32 %s4290_s10, 2 }
  0x3c   : > { %s928_s15 = scalar_lea.vmem %s3565_s5, %s3080_s0  ;;  %s932_s16 = scalar_lea.vmem %s3570_s9, %s4263_s11 }
  0x3d   : > { %v3085_v5 = vld [vmem:[%s928_s15] sm:$0xff]   ;;  %s935_s18 = scalar_lea.vmem %s3575_s13, %s4290_s10  ;;  %s3554_s15 = smov 112  }
  0x3e   : > { %v3734_v6 = vunpack.c.l.bf16 %v3085_v5  ;;  %v950_v7 = vld [vmem:[%s932_s16] sm:$0xf]  ;;  %v3736_v8 = vunpack.c.h.bf16 %v3085_v5  ;;  %s3555_s16 = smov 48   ;;  %s4286_s11 = sld [smem:[#allocation13_spill]] }
  0x3f   : > { %v3740_v9 = vunpack.c.l.bf16 %v950_v7  ;;  %v952_v10 = vld [vmem:[%s935_s18] sm:$0x1]  ;;  %s3556_s18 = smov 16  }
  0x40   : > { %v1119_v11 = vsel %vm1034_vm0, %v3734_v6, 0.0  ;;  %v953_v12 = vunpack.c.l.bf16 %v952_v10  ;;  %v1122_v14 = vsel %vm1034_vm0, %v3736_v8, 0.0 }
  0x41   : > { %1120 = vadd.xlane.f32.xlu0 %v1119_v11  ;;  %v1163_v13 = vsel %vm1034_vm0, %v3740_v9, 0.0 }
  0x42   : > { %1164 = vadd.xlane.f32.xlu1 %v1163_v13  ;;  %v3016_v15 = vmul.f32 -1.442695, %v953_v12 }
  0x44   : > { %3440 = vpow2.f32 %v3016_v15 }
  0x45   : > { %1123 = vadd.xlane.f32.xlu0 %v1122_v14 }
  0x4e   : > { %v3441_v16 = vpop.eup %3440 }
  0x4f   : > { %v971_v17 = vadd.f32 1.0, %v3441_v16 }
  0x51   : > { %3442 = vrcp.f32 %v971_v17 }
  0x5b   : > { %v3443_v18 = vpop.eup %3442 }
  0x5c   : > { %v974_v19 = vmul.f32 %v3443_v18, %v953_v12 }
  0x5e   : > { %v975_v20 = vpack.c.bf16 %v974_v19, %v974_v19 }
  0x60   : > { %3023 = vmatmul.mubr.msk.bf16.vlgmr.msra.gmra.mrb[0].mxu1 %vm1034_vm0, %v975_v20 }
  0x61   : > { %3167 = vmatprep.mubr.msk.bf16.mxu1 %vm3549_vm1, %v3548_v37  ;;  %3164 = vmatpush3.bf16.msra.mxu1 %v3409_v36 }
  0x62   : > { %3165 = vmatprep.subr.bf16.mxu1 %v3548_v37 }
  0x65   : > { %3166 = vmatpush3.bf16.msra.mxu1 %v3410_v39 }
  0x66   : > { %3179 = vmatprep.subr.bf16.mxu1 %v3548_v37 }
  0x68   : > { %3168 = vmatmul.mubr.msk.bf16.vlgmr.msra.gmra.mrb[4].mxu1 %vm1034_vm0, %v975_v20 }
  0x69   : > { %3183 = vmatprep.mubr.msk.bf16.mxu1 %vm3549_vm1, %v3548_v37  ;;  %3180 = vmatpush3.bf16.msra.mxu1 %v3412_v46 }
  0x6a   : > { %3181 = vmatprep.subr.bf16.mxu1 %v3548_v37 }
  0x6d   : > { %3182 = vmatpush3.bf16.msra.mxu1 %v3414_v50 }
  0xce   : > { %v1121_v21 = vpop.xlane.xlu0 %1120 }
  0xcf   : > { %v1126_v22 = vmul.f32 0.03125, %v1121_v21  ;;  %v1165_v23 = vpop.xlane.xlu1 %1164 }
  0xd0   : > { %v1166_v24 = vmul.f32 0.03125, %v1165_v23 }
  0xd1   : > { %v3750_v25 = vsub.f32 %v3734_v6, %v1126_v22 }
  0xd2   : > { %v3753_v26 = vsub.f32 %v3740_v9, %v1166_v24  ;;  %v1124_v27 = vpop.xlane.xlu0 %1123 }
  0xd3   : > { %v1127_v28 = vmul.f32 0.03125, %v1124_v27  ;;  %v1130_v29 = vmul.f32 %v3750_v25, %v3750_v25 }
  0xd4   : > { %v1168_v30 = vmul.f32 %v3753_v26, %v3753_v26 }
  0xd5   : > { %v3760_v31 = vsub.f32 %v3736_v8, %v1127_v28  ;;  %v1132_v32 = vsel %vm1034_vm0, %v1130_v29, 0.0 }
  0xd6   : > { %1133 = vadd.xlane.f32.xlu1 %v1132_v32  ;;  %v1169_v33 = vsel %vm1034_vm0, %v1168_v30, 0.0 }
  0xd7   : > { %v1131_v34 = vmul.f32 %v3760_v31, %v3760_v31 }
  0xd9   : > { %v1135_v35 = vsel %vm1034_vm0, %v1131_v34, 0.0  ;;  %v1267_v34 = vld [vmem:[%s3620_s24] sm:$0x1] }
  0xda   : > { %1170 = vadd.xlane.f32.xlu1 %v1169_v33  ;;  %1136 = vadd.xlane.f32.xlu0 %v1135_v35  ;;  %v1268_v35 = vunpack.c.l.bf16 %v1267_v34 }
  0xdc   : > { %v1272_v39 = vrot.slane %v1268_v35, %v3788_v44 }
 0x133   : > { %v1072_v51 = vpop.f32.mrb[0].mxu1 }
 0x134   : > { %v1073_v52 = vadd.f32 %v1072_v51, %v1022_v48  ;;  %v1074_v53 = vpop.f32.mrb[1].mxu1 }
 0x135   : > { %v1075_v54 = vadd.f32 %v1074_v53, %v1026_v49  ;;  %v1076_v55 = vpop.f32.mrb[2].mxu1 }
 0x136   : > { %v1146_v56 = vadd.f32 1.0, %v1073_v52  ;;  %v1077_v57 = vpop.f32.mrb[3].mxu1  ;;  %v3813_v16 = vrot.slane %v1073_v52, %v3788_v44 }
 0x137   : > { %v1176_v58 = vadd.f32 1.0, %v1075_v54  ;;  %v3806_v61 = vrot.slane %v1075_v54, %v3788_v44 }
 0x138   : > { %v1150_v59 = vrot.slane %v1146_v56, %v3788_v44 }
 0x139   : > { %v3800_v60 = vrot.slane %v1176_v58, %v3788_v44 }
 0x13a   : > { %1152 = vrot.lane.b32.xlu0 %v1150_v59, %s3550_s22 }
 0x13b   : > { %1182 = vrot.lane.b32.xlu1 %v3800_v60, %s3551_s23  ;;  %v3820_v29 = vpop.f32.mrb[4].mxu1 }
 0x13c   : > { %v3169_v30 = vpop.f32.mrb[5].mxu1 }
 0x13f   : > { %1191 = vrot.lane.b32.xlu1 %v3806_v61, %s3552_s26 }
 0x163   : > { %v1134_v62 = vpop.xlane.xlu1 %1133 }
 0x164   : > { %v1138_v0 = vmul.f32 0.03125, %v1134_v62 }
 0x166   : > { %v1140_v3 = vadd.f32 1e-06, %v1138_v0  ;;  %v1330_v0 = vld [vmem:[%s3630_s6] sm:$0x1] }
 0x167   : > { %v1137_v63 = vpop.xlane.xlu0 %1136  ;;  %v1171_v1 = vpop.xlane.xlu1 %1170 }
 0x168   : > { %v1139_v2 = vmul.f32 0.03125, %v1137_v63  ;;  %v1172_v4 = vmul.f32 0.03125, %v1171_v1  ;;  %3444 = vrsqrt.f32 %v1140_v3  ;;  %v1334_v1 = vld [vmem:[%s3640_s20] sm:$0x1] }
 0x169   : > { %v1335_v3 = vunpack.c.l.bf16 %v1334_v1 }
 0x16a   : > { %v1141_v5 = vadd.f32 1e-06, %v1139_v2  ;;  %v1173_v7 = vadd.f32 1e-06, %v1172_v4  ;;  %v1331_v2 = vunpack.c.l.bf16 %v1330_v0 }
 0x16b   : > { %v1387_v4 = vrot.slane %v1335_v3, %v3788_v44 }
 0x16c   : > { %3446 = vrsqrt.f32 %v1141_v5  ;;  %v1418_v5 = vrot.slane %v1331_v2, %v3788_v44 }
 0x16d   : > { %3448 = vrsqrt.f32 %v1173_v7 }
 0x16e   : > { %v3857_v7 = vpack.i.bf16 %v1418_v5, %v1387_v4  ;;  %v1328_v4 = vld [vmem:[%s3625_s30] sm:$0x1] }
 0x16f   : > { %v1332_v5 = vld [vmem:[%s4276_s28] sm:$0x1]  ;;  %s4278_s28 = sld [smem:[#allocation4_spill]] }
 0x172   : > { %v3445_v10 = vpop.eup %3444 }
 0x173   : > { %v1144_v13 = vmul.f32 %v3445_v10, %v3750_v25 }
 0x176   : > { %v3447_v11 = vpop.eup %3446 }
 0x177   : > { %v3449_v12 = vpop.eup %3448  ;;  %v1145_v14 = vmul.f32 %v3447_v11, %v3760_v31  ;;  %v1116_v31 = vpop.f32.mrb[6].mxu1 }
 0x178   : > { %v1175_v20 = vmul.f32 %v3449_v12, %v3753_v26  ;;  %v3170_v32 = vpop.f32.mrb[7].mxu1  ;;  %v1200_v26 = vld [vmem:[%s3610_s14] sm:$0x1] }
 0x179   : > { %v1201_v33 = vunpack.c.l.bf16 %v1200_v26  ;;  %v3866_v12 = vld [vmem:[%s3580_s17] sm:$0xff]  }
 0x17b   : > { %v1205_v36 = vrot.slane %v1201_v33, %v3788_v44 }
 0x1ac   : > { %v1153_v15 = vpop.permute.xlu0 %1152 }
 0x1ad   : > { %v1155_v17 = vmul.f32 %v1153_v15, %v1144_v13  ;;  %v1156_v18 = vmul.f32 %v1153_v15, %v1145_v14  ;;  %v1183_v19 = vpop.permute.xlu1 %1182  ;;  %v3090_v13 = vunpack.c.l.bf16 %v3866_v12  ;;  %v3091_v14 = vunpack.c.h.bf16 %v3866_v12 }
 0x1ae   : > { %v1185_v23 = vmul.f32 %v1183_v19, %v1175_v20  ;;  %v3884_v19 = vld [vmem:[%s3590_s25] sm:$0xff]  }
 0x1af   : > { %v1161_v21 = vadd.f32 %v3813_v16, %v1155_v17  ;;  %v1162_v22 = vadd.f32 %v3813_v16, %v1156_v18  ;;  %v3874_v15 = vpack.i.bf16 %v3091_v14, %v3090_v13  ;;  %v956_v17 = vld [vmem:[%s3580_s17 + $0x8] sm:$0xf]  ;;  %3193 = vmatprep.subr.bf16.mxu1 %v3884_v19  ;;  %3187 = vmatprep.subr.bf16.mxu0 %v3884_v19 }
 0x1b0   : > { %v3879_v18 = vunpack.c.l.bf16 %v956_v17  ;;  %v1333_v17 = vunpack.c.l.bf16 %v1332_v5 }
 0x1b1   : > { %v1195_v24 = vpack.c.bf16 %v1162_v22, %v1161_v21  ;;  %v1192_v25 = vpop.permute.xlu1 %1191 }
 0x1b2   : > { %v1194_v27 = vadd.f32 %v1192_v25, %v1185_v23 }
 0x1b3   : > { %3176 = vmatmul.mubr.msk.bf16.vlgmr.msra.gmra.mrb[0].mxu0 %vm1034_vm0, %v1195_v24 }
 0x1b4   : > { %v1262_v28 = vpack.c.bf16 %v1194_v27, %v1194_v27  ;;  %3188 = vmatpush3.bf16.msra.mxu0 %v3884_v19 }
 0x1b6   : > { %3184 = vmatmul.mubr.msk.bf16.vlgmr.msra.gmra.mrb[8].mxu1 %vm1034_vm0, %v1262_v28 }
 0x1b7   : > { %3194 = vmatpush3.bf16.msra.mxu1 %v3884_v19 }
 0x286   : > { %v1255_v38 = vpop.f32.mrb[0].mxu0 }
 0x287   : > { %v3826_v40 = vadd.f32 %v1255_v38, %v1205_v36  ;;  %v3177_v42 = vpop.f32.mrb[1].mxu0 }
 0x288   : > { %v1258_v45 = vpop.f32.mrb[2].mxu0 }
 0x289   : > { %v3178_v46 = vpop.f32.mrb[3].mxu0  ;;  %v1322_v47 = vpop.f32.mrb[8].mxu1  ;;  %v3830_v48 = vmul.f32 %v3826_v40, %v3826_v40  ;;  %v3836_v52 = vadd.f32 %v1258_v45, %v1205_v36 }
 0x28a   : > { %v3832_v49 = vadd.f32 %v1322_v47, %v1272_v39  ;;  %v3185_v50 = vpop.f32.mrb[9].mxu1 }
 0x28b   : > { %v1325_v51 = vpop.f32.mrb[10].mxu1  ;;  %1395 = vrot.lane.b32.xlu0 %v3830_v48, %s3550_s22  ;;  %v3846_v55 = vmul.f32 %v3836_v52, %v3836_v52 }
 0x28c   : > { %v3186_v53 = vpop.f32.mrb[11].mxu1  ;;  %v3840_v54 = vmul.f32 %v3832_v49, %v3832_v49  ;;  %v1353_v51 = vsel %vm1337_vm2, %v3830_v48, 0.0 }
 0x28d   : > { %v1356_v11 = vsel %vm1337_vm2, %v3846_v55, 0.0 }
 0x28e   : > { %1374 = vrot.lane.b32.xlu1 %v3840_v54, %s3550_s22  ;;  %v1338_v10 = vsel %vm1337_vm2, %v3840_v54, 0.0 }
 0x292   : > { %1397 = vrot.lane.b32.xlu1 %v3846_v55, %s3550_s22 }
 0x2fd   : > { %v1396_v56 = vpop.permute.xlu0 %1395 }
 0x2fe   : > { %v1401_v57 = vsel %vm1337_vm2, %v1396_v56, 0.0 }
 0x2ff   : > { %1402 = vadd.xlane.f32.xlu1 %v1401_v57 }
 0x300   : > { %v1375_v58 = vpop.permute.xlu1 %1374 }
 0x301   : > { %v1377_v59 = vsel %vm1337_vm2, %v1375_v58, 0.0 }
 0x302   : > { %1378 = vadd.xlane.f32.xlu0 %v1377_v59 }
 0x304   : > { %v1398_v62 = vpop.permute.xlu1 %1397 }
 0x305   : > { %v1404_v63 = vsel %vm1337_vm2, %v1398_v62, 0.0 }
 0x306   : > { %1405 = vadd.xlane.f32.xlu0 %v1404_v63 }
 0x31c   : > { %3369 = vrot.lane.b32.xlu0 %v3857_v7, %s3551_s23 }
 0x33b   : > { %1339 = vadd.xlane.f32.xlu0 %v1338_v10  ;;  %v1329_v10 = vunpack.c.l.bf16 %v1328_v4 }
 0x33f   : > { %1357 = vadd.xlane.f32.xlu0 %v1356_v11 }
 0x355   : > { %3374 = vrot.lane.b32.xlu0 %v3874_v15, %s3551_s23 }
 0x359   : > { %1567 = vrot.lane.b32.xlu0 %v3879_v18, %s3551_s23 }
 0x38c   : > { %v1403_v20 = vpop.xlane.xlu1 %1402 }
 0x38d   : > { %v1407_v21 = vmul.f32 0.0625, %v1403_v20 }
 0x38f   : > { %v1409_v22 = vadd.f32 1e-06, %v1407_v21  ;;  %v1379_v23 = vpop.xlane.xlu0 %1378 }
 0x390   : > { %v1380_v24 = vmul.f32 0.0625, %v1379_v23 }
 0x391   : > { %3450 = vrsqrt.f32 %v1409_v22  ;;  %v3913_v22 = vrot.slane %v1329_v10, %v3788_v44 }
 0x392   : > { %v1381_v25 = vadd.f32 1e-06, %v1380_v24  ;;  %v3917_v24 = vrot.slane %v1333_v17, %v3788_v44 }
 0x393   : > { %v1406_v27 = vpop.xlane.xlu0 %1405 }
 0x394   : > { %3452 = vrsqrt.f32 %v1381_v25  ;;  %v1408_v28 = vmul.f32 0.0625, %v1406_v27 }
 0x396   : > { %v1410_v30 = vadd.f32 1e-06, %v1408_v28 }
 0x397   : > { %v3370_v31 = vpop.permute.xlu0 %3369 }
 0x398   : > { %3454 = vrsqrt.f32 %v1410_v30  ;;  %v3372_v26 = vunpack.i.h.bf16 %v3370_v31  ;;  %v3371_v33 = vunpack.i.l.bf16 %v3370_v31 }
 0x39b   : > { %v3451_v32 = vpop.eup %3450 }
 0x39c   : > { %v1413_v34 = vmul.f32 %v3451_v32, %v3826_v40 }
 0x39e   : > { %v3453_v35 = vpop.eup %3452  ;;  %v3894_v39 = vmul.f32 %v3372_v26, %v1413_v34 }
 0x39f   : > { %v1383_v36 = vmul.f32 %v3453_v35, %v3832_v49 }
 0x3a1   : > { %v3892_v38 = vmul.f32 %v3371_v33, %v1383_v36  ;;  %v3093_v33 = vld [vmem:[%s4277_s1] sm:$0xff]  }
 0x3a2   : > { %v3455_v42 = vpop.eup %3454  ;;  %v3926_v34 = vunpack.c.l.bf16 %v3093_v33 }
 0x3a3   : > { %v1414_v45 = vmul.f32 %v3455_v42, %v3836_v52  ;;  %v1498_v46 = vpack.c.bf16 %v3894_v39, %v3892_v38 }
 0x3a5   : > { %v3899_v47 = vmul.f32 %v3372_v26, %v1414_v45  ;;  %1502 = vrot.lane.b32.xlu1 %v1498_v46, %s3550_s22  ;;  %v3929_v46 = vunpack.c.h.bf16 %v3093_v33 }
 0x3a7   : > { %v1499_v50 = vpack.c.bf16 %v3899_v47, %v3899_v47 }
 0x3a9   : > { %1504 = vrot.lane.b32.xlu1 %v1499_v50, %s3550_s22  ;;  %v962_v50 = vld [vmem:[%s4277_s1 + $0x8] sm:$0xf] }
 0x3c8   : > { %v1340_v57 = vpop.xlane.xlu0 %1339 }
 0x3c9   : > { %v1342_v62 = vmul.f32 0.0625, %v1340_v57 }
 0x3cb   : > { %v1343_v0 = vadd.f32 1e-06, %v1342_v62 }
 0x3cc   : > { %v1358_v58 = vpop.xlane.xlu0 %1357 }
 0x3cd   : > { %1354 = vadd.xlane.f32.xlu1 %v1353_v51  ;;  %v1360_v59 = vmul.f32 0.0625, %v1358_v58 }
 0x3cf   : > { %v1362_v63 = vadd.f32 1e-06, %v1360_v59 }
 0x3d1   : > { %3456 = vrsqrt.f32 %v1362_v63 }
 0x3d2   : > { %3458 = vrsqrt.f32 %v1343_v0 }
 0x3db   : > { %v3457_v11 = vpop.eup %3456 }
 0x3dc   : > { %v3459_v20 = vpop.eup %3458  ;;  %v1366_v21 = vmul.f32 %v3457_v11, %v3836_v52 }
 0x3dd   : > { %v1345_v23 = vmul.f32 %v3459_v20, %v3832_v49 }
 0x3de   : > { %v1372_v28 = vmul.f32 %v3913_v22, %v1366_v21  ;;  %v3375_v21 = vpop.permute.xlu0 %3374 }
 0x3df   : > { %v1350_v30 = vmul.f32 %v3917_v24, %v1345_v23  ;;  %v3377_v23 = vunpack.i.h.bf16 %v3375_v21 }
 0x3e0   : > { %v1428_v26 = vpack.c.bf16 %v1372_v28, %v1372_v28  ;;  %v1491_v59 = vmul.f32 %v1372_v28, %v3879_v18 }
 0x3e1   : > { %v1489_v4 = vmul.f32 %v3090_v13, %v1350_v30 }
 0x417   : > { %v1503_v53 = vpop.permute.xlu1 %1502 }
 0x418   : > { %3195 = vmatprep.mubr.msk.bf16.mxu1 %vm1337_vm2, %v1503_v53  ;;  %v3933_v53 = vunpack.c.l.bf16 %v962_v50 }
 0x41b   : > { %v1505_v56 = vpop.permute.xlu1 %1504 }
 0x41c   : > { %3196 = vmatmul.mubr.msk.bf16.vlgmr.msra.gmra.mrb[12].mxu1 %vm1337_vm2, %v1505_v56 }
 0x45a   : > { %v1355_v1 = vpop.xlane.xlu1 %1354 }
 0x45b   : > { %v1359_v2 = vmul.f32 0.0625, %v1355_v1 }
 0x45d   : > { %v1361_v3 = vadd.f32 1e-06, %v1359_v2 }
 0x45f   : > { %3460 = vrsqrt.f32 %v1361_v3 }
 0x469   : > { %v3461_v25 = vpop.eup %3460 }
 0x46a   : > { %v1365_v27 = vmul.f32 %v3461_v25, %v3826_v40  ;;  %v3376_v25 = vunpack.i.l.bf16 %v3375_v21 }
 0x46c   : > { %v1371_v31 = vmul.f32 %v3913_v22, %v1365_v27  ;;  %v1572_v28 = vmul.f32 %v3376_v25, %v3892_v38 }
 0x46e   : > { %v1427_v32 = vpack.c.bf16 %v1371_v31, %v1350_v30  ;;  %v1490_v5 = vmul.f32 %v3091_v14, %v1371_v31 }
 0x470   : > { %3189 = vmatprep.mubr.msk.bf16.mxu0 %vm1337_vm2, %v1427_v32  ;;  %v1573_v32 = vmul.f32 %v3377_v23, %v3894_v39  ;;  %v3383_v23 = vpack.i.bf16 %v3913_v22, %v3917_v24 }
 0x471   : > { %3190 = vmatmul.mubr.msk.bf16.vlgmr.msra.gmra.mrb[4].mxu0 %vm1337_vm2, %v1428_v26  ;;  %v1568_v26 = vpop.permute.xlu0 %1567 }
 0x472   : > { %v1574_v14 = vmul.f32 %v1568_v26, %v3899_v47 }
 0x4ef   : > { %v3197_v35 = vpop.f32.mrb[12].mxu1 }
 0x4f0   : > { %v1546_v36 = vpop.f32.mrb[13].mxu1  ;;  %v1577_v57 = vmul.f32 %v3197_v35, %v3933_v53 }
 0x4f1   : > { %v1575_v42 = vmul.f32 %v3926_v34, %v1546_v36  ;;  %v3198_v45 = vpop.f32.mrb[14].mxu1 }
 0x4f2   : > { %v1549_v51 = vpop.f32.mrb[15].mxu1 }
 0x4f3   : > { %1581 = vrot.lane.b32.xlu1 %v1575_v42, %s3551_s23  ;;  %v1576_v56 = vmul.f32 %v3929_v46, %v1549_v51 }
 0x4f7   : > { %1583 = vrot.lane.b32.xlu1 %v1576_v56, %s3551_s23 }
 0x4fb   : > { %1585 = vrot.lane.b32.xlu1 %v1577_v57, %s3551_s23 }
 0x544   : > { %v3191_v58 = vpop.f32.mrb[4].mxu0 }
 0x545   : > { %v1494_v62 = vmul.f32 %v3191_v58, %v3933_v53  ;;  %v1475_v63 = vpop.f32.mrb[5].mxu0 }
 0x546   : > { %v1492_v0 = vmul.f32 %v3926_v34, %v1475_v63  ;;  %v3192_v1 = vpop.f32.mrb[6].mxu0 }
 0x547   : > { %v1497_v2 = vadd.f32 %v1494_v62, %v1491_v59  ;;  %v1478_v3 = vpop.f32.mrb[7].mxu0 }
 0x548   : > { %v1493_v10 = vmul.f32 %v3929_v46, %v1478_v3  ;;  %v1495_v11 = vadd.f32 %v1492_v0, %v1489_v4 }
 0x54a   : > { %v1496_v17 = vadd.f32 %v1493_v10, %v1490_v5 }
 0x54c   : > { %v1593_v20 = vpack.c.bf16 %v1496_v17, %v1495_v11 }
 0x54e   : > { %3203 = vmatprep.mubr.msk.bf16.mxu0 %vm1337_vm2, %v1593_v20 }
 0x565   : > { %v1582_v27 = vpop.permute.xlu1 %1581 }
 0x566   : > { %v1590_v30 = vadd.f32 %v1582_v27, %v1572_v28 }
 0x569   : > { %v1584_v13 = vpop.permute.xlu1 %1583 }
 0x56a   : > { %v1591_v12 = vadd.f32 %v1584_v13, %v1573_v32 }
 0x56c   : > { %v1595_v31 = vpack.c.bf16 %v1591_v12, %v1590_v30 }
 0x56d   : > { %v1586_v33 = vpop.permute.xlu1 %1585 }
 0x56e   : > { %v1592_v35 = vadd.f32 %v1586_v33, %v1574_v14  ;;  %1599 = vrot.lane.b32.xlu0 %v1595_v31, %s3550_s22 }
 0x570   : > { %v1596_v36 = vpack.c.bf16 %v1592_v35, %v1592_v35 }
 0x572   : > { %1601 = vrot.lane.b32.xlu1 %v1596_v36, %s3550_s22  ;;  %1808 = vrot.lane.b32.xlu0 %v3840_v54, %s3553_s2 }
 0x576   : > { %1822 = vrot.lane.b32.xlu1 %v3830_v48, %s3553_s2  ;;  %1824 = vrot.lane.b32.xlu0 %v3846_v55, %s3553_s2 }
 0x57a   : > { %1767 = vrot.lane.b32.xlu1 %v3840_v54, %s3554_s15  ;;  %1782 = vrot.lane.b32.xlu0 %v3830_v48, %s3554_s15  ;;  %v1594_v54 = vpack.c.bf16 %v1497_v2, %v1497_v2 }
 0x57e   : > { %1784 = vrot.lane.b32.xlu1 %v3846_v55, %s3554_s15 }
 0x5e0   : > { %v1600_v38 = vpop.permute.xlu0 %1599 }
 0x5e1   : > { %v1610_v39 = vsel %vm1337_vm2, %v1600_v38, 0  ;;  %3315 = vmatprep.subr.msk.bf16.mxu0 %vm1337_vm2, %v1600_v38 }
 0x5e2   : > { %3200 = vmatpush3.bf16.xpose.msra.mxu0 %v1610_v39 }
 0x5e4   : > { %v1602_v47 = vpop.permute.xlu1 %1601  ;;  %v1809_v48 = vpop.permute.xlu0 %1808 }
 0x5e5   : > { %3316 = vmatprep.subr.msk.bf16.mxu0 %vm1337_vm2, %v1602_v47  ;;  %v1613_v42 = vsel %vm1337_vm2, %v1602_v47, 0  ;;  %v1811_v4 = vsel %vm1337_vm2, %v1809_v48, 0.0 }
 0x5e8   : > { %v1825_v62 = vpop.permute.xlu0 %1824  ;;  %v1823_v1 = vpop.permute.xlu1 %1822 }
 0x5e9   : > { %v1831_v2 = vsel %vm1337_vm2, %v1825_v62, 0.0  ;;  %v1828_v11 = vsel %vm1337_vm2, %v1823_v1, 0.0 }
 0x5ea   : > { %3202 = vmatpush3.bf16.xpose.msra.mxu0 %v1613_v42 }
 0x5eb   : > { %3221 = vmatprep.subr.bf16.mxu0 %v3884_v19 }
 0x5ec   : > { %v1783_v3 = vpop.permute.xlu0 %1782  ;;  %v1768_v10 = vpop.permute.xlu1 %1767 }
 0x5ed   : > { %v1788_v5 = vsel %vm1337_vm2, %v1783_v3, 0.0  ;;  %v1770_v17 = vsel %vm1337_vm2, %v1768_v10, 0.0 }
 0x5f0   : > { %v1785_v20 = vpop.permute.xlu1 %1784 }
 0x5f1   : > { %3204 = vmatmul.mubr.msk.bf16.vlgmr.msra.gmra.mrb[8].mxu0 %vm1337_vm2, %v1594_v54  ;;  %v1791_v21 = vsel %vm1337_vm2, %v1785_v20, 0.0 }
 0x5f2   : > { %3222 = vmatpush3.bf16.msra.mxu0 %v3884_v19 }
 0x6c4   : > { %v3205_v55 = vpop.f32.mrb[8].mxu0 }
 0x6c5   : > { %v1649_v45 = vpop.f32.mrb[9].mxu0  ;;  %v1665_v57 = vmul.f32 0.25, %v3205_v55 }
 0x6c6   : > { %v1663_v50 = vmul.f32 0.25, %v1649_v45  ;;  %v3206_v51 = vpop.f32.mrb[10].mxu0 }
 0x6c7   : > { %v1652_v56 = vpop.f32.mrb[11].mxu0  ;;  %v1673_v0 = vsel %vm1666_vm3, %v1665_v57, -inf }
 0x6c8   : > { %v1664_v58 = vmul.f32 0.25, %v1652_v56  ;;  %v1667_v59 = vsel %vm1666_vm3, %v1663_v50, -inf }
 0x6c9   : > { %1668 = vmax.xlane.f32.xlu0 %v1667_v59 }
 0x6ca   : > { %v1670_v63 = vsel %vm1666_vm3, %v1664_v58, -inf }
 0x6cb   : > { %1671 = vmax.xlane.f32.xlu1 %v1670_v63 }
 0x6cd   : > { %1674 = vmax.xlane.f32.xlu0 %v1673_v0 }
 0x6cf   : > { %1832 = vadd.xlane.f32.xlu1 %v1831_v2 }
 0x6d1   : > { %1812 = vadd.xlane.f32.xlu0 %v1811_v4 }
 0x6d3   : > { %1789 = vadd.xlane.f32.xlu1 %v1788_v5 }
 0x6d5   : > { %1829 = vadd.xlane.f32.xlu0 %v1828_v11 }
 0x6d9   : > { %1771 = vadd.xlane.f32.xlu0 %v1770_v17 }
 0x6dd   : > { %1792 = vadd.xlane.f32.xlu0 %v1791_v21 }
 0x6e4   : > { %3379 = vrot.lane.b32.xlu1 %v3857_v7, %s3555_s16 }
 0x6f3   : > { %3384 = vrot.lane.b32.xlu0 %v3383_v23, %s3556_s18 }
 0x756   : > { %v1669_v25 = vpop.xlane.xlu0 %1668 }
 0x757   : > { %v1676_v28 = vsub.f32 %v1663_v50, %v1669_v25 }
 0x758   : > { %v1672_v27 = vpop.xlane.xlu1 %1671 }
 0x759   : > { %v1677_v32 = vsub.f32 %v1664_v58, %v1672_v27  ;;  %v1679_v12 = vmul.f32 1.442695, %v1676_v28 }
 0x75a   : > { %v1675_v26 = vpop.xlane.xlu0 %1674 }
 0x75b   : > { %v1681_v13 = vmul.f32 1.442695, %v1677_v32  ;;  %v1678_v30 = vsub.f32 %v1665_v57, %v1675_v26 }
 0x75c   : > { %v1833_v31 = vpop.xlane.xlu1 %1832 }
 0x75d   : > { %3462 = vpow2.f32 %v1681_v13  ;;  %v1683_v14 = vmul.f32 1.442695, %v1678_v30  ;;  %v1835_v36 = vmul.f32 0.0625, %v1833_v31 }
 0x75e   : > { %v1813_v33 = vpop.xlane.xlu0 %1812 }
 0x75f   : > { %3464 = vpow2.f32 %v1683_v14  ;;  %v1814_v35 = vmul.f32 0.0625, %v1813_v33  ;;  %v1837_v50 = vadd.f32 1e-06, %v1835_v36  ;;  %v4011_v14 = vpack.c.bf16 %v3826_v40, %v3832_v49 }
 0x760   : > { %3466 = vpow2.f32 %v1679_v12  ;;  %v1790_v22 = vpop.xlane.xlu1 %1789  ;;  %v4033_v36 = vpack.c.bf16 %v3836_v52, %v3836_v52 }
 0x761   : > { %v1794_v39 = vmul.f32 0.0625, %v1790_v22  ;;  %v1815_v54 = vadd.f32 1e-06, %v1814_v35 }
 0x762   : > { %v1830_v7 = vpop.xlane.xlu0 %1829 }
 0x763   : > { %v1834_v24 = vmul.f32 0.0625, %v1830_v7  ;;  %v1796_v56 = vadd.f32 1e-06, %v1794_v39 }
 0x764   : > { %v3380_v3 = vpop.permute.xlu1 %3379 }
 0x765   : > { %v1836_v38 = vadd.f32 1e-06, %v1834_v24  ;;  %v3382_v20 = vunpack.i.h.bf16 %v3380_v3  ;;  %v3381_v21 = vunpack.i.l.bf16 %v3380_v3 }
 0x766   : > { %v1772_v47 = vpop.xlane.xlu0 %1771 }
 0x767   : > { %v3986_v42 = vpop.eup %3462  ;;  %v1773_v48 = vmul.f32 0.0625, %v1772_v47  ;;  %3468 = vrsqrt.f32 %v1836_v38 }
 0x768   : > { %v1688_v55 = vsel %vm1666_vm3, %v3986_v42, 0.0  ;;  %3470 = vrsqrt.f32 %v1815_v54 }
 0x769   : > { %v3990_v45 = vpop.eup %3464  ;;  %v1774_v51 = vadd.f32 1e-06, %v1773_v48  ;;  %1689 = vadd.xlane.f32.xlu0 %v1688_v55 }
 0x76a   : > { %v1793_v57 = vpop.xlane.xlu0 %1792  ;;  %v1691_v58 = vsel %vm1666_vm3, %v3990_v45, 0.0  ;;  %v3994_v59 = vpop.eup %3466 }
 0x76b   : > { %1692 = vadd.xlane.f32.xlu1 %v1691_v58  ;;  %3472 = vrsqrt.f32 %v1774_v51  ;;  %v1795_v62 = vmul.f32 0.0625, %v1793_v57  ;;  %v1685_v63 = vsel %vm1666_vm3, %v3994_v59, 0.0 }
 0x76c   : > { %3474 = vrsqrt.f32 %v1837_v50 }
 0x76d   : > { %3476 = vrsqrt.f32 %v1796_v56  ;;  %v1797_v0 = vadd.f32 1e-06, %v1795_v62 }
 0x76e   : > { %v3385_v23 = vpop.permute.xlu0 %3384 }
 0x76f   : > { %1686 = vadd.xlane.f32.xlu1 %v1685_v63  ;;  %3478 = vrsqrt.f32 %v1797_v0  ;;  %v3386_v27 = vunpack.i.l.bf16 %v3385_v23  ;;  %v3387_v26 = vunpack.i.h.bf16 %v3385_v23 }
 0x771   : > { %v3469_v1 = vpop.eup %3468 }
 0x772   : > { %v3471_v2 = vpop.eup %3470  ;;  %v1840_v5 = vmul.f32 %v3469_v1, %v3826_v40 }
 0x773   : > { %v1817_v17 = vmul.f32 %v3471_v2, %v3832_v49 }
 0x774   : > { %v4002_v32 = vmul.f32 %v3382_v20, %v1840_v5 }
 0x775   : > { %v3473_v4 = vpop.eup %3472  ;;  %v4005_v30 = vmul.f32 %v3381_v21, %v1817_v17 }
 0x776   : > { %v3475_v10 = vpop.eup %3474  ;;  %v1776_v25 = vmul.f32 %v3473_v4, %v3832_v49 }
 0x777   : > { %v3477_v11 = vpop.eup %3476  ;;  %v1841_v28 = vmul.f32 %v3475_v10, %v3836_v52  ;;  %v1939_v33 = vpack.c.bf16 %v4002_v32, %v4005_v30 }
 0x778   : > { %v1800_v13 = vmul.f32 %v3477_v11, %v3826_v40  ;;  %v4007_v12 = vmul.f32 %v3386_v27, %v1776_v25 }
 0x779   : > { %v4013_v31 = vmul.f32 %v3382_v20, %v1841_v28  ;;  %v3479_v7 = vpop.eup %3478 }
 0x77a   : > { %v4017_v35 = vmul.f32 %v3387_v26, %v1800_v13  ;;  %v1801_v24 = vmul.f32 %v3479_v7, %v3836_v52 }
 0x77b   : > { %v1940_v40 = vpack.c.bf16 %v4013_v31, %v4013_v31 }
 0x77c   : > { %v1847_v22 = vpack.c.bf16 %v4017_v35, %v4007_v12  ;;  %v4029_v49 = vmul.f32 %v3387_v26, %v1801_v24 }
 0x77e   : > { %v1848_v38 = vpack.c.bf16 %v4029_v49, %v4029_v49 }
 0x77f   : > { %1704 = vrot.lane.b32.xlu0 %v4011_v14, %s3552_s26 }
 0x780   : > { %1943 = vrot.lane.b32.xlu1 %v1939_v33, %s3553_s2 }
 0x783   : > { %1851 = vrot.lane.b32.xlu0 %v1847_v22, %s3554_s15 }
 0x784   : > { %1945 = vrot.lane.b32.xlu1 %v1940_v40, %s3553_s2 }
 0x787   : > { %3389 = vrot.lane.b32.xlu0 %v3874_v15, %s3555_s16 }
 0x788   : > { %1706 = vrot.lane.b32.xlu1 %v4033_v36, %s3552_s26 }
 0x78c   : > { %1853 = vrot.lane.b32.xlu1 %v1848_v38, %s3554_s15 }
 0x7f6   : > { %v1690_v39 = vpop.xlane.xlu0 %1689 }
 0x7f8   : > { %v1693_v47 = vpop.xlane.xlu1 %1692 }
 0x7f9   : > { %3480 = vrcp.f32 %v1693_v47 }
 0x7fa   : > { %v1705_v54 = vpop.permute.xlu0 %1704  ;;  %3482 = vrcp.f32 %v1690_v39 }
 0x7fb   : > { %3207 = vmatprep.subr.bf16.mxu1 %v1705_v54 }
 0x7fc   : > { %3208 = vmatpush3.bf16.msra.mxu1 %v1705_v54  ;;  %v1687_v52 = vpop.xlane.xlu1 %1686 }
 0x7fd   : > { %3484 = vrcp.f32 %v1687_v52 }
 0x7fe   : > { %v1852_v3 = vpop.permute.xlu0 %1851 }
 0x800   : > { %v1944_v48 = vpop.permute.xlu1 %1943 }
 0x801   : > { %3223 = vmatprep.mubr.msk.bf16.mxu0 %vm1337_vm2, %v1944_v48 }
 0x803   : > { %v3481_v55 = vpop.eup %3480 }
 0x804   : > { %v1946_v50 = vpop.permute.xlu1 %1945  ;;  %v3483_v51 = vpop.eup %3482  ;;  %v1699_v57 = vmul.f32 %v3481_v55, %v3990_v45 }
 0x805   : > { %3224 = vmatmul.mubr.msk.bf16.vlgmr.msra.gmra.mrb[12].mxu0 %vm1337_vm2, %v1946_v50  ;;  %v1698_v63 = vmul.f32 %v3483_v51, %v3986_v42 }
 0x806   : > { %v1701_v2 = vpack.c.bf16 %v1699_v57, %v1699_v57 }
 0x807   : > { %v3485_v56 = vpop.eup %3484 }
 0x808   : > { %v1707_v58 = vpop.permute.xlu1 %1706  ;;  %v1697_v62 = vmul.f32 %v3485_v56, %v3994_v59 }
 0x809   : > { %v1717_v0 = vsel %vm1715_vm4, %v1707_v58, 0  ;;  %3317 = vmatprep.subr.msk.bf16.mxu1 %vm1715_vm4, %v1707_v58 }
 0x80a   : > { %3210 = vmatpush3.bf16.msra.mxu1 %v1717_v0  ;;  %v1700_v1 = vpack.c.bf16 %v1698_v63, %v1697_v62 }
 0x80b   : > { %3215 = vmatprep.subr.bf16.mxu1 %v3884_v19 }
 0x80c   : > { %3211 = vmatprep.mubr.msk.bf16.mxu1 %vm1666_vm3, %v1700_v1  ;;  %v1854_v45 = vpop.permute.xlu1 %1853 }
 0x80d   : > { %3212 = vmatmul.mubr.msk.bf16.vlgmr.msra.gmra.mrb[16].mxu1 %vm1666_vm3, %v1701_v2 }
 0x80e   : > { %3216 = vmatpush3.bf16.msra.mxu1 %v3884_v19  ;;  %3217 = vmatprep.mubr.msk.bf16.mxu1 %vm1337_vm2, %v1852_v3 }
 0x815   : > { %3218 = vmatmul.mubr.msk.bf16.vlgmr.msra.gmra.mrb[20].mxu1 %vm1337_vm2, %v1854_v45 }
 0x8d8   : > { %v3225_v42 = vpop.f32.mrb[12].mxu0 }
 0x8d9   : > { %v1987_v59 = vpop.f32.mrb[13].mxu0  ;;  %v2015_v17 = vmul.f32 %v3225_v42, %v3933_v53 }
 0x8da   : > { %v2013_v4 = vmul.f32 %v3926_v34, %v1987_v59  ;;  %v3226_v5 = vpop.f32.mrb[14].mxu0 }
 0x8db   : > { %v1990_v10 = vpop.f32.mrb[15].mxu0 }
 0x8dc   : > { %v2014_v11 = vmul.f32 %v3929_v46, %v1990_v10  ;;  %2019 = vrot.lane.b32.xlu1 %v2013_v4, %s3555_s16 }
 0x8de   : > { %2021 = vrot.lane.b32.xlu0 %v2014_v11, %s3555_s16 }
 0x8e0   : > { %2005 = vrot.lane.b32.xlu1 %v3879_v18, %s3555_s16  ;;  %v4062_v19 = vpop.f32.mrb[16].mxu1 }
 0x8e1   : > { %v4064_v20 = vpop.f32.mrb[17].mxu1 }
 0x8e2   : > { %2023 = vrot.lane.b32.xlu0 %v2015_v17, %s3555_s16  ;;  %v3214_v21 = vpop.f32.mrb[18].mxu1 }
 0x8e3   : > { %v4067_v23 = vpop.f32.mrb[19].mxu1 }
 0x8e4   : > { %3394 = vrot.lane.b32.xlu1 %v3874_v15, %s3556_s18  ;;  %v3390_v15 = vpop.permute.xlu0 %3389 }
 0x8e5   : > { %v3392_v22 = vunpack.i.h.bf16 %v3390_v15  ;;  %v3391_v24 = vunpack.i.l.bf16 %v3390_v15 }
 0x8e6   : > { %1913 = vrot.lane.b32.xlu0 %v3879_v18, %s3556_s18 }
 0x8e7   : > { %v2010_v40 = vmul.f32 %v3391_v24, %v4005_v30 }
 0x8e8   : > { %v3219_v25 = vpop.f32.mrb[20].mxu1 }
 0x8e9   : > { %v1895_v27 = vpop.f32.mrb[21].mxu1  ;;  %v1923_v7 = vmul.f32 %v3219_v25, %v3933_v53 }
 0x8ea   : > { %v1921_v28 = vmul.f32 %v3926_v34, %v1895_v27  ;;  %v3220_v26 = vpop.f32.mrb[22].mxu1  ;;  %v2011_v34 = vmul.f32 %v3392_v22, %v4002_v32 }
 0x8eb   : > { %v1898_v13 = vpop.f32.mrb[23].mxu1 }
 0x8ec   : > { %v1922_v33 = vmul.f32 %v3929_v46, %v1898_v13  ;;  %1927 = vrot.lane.b32.xlu1 %v1921_v28, %s3556_s18 }
 0x8ee   : > { %1929 = vrot.lane.b32.xlu0 %v1922_v33, %s3556_s18 }
 0x8f0   : > { %1931 = vrot.lane.b32.xlu1 %v1923_v7, %s3556_s18 }
 0x94e   : > { %v2020_v18 = vpop.permute.xlu1 %2019 }
 0x94f   : > { %v2028_v39 = vadd.f32 %v2020_v18, %v2010_v40 }
 0x950   : > { %v2022_v38 = vpop.permute.xlu0 %2021 }
 0x951   : > { %v2029_v47 = vadd.f32 %v2022_v38, %v2011_v34 }
 0x952   : > { %v2006_v46 = vpop.permute.xlu1 %2005 }
 0x953   : > { %v2033_v54 = vpack.c.bf16 %v2029_v47, %v2028_v39  ;;  %v2012_v52 = vmul.f32 %v2006_v46, %v4013_v31 }
 0x954   : > { %v2024_v53 = vpop.permute.xlu0 %2023 }
 0x955   : > { %v2030_v48 = vadd.f32 %v2024_v53, %v2012_v52  ;;  %2043 = vrot.lane.b32.xlu0 %v2033_v54, %s3553_s2 }
 0x956   : > { %v3395_v50 = vpop.permute.xlu1 %3394 }
 0x957   : > { %v2034_v55 = vpack.c.bf16 %v2030_v48, %v2030_v48  ;;  %v3397_v51 = vunpack.i.h.bf16 %v3395_v50  ;;  %v3396_v56 = vunpack.i.l.bf16 %v3395_v50 }
 0x958   : > { %v1914_v30 = vpop.permute.xlu0 %1913 }
 0x959   : > { %2045 = vrot.lane.b32.xlu1 %v2034_v55, %s3553_s2  ;;  %v1918_v32 = vmul.f32 %v3396_v56, %v4007_v12  ;;  %v1919_v58 = vmul.f32 %v3397_v51, %v4017_v35  ;;  %v1920_v63 = vmul.f32 %v1914_v30, %v4029_v49  ;;  %s4279_s2 = sld [smem:[#allocation6_spill]] }
 0x95e   : > { %v1928_v57 = vpop.permute.xlu1 %1927 }
 0x95f   : > { %v1936_v31 = vadd.f32 %v1928_v57, %v1918_v32 }
 0x960   : > { %v1930_v62 = vpop.permute.xlu0 %1929 }
 0x961   : > { %v1937_v0 = vadd.f32 %v1930_v62, %v1919_v58 }
 0x962   : > { %v1932_v1 = vpop.permute.xlu1 %1931 }
 0x963   : > { %v2031_v2 = vpack.c.bf16 %v1937_v0, %v1936_v31  ;;  %v1938_v3 = vadd.f32 %v1932_v1, %v1920_v63  ;;  %v3416_v0 = vld [vmem:[%s4278_s28] sm:$0xff]  }
 0x964   : > { %v3417_v1 = vld [vmem:[%s4279_s2] sm:$0xff]  }
 0x965   : > { %v2032_v45 = vpack.c.bf16 %v1938_v3, %v1938_v3  ;;  %2037 = vrot.lane.b32.xlu0 %v2031_v2, %s3554_s15  ;;  %v3418_v2 = vld [vmem:[%s4278_s28 + $0x8] sm:$0xff]  }
 0x966   : > { %v3419_v3 = vld [vmem:[%s4279_s2 + $0x8] sm:$0xff]  }
 0x967   : > { %2039 = vrot.lane.b32.xlu1 %v2032_v45, %s3554_s15  ;;  %s4280_s15 = sld [smem:[#allocation5_spill]] }
 0x9c7   : > { %v2044_v42 = vpop.permute.xlu0 %2043 }
 0x9c8   : > { %v2054_v59 = vsel %vm1337_vm2, %v2044_v42, 0  ;;  %3318 = vmatprep.subr.msk.bf16.mxu1 %vm1337_vm2, %v2044_v42 }
 0x9c9   : > { %3228 = vmatpush3.bf16.xpose.msra.mxu1 %v2054_v59 }
 0x9cb   : > { %v2046_v12 = vpop.permute.xlu1 %2045 }
 0x9cc   : > { %3319 = vmatprep.subr.msk.bf16.mxu1 %vm1337_vm2, %v2046_v12  ;;  %v2057_v35 = vsel %vm1337_vm2, %v2046_v12, 0 }
 0x9d1   : > { %3230 = vmatpush3.bf16.xpose.msra.mxu1 %v2057_v35 }
 0x9d2   : > { %3251 = vmatprep.subr.bf16.mxu1 %v3548_v37 }
 0x9d7   : > { %v2038_v49 = vpop.permute.xlu0 %2037 }
 0x9d8   : > { %3231 = vmatprep.mubr.msk.bf16.mxu1 %vm1337_vm2, %v2038_v49 }
 0x9d9   : > { %v2040_v4 = vpop.permute.xlu1 %2039 }
 0x9da   : > { %3232 = vmatmul.mubr.msk.bf16.vlgmr.msra.gmra.mrb[24].mxu1 %vm1337_vm2, %v2040_v4 }
 0x9db   : > { %3255 = vmatprep.mubr.msk.bf16.mxu1 %vm3549_vm1, %v3548_v37  ;;  %3252 = vmatpush3.bf16.msra.mxu1 %v3416_v0 }
 0x9dc   : > { %3253 = vmatprep.subr.bf16.mxu1 %v3548_v37 }
 0x9df   : > { %3254 = vmatpush3.bf16.msra.mxu1 %v3418_v2 }
 0x9e0   : > { %3267 = vmatprep.subr.bf16.mxu1 %v3548_v37 }
 0xaad   : > { %v3233_v5 = vpop.f32.mrb[24].mxu1 }
 0xaae   : > { %v2093_v10 = vpop.f32.mrb[25].mxu1  ;;  %v2109_v25 = vmul.f32 0.25, %v3233_v5 }
 0xaaf   : > { %v2107_v11 = vmul.f32 0.25, %v2093_v10  ;;  %v3234_v17 = vpop.f32.mrb[26].mxu1 }
 0xab0   : > { %v2096_v21 = vpop.f32.mrb[27].mxu1  ;;  %v2116_v13 = vsel %vm1666_vm3, %v2109_v25, -inf }
 0xab1   : > { %v2108_v27 = vmul.f32 0.25, %v2096_v21  ;;  %v2110_v28 = vsel %vm1666_vm3, %v2107_v11, -inf }
 0xab2   : > { %2111 = vmax.xlane.f32.xlu0 %v2110_v28 }
 0xab3   : > { %v2113_v26 = vsel %vm1666_vm3, %v2108_v27, -inf }
 0xab4   : > { %2114 = vmax.xlane.f32.xlu1 %v2113_v26 }
 0xab6   : > { %2117 = vmax.xlane.f32.xlu0 %v2116_v13 }
 0xb3f   : > { %v2112_v33 = vpop.xlane.xlu0 %2111 }
 0xb40   : > { %v2119_v7 = vsub.f32 %v2107_v11, %v2112_v33 }
 0xb41   : > { %v2115_v15 = vpop.xlane.xlu1 %2114 }
 0xb42   : > { %v2122_v22 = vmul.f32 1.442695, %v2119_v7  ;;  %v2120_v24 = vsub.f32 %v2108_v27, %v2115_v15 }
 0xb43   : > { %v2118_v18 = vpop.xlane.xlu0 %2117 }
 0xb44   : > { %3486 = vpow2.f32 %v2122_v22  ;;  %v2124_v40 = vmul.f32 1.442695, %v2120_v24  ;;  %v2121_v34 = vsub.f32 %v2109_v25, %v2118_v18 }
 0xb46   : > { %3488 = vpow2.f32 %v2124_v40  ;;  %v2126_v38 = vmul.f32 1.442695, %v2121_v34 }
 0xb48   : > { %3490 = vpow2.f32 %v2126_v38 }
 0xb4e   : > { %v3487_v39 = vpop.eup %3486 }
 0xb4f   : > { %v2128_v47 = vsel %vm1666_vm3, %v3487_v39, 0.0 }
 0xb50   : > { %v3489_v46 = vpop.eup %3488  ;;  %2129 = vadd.xlane.f32.xlu0 %v2128_v47 }
 0xb51   : > { %v2131_v53 = vsel %vm1666_vm3, %v3489_v46, 0.0 }
 0xb52   : > { %v3491_v54 = vpop.eup %3490 }
 0xb53   : > { %v2134_v52 = vsel %vm1666_vm3, %v3491_v54, 0.0 }
 0xb54   : > { %2135 = vadd.xlane.f32.xlu1 %v2134_v52  ;;  %2132 = vadd.xlane.f32.xlu0 %v2131_v53 }
 0xb65   : > { %2147 = vrot.lane.b32.xlu1 %v4033_v36, %s3555_s16 }
 0xb6a   : > { %2145 = vrot.lane.b32.xlu0 %v4011_v14, %s3555_s16  ;;  %s4281_s16 = sld [smem:[#allocation7_spill]] }
 0xbdd   : > { %v2130_v48 = vpop.xlane.xlu0 %2129 }
 0xbde   : > { %3492 = vrcp.f32 %v2130_v48 }
 0xbe1   : > { %v2133_v55 = vpop.xlane.xlu0 %2132  ;;  %v2136_v50 = vpop.xlane.xlu1 %2135 }
 0xbe2   : > { %3494 = vrcp.f32 %v2133_v55 }
 0xbe3   : > { %3496 = vrcp.f32 %v2136_v50 }
 0xbe5   : > { %v2146_v51 = vpop.permute.xlu0 %2145  ;;  %v2148_v56 = vpop.permute.xlu1 %2147 }
 0xbe6   : > { %3235 = vmatprep.subr.bf16.mxu0 %v2146_v51  ;;  %v2157_v57 = vsel %vm1715_vm4, %v2148_v56, 0 }
 0xbe7   : > { %3236 = vmatpush3.bf16.msra.mxu0 %v2146_v51 }
 0xbe8   : > { %3320 = vmatprep.subr.msk.bf16.mxu0 %vm1715_vm4, %v2148_v56  ;;  %v3493_v30 = vpop.eup %3492 }
 0xbe9   : > { %v2140_v32 = vmul.f32 %v3493_v30, %v3487_v39 }
 0xbeb   : > { %3238 = vmatpush3.bf16.msra.mxu0 %v2157_v57 }
 0xbec   : > { %v3495_v36 = vpop.eup %3494  ;;  %3243 = vmatprep.subr.bf16.mxu0 %v3548_v37 }
 0xbed   : > { %v3497_v14 = vpop.eup %3496  ;;  %v2141_v58 = vmul.f32 %v3495_v36, %v3489_v46  ;;  %v2227_v46 = vld [vmem:[%s4281_s16] sm:$0x1]  ;;  %s4285_s16 = sld [smem:[#allocation9_spill]] }
 0xbee   : > { %v2142_v62 = vmul.f32 %v3497_v14, %v3491_v54  ;;  %v1029_v54 = vsub.s32 4, %v3782_v41  ;;  %v2228_v52 = vunpack.c.l.bf16 %v2227_v46 }
 0xbef   : > { %v2143_v63 = vpack.c.bf16 %v2141_v58, %v2140_v32 }
 0xbf0   : > { %v2144_v31 = vpack.c.bf16 %v2142_v62, %v2142_v62  ;;  %v1030_v53 = vrot.slane %v3785_v43, %v1029_v54  ;;  %v2232_v48 = vrot.slane %v2228_v52, %v3788_v44 }
 0xbf1   : > { %3239 = vmatprep.mubr.msk.bf16.mxu0 %vm1666_vm3, %v2143_v63 }
 0xbf2   : > { %3240 = vmatmul.mubr.msk.bf16.vlgmr.msra.gmra.mrb[16].mxu0 %vm1666_vm3, %v2144_v31  ;;  %v1114_v55 = vadd.f32 %v3820_v29, %v1030_v53 }
 0xbf3   : > { %3247 = vmatprep.mubr.msk.bf16.mxu0 %vm3549_vm1, %v3548_v37  ;;  %3244 = vmatpush3.bf16.msra.mxu0 %v3417_v1 }
 0xbf4   : > { %3245 = vmatprep.subr.bf16.mxu0 %v3548_v37  ;;  %v4151_v51 = vrot.slane %v1114_v55, %v3788_v44 }
 0xbf7   : > { %3246 = vmatpush3.bf16.msra.mxu0 %v3419_v3 }
 0xbf8   : > { %3259 = vmatprep.subr.bf16.mxu0 %v3548_v37 }
 0xcc5   : > { %v3241_v45 = vpop.f32.mrb[16].mxu0 }
 0xcc6   : > { %v2193_v42 = vpop.f32.mrb[17].mxu0 }
 0xcc7   : > { %v3242_v59 = vpop.f32.mrb[18].mxu0 }
 0xcc8   : > { %v2196_v12 = vpop.f32.mrb[19].mxu0 }
 0xcc9   : > { %v3398_v35 = vpack.i.bf16 %v3241_v45, %v2196_v12 }
 0xccb   : > { %3399 = vrot.lane.b32.xlu1 %v3398_v35, %s3556_s18  ;;  %v2645_v35 = vadd.f32 1.0, %v1114_v55  ;;  %v3426_v55 = vld [vmem:[%s3695_s21] sm:$0xff]  }
 0xccf   : > { %2210 = vrot.lane.b32.xlu1 %v2193_v42, %s3556_s18  ;;  %s4282_s18 = sld [smem:[#allocation8_spill]] }
 0xd3d   : > { %v3400_v49 = vpop.permute.xlu1 %3399 }
 0xd3e   : > { %v3402_v4 = vunpack.i.h.bf16 %v3400_v49  ;;  %v3401_v5 = vunpack.i.l.bf16 %v3400_v49  ;;  %v2649_v49 = vrot.slane %v2645_v35, %v3788_v44 }
 0xd40   : > { %v2221_v10 = vsel %vm1337_vm2, %v4062_v19, %v3402_v4  ;;  %v2220_v11 = vsel %vm1337_vm2, %v4067_v23, %v3401_v5  ;;  %v2293_v19 = vld [vmem:[%s4280_s15] sm:$0x1]  ;;  %v3421_v5 = vld [vmem:[%s4282_s18 + $0x8] sm:$0xff]   ;;  %s4284_s15 = sld [smem:[#allocation10_spill]] }
 0xd41   : > { %v2288_v17 = vpack.c.bf16 %v2221_v10, %v2220_v11  ;;  %v2211_v21 = vpop.permute.xlu1 %2210  ;;  %v2294_v28 = vunpack.c.l.bf16 %v2293_v19  ;;  %v3420_v4 = vld [vmem:[%s4282_s18] sm:$0xff]  }
 0xd42   : > { %v2219_v25 = vsel %vm1337_vm2, %v4064_v20, %v2211_v21 }
 0xd43   : > { %v2222_v27 = vpack.c.bf16 %v2219_v25, %v2219_v25  ;;  %3256 = vmatmul.mubr.msk.bf16.vlgmr.msra.gmra.mrb[28].mxu1 %vm1034_vm0, %v2288_v17  ;;  %v2298_v23 = vrot.slane %v2294_v28, %v3788_v44 }
 0xd44   : > { %3283 = vmatprep.mubr.msk.bf16.mxu1 %vm3549_vm1, %v3548_v37 }
 0xd45   : > { %3248 = vmatmul.mubr.msk.bf16.vlgmr.msra.gmra.mrb[20].mxu0 %vm1034_vm0, %v2222_v27 }
 0xd46   : > { %3263 = vmatprep.mubr.msk.bf16.mxu0 %vm3549_vm1, %v3548_v37  ;;  %3260 = vmatpush3.bf16.msra.mxu0 %v3420_v4  ;;  %v3424_v53 = vld [vmem:[%s4284_s15] sm:$0xff]  }
 0xd47   : > { %3261 = vmatprep.subr.bf16.mxu0 %v3548_v37  ;;  %3268 = vmatpush3.bf16.msra.mxu1 %v3424_v53 }
 0xd48   : > { %3269 = vmatprep.subr.bf16.mxu1 %v3548_v37 }
 0xd4a   : > { %3262 = vmatpush3.bf16.msra.mxu0 %v3421_v5 }
 0xd4b   : > { %3287 = vmatprep.subr.bf16.mxu0 %v3548_v37 }
 0xe16   : > { %v2348_v26 = vpop.f32.mrb[28].mxu1 }
 0xe17   : > { %v2349_v13 = vadd.f32 %v2348_v26, %v2298_v23  ;;  %v3257_v33 = vpop.f32.mrb[29].mxu1 }
 0xe18   : > { %v2282_v20 = vpop.f32.mrb[20].mxu0  ;;  %v2351_v7 = vpop.f32.mrb[30].mxu1 }
 0xe19   : > { %v2352_v15 = vadd.f32 %v2351_v7, %v2298_v23  ;;  %v3249_v22 = vpop.f32.mrb[21].mxu0  ;;  %2357 = vrot.lane.b32.xlu0 %v2349_v13, %s3552_s26  ;;  %v3258_v24 = vpop.f32.mrb[31].mxu1  ;;  %v2283_v50 = vadd.f32 %v2282_v20, %v2232_v48  ;;  %v3425_v48 = vld [vmem:[%s4284_s15 + $0x8] sm:$0xff]  }
 0xe1a   : > { %v2285_v18 = vpop.f32.mrb[22].mxu0  ;;  %3270 = vmatpush3.bf16.msra.mxu1 %v3425_v48 }
 0xe1b   : > { %v3250_v40 = vpop.f32.mrb[23].mxu0  ;;  %2359 = vrot.lane.b32.xlu1 %v2352_v15, %s3552_s26  ;;  %v2630_v56 = vmul.f32 %v4151_v51, %v2283_v50  ;;  %3271 = vmatprep.subr.bf16.mxu1 %v3548_v37  ;;  %v3427_v50 = vld [vmem:[%s4284_s15 + $0x10] sm:$0xff]  }
 0xe1d   : > { %v4158_v41 = vadd.f32 %v2630_v56, %v3740_v9  ;;  %v3428_v56 = vld [vmem:[%s3695_s21 + $0x8] sm:$0xff]  }
 0xe1e   : > { %3272 = vmatpush3.bf16.msra.mxu1 %v3427_v50 }
 0xe1f   : > { %v2632_v32 = vsel %vm1034_vm0, %v4158_v41, 0.0  ;;  %3273 = vmatprep.subr.bf16.mxu1 %v3548_v37 }
 0xe8b   : > { %v2358_v34 = vpop.permute.xlu0 %2357 }
 0xe8c   : > { %v2363_v38 = vmul.f32 %v2358_v34, %v3813_v16 }
 0xe8d   : > { %v2360_v39 = vpop.permute.xlu1 %2359 }
 0xe8e   : > { %v2364_v47 = vmul.f32 %v2360_v39, %v3813_v16  ;;  %2367 = vrot.lane.b32.xlu0 %v2363_v38, %s3552_s26 }
 0xe90   : > { %2369 = vrot.lane.b32.xlu1 %v2364_v47, %s3552_s26 }
 0xf00   : > { %v2368_v30 = vpop.permute.xlu0 %2367 }
 0xf01   : > { %v4155_v57 = vadd.f32 %v3734_v6, %v2368_v30  ;;  %v3429_v30 = vld [vmem:[%s4284_s15 + $0x18] sm:$0xff]  }
 0xf02   : > { %v2370_v36 = vpop.permute.xlu1 %2369  ;;  %3274 = vmatpush3.bf16.msra.mxu1 %v3429_v30 }
 0xf03   : > { %v4161_v43 = vadd.f32 %v3736_v8, %v2370_v36  ;;  %v2375_v29 = vsel %vm1034_vm0, %v4155_v57, 0.0  ;;  %v3430_v36 = vld [vmem:[%s3695_s21 + $0x10] sm:$0xff]   ;;  %3275 = vmatprep.subr.bf16.mxu1 %v3548_v37 }
 0xf04   : > { %2376 = vadd.xlane.f32.xlu0 %v2375_v29  ;;  %v3431_v29 = vld [vmem:[%s4284_s15 + $0x20] sm:$0xff]  }
 0xf05   : > { %v2378_v14 = vsel %vm1034_vm0, %v4161_v43, 0.0 }
 0xf06   : > { %2379 = vadd.xlane.f32.xlu1 %v2378_v14  ;;  %3276 = vmatpush3.bf16.msra.mxu1 %v3431_v29  ;;  %v3432_v14 = vld [vmem:[%s3695_s21 + $0x18] sm:$0xff]  }
 0xf07   : > { %3277 = vmatprep.subr.bf16.mxu1 %v3548_v37 }
 0xf08   : > { %2633 = vadd.xlane.f32.xlu0 %v2632_v32  ;;  %v3433_v32 = vld [vmem:[%s4284_s15 + $0x28] sm:$0xff]  }
 0xf0a   : > { %3278 = vmatpush3.bf16.msra.mxu1 %v3433_v32 }
 0xf0b   : > { %3279 = vmatprep.subr.bf16.mxu1 %v3548_v37 }
 0xf91   : > { %v2377_v6 = vpop.xlane.xlu0 %2376 }
 0xf92   : > { %v2381_v58 = vmul.f32 0.03125, %v2377_v6  ;;  %v3434_v6 = vld [vmem:[%s3695_s21 + $0x20] sm:$0xff]  }
 0xf93   : > { %v2380_v62 = vpop.xlane.xlu1 %2379 }
 0xf94   : > { %v2383_v9 = vsub.f32 %v4155_v57, %v2381_v58  ;;  %v2382_v63 = vmul.f32 0.03125, %v2380_v62  ;;  %v3435_v58 = vld [vmem:[%s4284_s15 + $0x30] sm:$0xff]   ;;  %v3436_v62 = vld [vmem:[%s3695_s21 + $0x28] sm:$0xff]  }
 0xf95   : > { %v2634_v8 = vpop.xlane.xlu0 %2633  ;;  %3280 = vmatpush3.bf16.msra.mxu1 %v3435_v58 }
 0xf96   : > { %v2384_v31 = vsub.f32 %v4161_v43, %v2382_v63  ;;  %v2635_v0 = vmul.f32 0.03125, %v2634_v8  ;;  %v2385_v1 = vmul.f32 %v2383_v9, %v2383_v9  ;;  %3281 = vmatprep.subr.bf16.mxu1 %v3548_v37  ;;  %v3438_v63 = vld [vmem:[%s3695_s21 + $0x30] sm:$0xff]   ;;  %v3439_v8 = vld [vmem:[%s3695_s21 + $0x38] sm:$0xff]  }
 0xf98   : > { %v2636_v2 = vsub.f32 %v4158_v41, %v2635_v0  ;;  %v2387_v3 = vsel %vm1034_vm0, %v2385_v1, 0.0  ;;  %v2386_v45 = vmul.f32 %v2384_v31, %v2384_v31 }
 0xf99   : > { %2388 = vadd.xlane.f32.xlu0 %v2387_v3 }
 0xf9a   : > { %v2637_v42 = vmul.f32 %v2636_v2, %v2636_v2  ;;  %v2390_v12 = vsel %vm1034_vm0, %v2386_v45, 0.0 }
 0xf9c   : > { %v2638_v59 = vsel %vm1034_vm0, %v2637_v42, 0.0 }
 0xf9d   : > { %2639 = vadd.xlane.f32.xlu1 %v2638_v59  ;;  %2391 = vadd.xlane.f32.xlu0 %v2390_v12 }
 0xfae   : > { %2651 = vrot.lane.b32.xlu1 %v2649_v49, %s3552_s26  ;;  %s4283_s26 = sld [smem:[#allocation12_spill]] }
 0xfb2   : > { %2656 = vrot.lane.b32.xlu1 %v4151_v51, %s3550_s22 }
 0xfb3   : > { %2404 = vrot.lane.b32.xlu0 %v3813_v16, %s3551_s23 }
 0xfb4   : > { %v3422_v38 = vld [vmem:[%s4283_s26] sm:$0xff]   ;;  %v3423_v54 = vld [vmem:[%s4283_s26 + $0x8] sm:$0xff]  }
0x1026   : > { %v2389_v10 = vpop.xlane.xlu0 %2388 }
0x1027   : > { %v2393_v11 = vmul.f32 0.03125, %v2389_v10 }
0x1029   : > { %v2395_v17 = vadd.f32 1e-06, %v2393_v11 }
0x102a   : > { %v2392_v21 = vpop.xlane.xlu0 %2391  ;;  %v2640_v25 = vpop.xlane.xlu1 %2639 }
0x102b   : > { %3498 = vrsqrt.f32 %v2395_v17  ;;  %v2394_v27 = vmul.f32 0.03125, %v2392_v21  ;;  %v2641_v19 = vmul.f32 0.03125, %v2640_v25 }
0x102d   : > { %v2396_v28 = vadd.f32 1e-06, %v2394_v27  ;;  %v2642_v23 = vadd.f32 1e-06, %v2641_v19 }
0x102e   : > { %v2405_v24 = vpop.permute.xlu0 %2404  ;;  %v2652_v18 = vpop.permute.xlu1 %2651 }
0x102f   : > { %3500 = vrsqrt.f32 %v2396_v28 }
0x1030   : > { %3502 = vrsqrt.f32 %v2642_v23 }
0x1032   : > { %v2657_v46 = vpop.permute.xlu1 %2656 }
0x1035   : > { %v3499_v16 = vpop.eup %3498 }
0x1036   : > { %v2399_v26 = vmul.f32 %v3499_v16, %v2383_v9  ;;  %v3437_v9 = vld [vmem:[%s4284_s15 + $0x38] sm:$0xff]  }
0x1037   : > { %3282 = vmatpush3.bf16.msra.mxu1 %v3437_v9 }
0x1038   : > { %v2401_v7 = vmul.f32 %v2399_v26, %v3800_v60 }
0x1039   : > { %v3501_v13 = vpop.eup %3500 }
0x103a   : > { %v3503_v33 = vpop.eup %3502  ;;  %v2400_v20 = vmul.f32 %v3501_v13, %v2384_v31  ;;  %v2407_v40 = vadd.f32 %v2405_v24, %v2401_v7  ;;  %v2414_v31 = vld [vmem:[%s4285_s16] sm:$0x1]  ;;  %s940_s16 = scalar_lea.vmem %s3705_s27, %s3080_s0 }
0x103b   : > { %v2644_v22 = vmul.f32 %v3503_v33, %v2636_v2  ;;  %v2415_v0 = vunpack.c.l.bf16 %v2414_v31  ;;  %v2665_v2 = vld [vmem:[%s4286_s11] sm:$0x1]  ;;  %s4287_s11 = sld [smem:[#allocation11_spill]] }
0x103c   : > { %v2402_v15 = vmul.f32 %v2400_v20, %v3800_v60  ;;  %v2666_v59 = vunpack.c.l.bf16 %v2665_v2 }
0x103d   : > { %v2654_v47 = vmul.f32 %v2652_v18, %v2644_v22  ;;  %v2419_v1 = vrot.slane %v2415_v0, %v3788_v44  ;;  %v2752_v0 = vld [vmem:[%s3700_s12] sm:$0x1] }
0x103e   : > { %v2408_v34 = vadd.f32 %v2405_v24, %v2402_v15  ;;  %v2670_v11 = vrot.slane %v2666_v59, %v3788_v44 }
0x103f   : > { %v2659_v60 = vadd.f32 %v2657_v46, %v2654_v47 }
0x1040   : > { %v2409_v39 = vpack.c.bf16 %v2408_v34, %v2407_v40 }
0x1041   : > { %v2660_v52 = vpack.c.bf16 %v2659_v60, %v2659_v60 }
0x1042   : > { %3264 = vmatmul.mubr.msk.bf16.vlgmr.msra.gmra.mrb[24].mxu0 %vm1034_vm0, %v2409_v39 }
0x1043   : > { %3288 = vmatpush3.bf16.msra.mxu0 %v3422_v38  ;;  %3291 = vmatprep.mubr.msk.bf16.mxu0 %vm3549_vm1, %v3548_v37 }
0x1044   : > { %3289 = vmatprep.subr.bf16.mxu0 %v3548_v37 }
0x1047   : > { %3290 = vmatpush3.bf16.msra.mxu0 %v3423_v54 }
0x1048   : > { %3295 = vmatprep.subr.bf16.mxu0 %v3548_v37 }
0x104a   : > { %3292 = vmatmul.mubr.msk.bf16.vlgmr.msra.gmra.mrb[28].mxu0 %vm1034_vm0, %v2660_v52 }
0x104b   : > { %3311 = vmatprep.mubr.msk.bf16.mxu0 %vm3549_vm1, %v3548_v37  ;;  %3296 = vmatpush3.bf16.msra.mxu0 %v3426_v55 }
0x104c   : > { %3297 = vmatprep.subr.bf16.mxu0 %v3548_v37 }
0x104f   : > { %3298 = vmatpush3.bf16.msra.mxu0 %v3428_v56  ;;  %v2511_v56 = vld [vmem:[%s4287_s11] sm:$0x1] }
0x1050   : > { %3299 = vmatprep.subr.bf16.mxu0 %v3548_v37  ;;  %v2512_v30 = vunpack.c.l.bf16 %v2511_v56 }
0x1053   : > { %3300 = vmatpush3.bf16.msra.mxu0 %v3430_v36  ;;  %v2516_v36 = vrot.slane %v2512_v30, %v3788_v44 }
0x1054   : > { %3301 = vmatprep.subr.bf16.mxu0 %v3548_v37 }
0x1057   : > { %3302 = vmatpush3.bf16.msra.mxu0 %v3432_v14 }
0x1058   : > { %3303 = vmatprep.subr.bf16.mxu0 %v3548_v37 }
0x105b   : > { %3304 = vmatpush3.bf16.msra.mxu0 %v3434_v6 }
0x105c   : > { %3305 = vmatprep.subr.bf16.mxu0 %v3548_v37 }
0x105f   : > { %3306 = vmatpush3.bf16.msra.mxu0 %v3436_v62 }
0x1060   : > { %3307 = vmatprep.subr.bf16.mxu0 %v3548_v37 }
0x1063   : > { %3308 = vmatpush3.bf16.msra.mxu0 %v3438_v63 }
0x1064   : > { %3309 = vmatprep.subr.bf16.mxu0 %v3548_v37 }
0x1067   : > { %3310 = vmatpush3.bf16.msra.mxu0 %v3439_v8 }
0x1115   : > { %v2469_v3 = vpop.f32.mrb[24].mxu0 }
0x1116   : > { %v2470_v45 = vadd.f32 %v2469_v3, %v2419_v1  ;;  %v3265_v42 = vpop.f32.mrb[25].mxu0 }
0x1117   : > { %v2472_v12 = vpop.f32.mrb[26].mxu0 }
0x1118   : > { %v2476_v35 = vmul.f32 %v2470_v45, %v2470_v45  ;;  %v2473_v49 = vadd.f32 %v2472_v12, %v2419_v1  ;;  %v3266_v4 = vpop.f32.mrb[27].mxu0  ;;  %v2753_v1 = vunpack.c.l.bf16 %v2752_v0 }
0x111a   : > { %v2478_v5 = vmul.f32 %v2476_v35, %v2470_v45  ;;  %v2477_v10 = vmul.f32 %v2473_v49, %v2473_v49  ;;  %v2757_v3 = vrot.slane %v2753_v1, %v3788_v44 }
0x111c   : > { %v2480_v17 = vmul.f32 0.044715, %v2478_v5  ;;  %v2479_v37 = vmul.f32 %v2477_v10, %v2473_v49 }
0x111d   : > { %v2720_v21 = vpop.f32.mrb[28].mxu0 }
0x111e   : > { %v2482_v25 = vadd.f32 %v2480_v17, %v2470_v45  ;;  %v2481_v27 = vmul.f32 0.044715, %v2479_v37  ;;  %v2721_v19 = vadd.f32 %v2720_v21, %v2670_v11  ;;  %v3293_v28 = vpop.f32.mrb[29].mxu0 }
0x111f   : > { %v2723_v23 = vpop.f32.mrb[30].mxu0 }
0x1120   : > { %v2484_v16 = vmul.f32 0.7978846, %v2482_v25  ;;  %v2483_v26 = vadd.f32 %v2481_v27, %v2473_v49  ;;  %v2726_v13 = vmul.f32 %v2721_v19, %v2721_v19  ;;  %v3294_v33 = vpop.f32.mrb[31].mxu0 }
0x1122   : > { %3504 = vtanh.f32 %v2484_v16  ;;  %v2485_v20 = vmul.f32 0.7978846, %v2483_v26  ;;  %v2727_v7 = vmul.f32 %v2726_v13, %v2721_v19 }
0x1124   : > { %3506 = vtanh.f32 %v2485_v20  ;;  %v2728_v15 = vmul.f32 0.044715, %v2727_v7 }
0x1126   : > { %v2729_v22 = vadd.f32 %v2728_v15, %v2721_v19 }
0x1128   : > { %v2730_v24 = vmul.f32 0.7978846, %v2729_v22 }
0x112a   : > { %3508 = vtanh.f32 %v2730_v24 }
0x112c   : > { %v3505_v18 = vpop.eup %3504 }
0x112d   : > { %v2488_v40 = vadd.f32 1.0, %v3505_v18 }
0x112e   : > { %v3507_v34 = vpop.eup %3506 }
0x112f   : > { %v2490_v38 = vmul.f32 0.5, %v2488_v40  ;;  %v2489_v39 = vadd.f32 1.0, %v3507_v34 }
0x1131   : > { %v2491_v47 = vmul.f32 0.5, %v2489_v39  ;;  %v2492_v46 = vmul.f32 %v2490_v38, %v2470_v45 }
0x1133   : > { %v2493_v54 = vmul.f32 %v2491_v47, %v2473_v49 }
0x1134   : > { %v3509_v60 = vpop.eup %3508 }
0x1135   : > { %v2494_v52 = vpack.c.bf16 %v2493_v54, %v2492_v46  ;;  %v2732_v53 = vadd.f32 1.0, %v3509_v60 }
0x1137   : > { %3284 = vmatmul.mubr.bf16.vlgmr.msra.gmra.mrb[32].mxu1 %v2494_v52  ;;  %v2733_v48 = vmul.f32 0.5, %v2732_v53 }
0x1139   : > { %v2734_v55 = vmul.f32 %v2733_v48, %v2721_v19 }
0x113b   : > { %v2735_v50 = vpack.c.bf16 %v2734_v55, %v2734_v55 }
0x113d   : > { %3312 = vmatmul.mubr.bf16.vlgmr.msra.gmra.mrb[32].mxu0 %v2735_v50 }
0x120a   : > { %v2599_v29 = vpop.f32.mrb[32].mxu1 }
0x120b   : > { %v2600_v14 = vadd.f32 %v2599_v29, %v2516_v36  ;;  %v3285_v32 = vpop.f32.mrb[33].mxu1 }
0x120c   : > { %v2602_v6 = vpop.f32.mrb[34].mxu1 }
0x120d   : > { %v2603_v58 = vadd.f32 %v2602_v6, %v2516_v36  ;;  %2608 = vrot.lane.b32.xlu1 %v2600_v14, %s3551_s23  ;;  %v3286_v62 = vpop.f32.mrb[35].mxu1 }
0x120f   : > { %2610 = vrot.lane.b32.xlu0 %v2603_v58, %s3551_s23 }
0x1210   : > { %v2840_v9 = vpop.f32.mrb[32].mxu0 }
0x1211   : > { %v3313_v63 = vpop.f32.mrb[33].mxu0  ;;  %v2841_v12 = vadd.f32 %v2840_v9, %v2757_v3 }
0x1212   : > { %v2843_v8 = vpop.f32.mrb[34].mxu0 }
0x1213   : > { %v3314_v31 = vpop.f32.mrb[35].mxu0 }
0x127f   : > { %v2609_v2 = vpop.permute.xlu1 %2608 }
0x1280   : > { %v2614_v45 = vmul.f32 %v2609_v2, %v3806_v61 }
0x1281   : > { %v2611_v42 = vpop.permute.xlu0 %2610 }
0x1282   : > { %v2615_v59 = vmul.f32 %v2611_v42, %v3806_v61  ;;  %2618 = vrot.lane.b32.xlu1 %v2614_v45, %s3550_s22 }
0x1284   : > { %2620 = vrot.lane.b32.xlu0 %v2615_v59, %s3550_s22 }
0x1286   : > { %2847 = vrot.lane.b32.xlu1 %v2841_v12, %s3550_s22  ;;  %s4288_s22 = sshll.u32 %s4290_s10, 2 }
0x1287   : > { %s944_s11 = scalar_lea.vmem %s3710_s4, %s4288_s22 }
0x12f4   : > { %v2619_v35 = vpop.permute.xlu1 %2618 }
0x12f5   : > { %v2624_v49 = vadd.f32 %v2619_v35, %v4155_v57 }
0x12f6   : > { %v2621_v44 = vpop.permute.xlu0 %2620 }
0x12f7   : > { %v3082_v4 = vpack.c.bf16 %v2624_v49, %v2624_v49  ;;  %v2625_v5 = vadd.f32 %v2621_v44, %v4161_v43 }
0x12f8   : > { %v2848_v61 = vpop.permute.xlu1 %2847 }
0x12f9   : > { %2865 = vst.msk [vmem:[%s940_s16] sm:$0xf] %vm2864_vm5, %v3082_v4  ;;  %v3083_v10 = vpack.c.bf16 %v2625_v5, %v2625_v5  ;;  %v2850_v11 = vmul.f32 %v2848_v61, %v4151_v51 }
0x12fb   : > { %2866 = vst.msk [vmem:[%s940_s16 + $0x4] sm:$0xf] %vm2864_vm5, %v3083_v10  ;;  %2852 = vrot.lane.b32.xlu0 %v2850_v11, %s3551_s23 }
0x136d   : > { %v2853_v17 = vpop.permute.xlu0 %2852 }
0x136e   : > { %v2855_v37 = vadd.f32 %v2853_v17, %v4158_v41 }
0x1370   : > { %v2867_v57 = vpack.c.bf16 %v2855_v37, %v2855_v37 }
0x1372   : > { %2868 = vst.msk [vmem:[%s944_s11] sm:$0xf] %vm2864_vm5, %v2867_v57 }
0x1373 PF: > { %s70_s7 = sadd.s32 1, %s3516_s7  }
0x1374   : > { %p67_p4 = scmp.ge.s32.totalorder %s70_s7, 4  }
0x1376   :  { %69 = sbr.rel (!%p67_p4) target bundleno = 46 (0x2e), region = 209 }

</bundles_post_ra>
